<compile_context>
chip_gen: v5e
topology: v5e:2x2
jax: 0.10.0
libtpu: 0.0.40
codegen_flags: <defaults>
</compile_context>

<pallas_src>
import math
import jax
import jax.numpy as jnp
from jax.experimental import pallas as pl
from jax.experimental.pallas import tpu as pltpu  # noqa: F401  (kept for TPU-specific params if needed)

# ---- small, module-consistent shapes -----------------------------------------
B, S, D = 2, 8, 32          # batch, seq_len, hidden_dim
H = 4                       # n_heads
HW = D // H                 # head width
L = 4                       # n_layers
N_TOP = 2                   # n_top_layers
VOCAB = 50
MAX_LEN = 16
EPS = 1e-12
FEAT_START = L - N_TOP      # layer index whose output initializes `features`
BS = B * S
INV_SQRT2 = 0.7071067811865476


def _layernorm(y, g, b):
    u = jnp.mean(y, axis=-1, keepdims=True)
    s = jnp.mean(jnp.square(y - u), axis=-1, keepdims=True)
    return g * ((y - u) * jax.lax.rsqrt(s + EPS)) + b


def _gelu(x):
    return x * 0.5 * (1.0 + jax.lax.erf(x * INV_SQRT2))


# ---- Pallas kernel: the whole forward pass (embedding LN + L blocks + feature sum) ----
def transformer_kernel(e_ref, eg_ref, eb_ref,
                       wq_ref, bq_ref, wk_ref, bk_ref, wv_ref, bv_ref,
                       wo_ref, bo_ref, g1_ref, be1_ref,
                       w1_ref, b1_ref, w2_ref, b2_ref, g2_ref, be2_ref,
                       out_ref):
    f32 = jnp.float32
    bf16 = jnp.bfloat16

    def linear(inp, w, b):
        # inp (BS, Din) f32, w (Din, Dout) bf16, b (1, Dout) f32 -> (BS, Dout) f32
        y = jnp.dot(inp.astype(bf16), w, preferred_element_type=f32)
        return y + b

    # BertEmbeddingLayer: LayerNorm of (tok + pos + seg); dropout = identity.
    x = _layernorm(e_ref[...], eg_ref[...], eb_ref[...])          # (BS, D) f32
    scale = f32(1.0 / math.sqrt(HW))
    feat = None

    for l in range(L):                                            # unrolled layer loop
        # ---- multi-headed self attention (values only, no scratch) ----
        q = linear(x, wq_ref[l], bq_ref[l]).reshape(B, S, D)
        k = linear(x, wk_ref[l], bk_ref[l]).reshape(B, S, D)
        v = linear(x, wv_ref[l], bv_ref[l]).reshape(B, S, D)
        qb = (q * scale).astype(bf16)                             # fold 1/sqrt(HW) into q
        kb = k.astype(bf16)
        vb = v.astype(bf16)
        wo_l = wo_ref[l]                                          # (D, D) f32

        acc = None
        for h in range(H):
            sl = slice(h * HW, (h + 1) * HW)
            sc = jnp.einsum('bsw,btw->bst', qb[:, :, sl], kb[:, :, sl],
                            preferred_element_type=f32)           # (B, S, S) f32
            sc = sc - jnp.max(sc, axis=-1, keepdims=True)
            pe = jnp.exp(sc)
            pr = pe * pl.reciprocal(jnp.sum(pe, axis=-1, keepdims=True), approx=True)
            ctx_h = jnp.einsum('bst,btw->bsw', pr.astype(bf16), vb[:, :, sl],
                               preferred_element_type=f32)        # (B, S, HW) f32
            # merge_last + output projection folded: attn_out = sum_h ctx_h @ Wo[h*HW:(h+1)*HW, :]
            contrib = jnp.dot(ctx_h.reshape(BS, HW).astype(bf16),
                              wo_l[sl, :].astype(bf16),
                              preferred_element_type=f32)         # (BS, D) f32
            acc = contrib if acc is None else acc + contrib
        attn_out = acc + bo_ref[l]

        # ---- residual + norm1 ----
        h1 = _layernorm(x + attn_out, g1_ref[l], be1_ref[l])

        # ---- position-wise feed forward + residual + norm2 ----
        ff = _gelu(linear(h1, w1_ref[l], b1_ref[l]))
        ff = linear(ff, w2_ref[l], b2_ref[l])
        x = _layernorm(h1 + ff, g2_ref[l], be2_ref[l])

        # ---- feature accumulation over top N layers ----
        if l == FEAT_START:
            feat = x
        elif l > FEAT_START:
            feat = feat + x

    out_ref[...] = feat


# ---- wrapper ------------------------------------------------------------------
def transformer_layer(tokens_ids, segment_ids, p):
    # Embedding gathers (glue, plain JAX); activations presented as a 2-D (B*S, D) slab.
    pos_ids = jnp.arange(S, dtype=jnp.int32)
    e = (p['tok'][tokens_ids] + p['pos'][pos_ids][None, :, :]
         + p['seg'][segment_ids]).astype(jnp.float32)
    e2 = e.reshape(BS, D)
    bf16 = jnp.bfloat16

    out2 = pl.pallas_call(
        transformer_kernel,
        out_shape=jax.ShapeDtypeStruct((BS, D), jnp.float32),
        # No grid / BlockSpecs: every operand is a whole array resident in VMEM
        # (total weights << 1 MiB, fits comfortably on v5e/v6e/v7x).
    )(e2, p['eg'], p['eb'],
      p['wq'].astype(bf16), p['bq'],
      p['wk'].astype(bf16), p['bk'],
      p['wv'].astype(bf16), p['bv'],
      p['wo'], p['bo'],                       # wo stays f32: 8-row head slices are tile-aligned, cast in-kernel
      p['g1'], p['be1'],
      p['w1'].astype(bf16), p['b1'],
      p['w2'].astype(bf16), p['b2'],
      p['g2'], p['be2'])
    return out2.reshape(B, S, D)


# ---- pure-JAX f32 reference (for correctness check) -----------------------------
def reference(tokens_ids, segment_ids, p):
    e = (p['tok'][tokens_ids] + p['pos'][jnp.arange(S)][None, :, :]
         + p['seg'][segment_ids]).astype(jnp.float32)
    h = _layernorm(e, p['eg'], p['eb'])
    feats = None
    for l in range(L):
        def lin(x, w, b):
            return x @ w + b
        q = lin(h, p['wq'][l], p['bq'][l])
        k = lin(h, p['wk'][l], p['bk'][l])
        v = lin(h, p['wv'][l], p['bv'][l])
        qh = q.reshape(B, S, H, HW).transpose(0, 2, 1, 3)
        kh = k.reshape(B, S, H, HW).transpose(0, 2, 1, 3)
        vh = v.reshape(B, S, H, HW).transpose(0, 2, 1, 3)
        sc = (qh @ kh.transpose(0, 1, 3, 2)) / jnp.sqrt(jnp.float32(HW))
        pr = jax.nn.softmax(sc, axis=-1)
        ctx = (pr @ vh).transpose(0, 2, 1, 3).reshape(B, S, D)
        a = lin(ctx, p['wo'][l], p['bo'][l])
        h1 = _layernorm(h + a, p['g1'][l], p['be1'][l])
        ff = lin(h1, p['w1'][l], p['b1'][l])
        ff = _gelu(ff)
        ff = lin(ff, p['w2'][l], p['b2'][l])
        h = _layernorm(h1 + ff, p['g2'][l], p['be2'][l])
        if l == FEAT_START:
            feats = h
        elif l > FEAT_START:
            feats = feats + h
    return feats


# ---- deterministic parameter init ----------------------------------------------
def init_params(key):
    ks = jax.random.split(key, 16)

    def nrm(k, shape):
        return (0.02 * jax.random.normal(k, shape)).astype(jnp.float32)

    return {
        'tok': nrm(ks[0], (VOCAB, D)).at[0].set(0.0),   # padding_idx=0
        'pos': nrm(ks[1], (MAX_LEN, D)),
        'seg': nrm(ks[2], (2, D)),
        'eg': jnp.ones((1, D), jnp.float32),
        'eb': jnp.zeros((1, D), jnp.float32),
        'wq': nrm(ks[3], (L, D, D)), 'bq': nrm(ks[4], (L, 1, D)),
        'wk': nrm(ks[5], (L, D, D)), 'bk': nrm(ks[6], (L, 1, D)),
        'wv': nrm(ks[7], (L, D, D)), 'bv': nrm(ks[8], (L, 1, D)),
        'wo': nrm(ks[9], (L, D, D)), 'bo': nrm(ks[10], (L, 1, D)),
        'g1': jnp.ones((L, 1, D), jnp.float32), 'be1': jnp.zeros((L, 1, D), jnp.float32),
        'w1': nrm(ks[11], (L, D, 4 * D)), 'b1': nrm(ks[12], (L, 1, 4 * D)),
        'w2': nrm(ks[13], (L, 4 * D, D)), 'b2': nrm(ks[14], (L, 1, D)),
        'g2': jnp.ones((L, 1, D), jnp.float32), 'be2': jnp.zeros((L, 1, D), jnp.float32),
    }


if __name__ == "__main__":
    key = jax.random.PRNGKey(0)
    k_tok, k_seg, k_par = jax.random.split(key, 3)
    tokens_ids = jax.random.randint(k_tok, (B, S), 0, VOCAB, dtype=jnp.int32)
    segment_ids = jax.random.randint(k_seg, (B, S), 0, 2, dtype=jnp.int32)
    params = init_params(k_par)

    out = jax.block_until_ready(transformer_layer(tokens_ids, segment_ids, params))
    ref = jax.block_until_ready(reference(tokens_ids, segment_ids, params))

    assert out.shape == (B, S, D)
    # Kernel uses bf16 MXU operands + approx reciprocal; compare vs f32 reference at a
    # correspondingly realistic tolerance.
    assert jnp.allclose(out, ref, atol=1e-2, rtol=1e-2), "mismatch vs reference"

    print("KERNEL_OK")
</pallas_src>

<mosaic_0001>
module attributes {stable_mosaic.version = 11 : i64} {
  func.func @transformer_kernel(%arg0: memref<16x32xf32, #tpu.memory_space<vmem>>, %arg1: memref<1x32xf32, #tpu.memory_space<vmem>>, %arg2: memref<1x32xf32, #tpu.memory_space<vmem>>, %arg3: memref<4x32x32xbf16, #tpu.memory_space<vmem>>, %arg4: memref<4x1x32xf32, #tpu.memory_space<vmem>>, %arg5: memref<4x32x32xbf16, #tpu.memory_space<vmem>>, %arg6: memref<4x1x32xf32, #tpu.memory_space<vmem>>, %arg7: memref<4x32x32xbf16, #tpu.memory_space<vmem>>, %arg8: memref<4x1x32xf32, #tpu.memory_space<vmem>>, %arg9: memref<4x32x32xf32, #tpu.memory_space<vmem>>, %arg10: memref<4x1x32xf32, #tpu.memory_space<vmem>>, %arg11: memref<4x1x32xf32, #tpu.memory_space<vmem>>, %arg12: memref<4x1x32xf32, #tpu.memory_space<vmem>>, %arg13: memref<4x32x128xbf16, #tpu.memory_space<vmem>>, %arg14: memref<4x1x128xf32, #tpu.memory_space<vmem>>, %arg15: memref<4x128x32xbf16, #tpu.memory_space<vmem>>, %arg16: memref<4x1x32xf32, #tpu.memory_space<vmem>>, %arg17: memref<4x1x32xf32, #tpu.memory_space<vmem>>, %arg18: memref<4x1x32xf32, #tpu.memory_space<vmem>>, %arg19: memref<16x32xf32, #tpu.memory_space<vmem>>) attributes {dimension_semantics = [], scalar_prefetch = 0 : i64, scratch_operands = 0 : i64, tpu.core_type = #tpu.core_type<tc>} {
    %c0 = arith.constant 0 : index
    %c0_0 = arith.constant 0 : index
    %0 = vector.load %arg0[%c0, %c0_0] : memref<16x32xf32, #tpu.memory_space<vmem>>, vector<16x32xf32>
    %c0_1 = arith.constant 0 : index
    %c0_2 = arith.constant 0 : index
    %1 = vector.load %arg1[%c0_1, %c0_2] : memref<1x32xf32, #tpu.memory_space<vmem>>, vector<1x32xf32>
    %c0_3 = arith.constant 0 : index
    %c0_4 = arith.constant 0 : index
    %2 = vector.load %arg2[%c0_3, %c0_4] : memref<1x32xf32, #tpu.memory_space<vmem>>, vector<1x32xf32>
    %cst = arith.constant dense<0.000000e+00> : vector<16xf32>
    %3 = vector.multi_reduction <add>, %0, %cst [1] : vector<16x32xf32> to vector<16xf32>
    %4 = vector.shape_cast %3 : vector<16xf32> to vector<16x1xf32>
    %cst_5 = arith.constant 3.200000e+01 : f32
    %5 = vector.broadcast %cst_5 : f32 to vector<16x1xf32>
    %6 = arith.divf %4, %5 : vector<16x1xf32>
    %7 = vector.broadcast %6 : vector<16x1xf32> to vector<16x32xf32>
    %8 = arith.subf %0, %7 : vector<16x32xf32>
    %9 = arith.mulf %8, %8 : vector<16x32xf32>
    %cst_6 = arith.constant dense<0.000000e+00> : vector<16xf32>
    %10 = vector.multi_reduction <add>, %9, %cst_6 [1] : vector<16x32xf32> to vector<16xf32>
    %11 = vector.shape_cast %10 : vector<16xf32> to vector<16x1xf32>
    %cst_7 = arith.constant 3.200000e+01 : f32
    %12 = vector.broadcast %cst_7 : f32 to vector<16x1xf32>
    %13 = arith.divf %11, %12 : vector<16x1xf32>
    %14 = vector.broadcast %6 : vector<16x1xf32> to vector<16x32xf32>
    %15 = arith.subf %0, %14 : vector<16x32xf32>
    %cst_8 = arith.constant 9.99999996E-13 : f32
    %16 = vector.broadcast %cst_8 : f32 to vector<16x1xf32>
    %17 = arith.addf %13, %16 : vector<16x1xf32>
    %18 = math.rsqrt %17 : vector<16x1xf32>
    %19 = vector.broadcast %18 : vector<16x1xf32> to vector<16x32xf32>
    %20 = arith.mulf %15, %19 : vector<16x32xf32>
    %21 = vector.broadcast %1 : vector<1x32xf32> to vector<16x32xf32>
    %22 = arith.mulf %21, %20 : vector<16x32xf32>
    %23 = vector.broadcast %2 : vector<1x32xf32> to vector<16x32xf32>
    %24 = arith.addf %22, %23 : vector<16x32xf32>
    %c0_9 = arith.constant 0 : index
    %c0_10 = arith.constant 0 : index
    %c0_11 = arith.constant 0 : index
    %25 = vector.load %arg3[%c0_9, %c0_10, %c0_11] : memref<4x32x32xbf16, #tpu.memory_space<vmem>>, vector<1x32x32xbf16>
    %26 = vector.shape_cast %25 : vector<1x32x32xbf16> to vector<32x32xbf16>
    %c0_12 = arith.constant 0 : index
    %c0_13 = arith.constant 0 : index
    %c0_14 = arith.constant 0 : index
    %27 = vector.load %arg4[%c0_12, %c0_13, %c0_14] : memref<4x1x32xf32, #tpu.memory_space<vmem>>, vector<1x1x32xf32>
    %28 = vector.shape_cast %27 : vector<1x1x32xf32> to vector<1x32xf32>
    %29 = arith.truncf %24 : vector<16x32xf32> to vector<16x32xbf16>
    %cst_15 = arith.constant dense<0.000000e+00> : vector<16x32xf32>
    %30 = tpu.matmul %29, %26, %cst_15 {dimension_numbers = #tpu.dot_dimension_numbers<[1], [0], [0], [1], [0, 0, 1, 1], [], []>} : vector<16x32xbf16>, vector<32x32xbf16>, vector<16x32xf32> -> vector<16x32xf32>
    %31 = vector.broadcast %28 : vector<1x32xf32> to vector<16x32xf32>
    %32 = arith.addf %30, %31 : vector<16x32xf32>
    %33 = vector.shape_cast %32 : vector<16x32xf32> to vector<2x8x32xf32>
    %c0_16 = arith.constant 0 : index
    %c0_17 = arith.constant 0 : index
    %c0_18 = arith.constant 0 : index
    %34 = vector.load %arg5[%c0_16, %c0_17, %c0_18] : memref<4x32x32xbf16, #tpu.memory_space<vmem>>, vector<1x32x32xbf16>
    %35 = vector.shape_cast %34 : vector<1x32x32xbf16> to vector<32x32xbf16>
    %c0_19 = arith.constant 0 : index
    %c0_20 = arith.constant 0 : index
    %c0_21 = arith.constant 0 : index
    %36 = vector.load %arg6[%c0_19, %c0_20, %c0_21] : memref<4x1x32xf32, #tpu.memory_space<vmem>>, vector<1x1x32xf32>
    %37 = vector.shape_cast %36 : vector<1x1x32xf32> to vector<1x32xf32>
    %38 = arith.truncf %24 : vector<16x32xf32> to vector<16x32xbf16>
    %cst_22 = arith.constant dense<0.000000e+00> : vector<16x32xf32>
    %39 = tpu.matmul %38, %35, %cst_22 {dimension_numbers = #tpu.dot_dimension_numbers<[1], [0], [0], [1], [0, 0, 1, 1], [], []>} : vector<16x32xbf16>, vector<32x32xbf16>, vector<16x32xf32> -> vector<16x32xf32>
    %40 = vector.broadcast %37 : vector<1x32xf32> to vector<16x32xf32>
    %41 = arith.addf %39, %40 : vector<16x32xf32>
    %42 = vector.shape_cast %41 : vector<16x32xf32> to vector<2x8x32xf32>
    %c0_23 = arith.constant 0 : index
    %c0_24 = arith.constant 0 : index
    %c0_25 = arith.constant 0 : index
    %43 = vector.load %arg7[%c0_23, %c0_24, %c0_25] : memref<4x32x32xbf16, #tpu.memory_space<vmem>>, vector<1x32x32xbf16>
    %44 = vector.shape_cast %43 : vector<1x32x32xbf16> to vector<32x32xbf16>
    %c0_26 = arith.constant 0 : index
    %c0_27 = arith.constant 0 : index
    %c0_28 = arith.constant 0 : index
    %45 = vector.load %arg8[%c0_26, %c0_27, %c0_28] : memref<4x1x32xf32, #tpu.memory_space<vmem>>, vector<1x1x32xf32>
    %46 = vector.shape_cast %45 : vector<1x1x32xf32> to vector<1x32xf32>
    %47 = arith.truncf %24 : vector<16x32xf32> to vector<16x32xbf16>
    %cst_29 = arith.constant dense<0.000000e+00> : vector<16x32xf32>
    %48 = tpu.matmul %47, %44, %cst_29 {dimension_numbers = #tpu.dot_dimension_numbers<[1], [0], [0], [1], [0, 0, 1, 1], [], []>} : vector<16x32xbf16>, vector<32x32xbf16>, vector<16x32xf32> -> vector<16x32xf32>
    %49 = vector.broadcast %46 : vector<1x32xf32> to vector<16x32xf32>
    %50 = arith.addf %48, %49 : vector<16x32xf32>
    %51 = vector.shape_cast %50 : vector<16x32xf32> to vector<2x8x32xf32>
    %cst_30 = arith.constant 0.353553385 : f32
    %52 = vector.broadcast %cst_30 : f32 to vector<2x8x32xf32>
    %53 = arith.mulf %33, %52 : vector<2x8x32xf32>
    %54 = arith.truncf %53 : vector<2x8x32xf32> to vector<2x8x32xbf16>
    %55 = arith.truncf %42 : vector<2x8x32xf32> to vector<2x8x32xbf16>
    %56 = arith.truncf %51 : vector<2x8x32xf32> to vector<2x8x32xbf16>
    %c0_31 = arith.constant 0 : index
    %c0_32 = arith.constant 0 : index
    %c0_33 = arith.constant 0 : index
    %57 = vector.load %arg9[%c0_31, %c0_32, %c0_33] : memref<4x32x32xf32, #tpu.memory_space<vmem>>, vector<1x32x32xf32>
    %58 = vector.shape_cast %57 : vector<1x32x32xf32> to vector<32x32xf32>
    %59 = vector.extract_strided_slice %54 {offsets = [0, 0, 0], sizes = [2, 8, 8], strides = [1, 1, 1]} : vector<2x8x32xbf16> to vector<2x8x8xbf16>
    %60 = vector.extract_strided_slice %55 {offsets = [0, 0, 0], sizes = [2, 8, 8], strides = [1, 1, 1]} : vector<2x8x32xbf16> to vector<2x8x8xbf16>
    "tpu.trace_start"() <{level = 10 : i32, message = "bsw,btw->bst"}> : () -> ()
    %cst_34 = arith.constant dense<0.000000e+00> : vector<2x8x8xf32>
    %61 = tpu.matmul %59, %60, %cst_34 {dimension_numbers = #tpu.dot_dimension_numbers<[2], [2], [1], [1], [0, 0, 0, 1, 1, 1], [0], [0]>} : vector<2x8x8xbf16>, vector<2x8x8xbf16>, vector<2x8x8xf32> -> vector<2x8x8xf32>
    "tpu.trace_stop"() : () -> ()
    %cst_35 = arith.constant dense<0xFF800000> : vector<2x8xf32>
    %62 = vector.multi_reduction <maximumf>, %61, %cst_35 [2] : vector<2x8x8xf32> to vector<2x8xf32>
    %63 = vector.shape_cast %62 : vector<2x8xf32> to vector<2x8x1xf32>
    %64 = vector.broadcast %63 : vector<2x8x1xf32> to vector<2x8x8xf32>
    %65 = arith.subf %61, %64 : vector<2x8x8xf32>
    %66 = math.exp %65 : vector<2x8x8xf32>
    %cst_36 = arith.constant dense<0.000000e+00> : vector<2x8xf32>
    %67 = vector.multi_reduction <add>, %66, %cst_36 [2] : vector<2x8x8xf32> to vector<2x8xf32>
    %68 = vector.shape_cast %67 : vector<2x8xf32> to vector<2x8x1xf32>
    %69 = tpu.reciprocal %68 {approx = true} : vector<2x8x1xf32> -> vector<2x8x1xf32>
    %70 = vector.broadcast %69 : vector<2x8x1xf32> to vector<2x8x8xf32>
    %71 = arith.mulf %66, %70 : vector<2x8x8xf32>
    %72 = arith.truncf %71 : vector<2x8x8xf32> to vector<2x8x8xbf16>
    %73 = vector.extract_strided_slice %56 {offsets = [0, 0, 0], sizes = [2, 8, 8], strides = [1, 1, 1]} : vector<2x8x32xbf16> to vector<2x8x8xbf16>
    "tpu.trace_start"() <{level = 10 : i32, message = "bst,btw->bsw"}> : () -> ()
    %cst_37 = arith.constant dense<0.000000e+00> : vector<2x8x8xf32>
    %74 = tpu.matmul %72, %73, %cst_37 {dimension_numbers = #tpu.dot_dimension_numbers<[2], [1], [1], [2], [0, 0, 0, 1, 1, 2], [0], [0]>} : vector<2x8x8xbf16>, vector<2x8x8xbf16>, vector<2x8x8xf32> -> vector<2x8x8xf32>
    "tpu.trace_stop"() : () -> ()
    %75 = vector.shape_cast %74 : vector<2x8x8xf32> to vector<16x8xf32>
    %76 = arith.truncf %75 : vector<16x8xf32> to vector<16x8xbf16>
    %77 = vector.extract_strided_slice %58 {offsets = [0, 0], sizes = [8, 32], strides = [1, 1]} : vector<32x32xf32> to vector<8x32xf32>
    %78 = arith.truncf %77 : vector<8x32xf32> to vector<8x32xbf16>
    %cst_38 = arith.constant dense<0.000000e+00> : vector<16x32xf32>
    %79 = tpu.matmul %76, %78, %cst_38 {dimension_numbers = #tpu.dot_dimension_numbers<[1], [0], [0], [1], [0, 0, 1, 1], [], []>} : vector<16x8xbf16>, vector<8x32xbf16>, vector<16x32xf32> -> vector<16x32xf32>
    %80 = vector.extract_strided_slice %54 {offsets = [0, 0, 8], sizes = [2, 8, 8], strides = [1, 1, 1]} : vector<2x8x32xbf16> to vector<2x8x8xbf16>
    %81 = vector.extract_strided_slice %55 {offsets = [0, 0, 8], sizes = [2, 8, 8], strides = [1, 1, 1]} : vector<2x8x32xbf16> to vector<2x8x8xbf16>
    "tpu.trace_start"() <{level = 10 : i32, message = "bsw,btw->bst"}> : () -> ()
    %cst_39 = arith.constant dense<0.000000e+00> : vector<2x8x8xf32>
    %82 = tpu.matmul %80, %81, %cst_39 {dimension_numbers = #tpu.dot_dimension_numbers<[2], [2], [1], [1], [0, 0, 0, 1, 1, 1], [0], [0]>} : vector<2x8x8xbf16>, vector<2x8x8xbf16>, vector<2x8x8xf32> -> vector<2x8x8xf32>
    "tpu.trace_stop"() : () -> ()
    %cst_40 = arith.constant dense<0xFF800000> : vector<2x8xf32>
    %83 = vector.multi_reduction <maximumf>, %82, %cst_40 [2] : vector<2x8x8xf32> to vector<2x8xf32>
    %84 = vector.shape_cast %83 : vector<2x8xf32> to vector<2x8x1xf32>
    %85 = vector.broadcast %84 : vector<2x8x1xf32> to vector<2x8x8xf32>
    %86 = arith.subf %82, %85 : vector<2x8x8xf32>
    %87 = math.exp %86 : vector<2x8x8xf32>
    %cst_41 = arith.constant dense<0.000000e+00> : vector<2x8xf32>
    %88 = vector.multi_reduction <add>, %87, %cst_41 [2] : vector<2x8x8xf32> to vector<2x8xf32>
    %89 = vector.shape_cast %88 : vector<2x8xf32> to vector<2x8x1xf32>
    %90 = tpu.reciprocal %89 {approx = true} : vector<2x8x1xf32> -> vector<2x8x1xf32>
    %91 = vector.broadcast %90 : vector<2x8x1xf32> to vector<2x8x8xf32>
    %92 = arith.mulf %87, %91 : vector<2x8x8xf32>
    %93 = arith.truncf %92 : vector<2x8x8xf32> to vector<2x8x8xbf16>
    %94 = vector.extract_strided_slice %56 {offsets = [0, 0, 8], sizes = [2, 8, 8], strides = [1, 1, 1]} : vector<2x8x32xbf16> to vector<2x8x8xbf16>
    "tpu.trace_start"() <{level = 10 : i32, message = "bst,btw->bsw"}> : () -> ()
    %cst_42 = arith.constant dense<0.000000e+00> : vector<2x8x8xf32>
    %95 = tpu.matmul %93, %94, %cst_42 {dimension_numbers = #tpu.dot_dimension_numbers<[2], [1], [1], [2], [0, 0, 0, 1, 1, 2], [0], [0]>} : vector<2x8x8xbf16>, vector<2x8x8xbf16>, vector<2x8x8xf32> -> vector<2x8x8xf32>
    "tpu.trace_stop"() : () -> ()
    %96 = vector.shape_cast %95 : vector<2x8x8xf32> to vector<16x8xf32>
    %97 = arith.truncf %96 : vector<16x8xf32> to vector<16x8xbf16>
    %98 = vector.extract_strided_slice %58 {offsets = [8, 0], sizes = [8, 32], strides = [1, 1]} : vector<32x32xf32> to vector<8x32xf32>
    %99 = arith.truncf %98 : vector<8x32xf32> to vector<8x32xbf16>
    %cst_43 = arith.constant dense<0.000000e+00> : vector<16x32xf32>
    %100 = tpu.matmul %97, %99, %cst_43 {dimension_numbers = #tpu.dot_dimension_numbers<[1], [0], [0], [1], [0, 0, 1, 1], [], []>} : vector<16x8xbf16>, vector<8x32xbf16>, vector<16x32xf32> -> vector<16x32xf32>
    %101 = arith.addf %79, %100 : vector<16x32xf32>
    %102 = vector.extract_strided_slice %54 {offsets = [0, 0, 16], sizes = [2, 8, 8], strides = [1, 1, 1]} : vector<2x8x32xbf16> to vector<2x8x8xbf16>
    %103 = vector.extract_strided_slice %55 {offsets = [0, 0, 16], sizes = [2, 8, 8], strides = [1, 1, 1]} : vector<2x8x32xbf16> to vector<2x8x8xbf16>
    "tpu.trace_start"() <{level = 10 : i32, message = "bsw,btw->bst"}> : () -> ()
    %cst_44 = arith.constant dense<0.000000e+00> : vector<2x8x8xf32>
    %104 = tpu.matmul %102, %103, %cst_44 {dimension_numbers = #tpu.dot_dimension_numbers<[2], [2], [1], [1], [0, 0, 0, 1, 1, 1], [0], [0]>} : vector<2x8x8xbf16>, vector<2x8x8xbf16>, vector<2x8x8xf32> -> vector<2x8x8xf32>
    "tpu.trace_stop"() : () -> ()
    %cst_45 = arith.constant dense<0xFF800000> : vector<2x8xf32>
    %105 = vector.multi_reduction <maximumf>, %104, %cst_45 [2] : vector<2x8x8xf32> to vector<2x8xf32>
    %106 = vector.shape_cast %105 : vector<2x8xf32> to vector<2x8x1xf32>
    %107 = vector.broadcast %106 : vector<2x8x1xf32> to vector<2x8x8xf32>
    %108 = arith.subf %104, %107 : vector<2x8x8xf32>
    %109 = math.exp %108 : vector<2x8x8xf32>
    %cst_46 = arith.constant dense<0.000000e+00> : vector<2x8xf32>
    %110 = vector.multi_reduction <add>, %109, %cst_46 [2] : vector<2x8x8xf32> to vector<2x8xf32>
    %111 = vector.shape_cast %110 : vector<2x8xf32> to vector<2x8x1xf32>
    %112 = tpu.reciprocal %111 {approx = true} : vector<2x8x1xf32> -> vector<2x8x1xf32>
    %113 = vector.broadcast %112 : vector<2x8x1xf32> to vector<2x8x8xf32>
    %114 = arith.mulf %109, %113 : vector<2x8x8xf32>
    %115 = arith.truncf %114 : vector<2x8x8xf32> to vector<2x8x8xbf16>
    %116 = vector.extract_strided_slice %56 {offsets = [0, 0, 16], sizes = [2, 8, 8], strides = [1, 1, 1]} : vector<2x8x32xbf16> to vector<2x8x8xbf16>
    "tpu.trace_start"() <{level = 10 : i32, message = "bst,btw->bsw"}> : () -> ()
    %cst_47 = arith.constant dense<0.000000e+00> : vector<2x8x8xf32>
    %117 = tpu.matmul %115, %116, %cst_47 {dimension_numbers = #tpu.dot_dimension_numbers<[2], [1], [1], [2], [0, 0, 0, 1, 1, 2], [0], [0]>} : vector<2x8x8xbf16>, vector<2x8x8xbf16>, vector<2x8x8xf32> -> vector<2x8x8xf32>
    "tpu.trace_stop"() : () -> ()
    %118 = vector.shape_cast %117 : vector<2x8x8xf32> to vector<16x8xf32>
    %119 = arith.truncf %118 : vector<16x8xf32> to vector<16x8xbf16>
    %120 = vector.extract_strided_slice %58 {offsets = [16, 0], sizes = [8, 32], strides = [1, 1]} : vector<32x32xf32> to vector<8x32xf32>
    %121 = arith.truncf %120 : vector<8x32xf32> to vector<8x32xbf16>
    %cst_48 = arith.constant dense<0.000000e+00> : vector<16x32xf32>
    %122 = tpu.matmul %119, %121, %cst_48 {dimension_numbers = #tpu.dot_dimension_numbers<[1], [0], [0], [1], [0, 0, 1, 1], [], []>} : vector<16x8xbf16>, vector<8x32xbf16>, vector<16x32xf32> -> vector<16x32xf32>
    %123 = arith.addf %101, %122 : vector<16x32xf32>
    %124 = vector.extract_strided_slice %54 {offsets = [0, 0, 24], sizes = [2, 8, 8], strides = [1, 1, 1]} : vector<2x8x32xbf16> to vector<2x8x8xbf16>
    %125 = vector.extract_strided_slice %55 {offsets = [0, 0, 24], sizes = [2, 8, 8], strides = [1, 1, 1]} : vector<2x8x32xbf16> to vector<2x8x8xbf16>
    "tpu.trace_start"() <{level = 10 : i32, message = "bsw,btw->bst"}> : () -> ()
    %cst_49 = arith.constant dense<0.000000e+00> : vector<2x8x8xf32>
    %126 = tpu.matmul %124, %125, %cst_49 {dimension_numbers = #tpu.dot_dimension_numbers<[2], [2], [1], [1], [0, 0, 0, 1, 1, 1], [0], [0]>} : vector<2x8x8xbf16>, vector<2x8x8xbf16>, vector<2x8x8xf32> -> vector<2x8x8xf32>
    "tpu.trace_stop"() : () -> ()
    %cst_50 = arith.constant dense<0xFF800000> : vector<2x8xf32>
    %127 = vector.multi_reduction <maximumf>, %126, %cst_50 [2] : vector<2x8x8xf32> to vector<2x8xf32>
    %128 = vector.shape_cast %127 : vector<2x8xf32> to vector<2x8x1xf32>
    %129 = vector.broadcast %128 : vector<2x8x1xf32> to vector<2x8x8xf32>
    %130 = arith.subf %126, %129 : vector<2x8x8xf32>
    %131 = math.exp %130 : vector<2x8x8xf32>
    %cst_51 = arith.constant dense<0.000000e+00> : vector<2x8xf32>
    %132 = vector.multi_reduction <add>, %131, %cst_51 [2] : vector<2x8x8xf32> to vector<2x8xf32>
    %133 = vector.shape_cast %132 : vector<2x8xf32> to vector<2x8x1xf32>
    %134 = tpu.reciprocal %133 {approx = true} : vector<2x8x1xf32> -> vector<2x8x1xf32>
    %135 = vector.broadcast %134 : vector<2x8x1xf32> to vector<2x8x8xf32>
    %136 = arith.mulf %131, %135 : vector<2x8x8xf32>
    %137 = arith.truncf %136 : vector<2x8x8xf32> to vector<2x8x8xbf16>
    %138 = vector.extract_strided_slice %56 {offsets = [0, 0, 24], sizes = [2, 8, 8], strides = [1, 1, 1]} : vector<2x8x32xbf16> to vector<2x8x8xbf16>
    "tpu.trace_start"() <{level = 10 : i32, message = "bst,btw->bsw"}> : () -> ()
    %cst_52 = arith.constant dense<0.000000e+00> : vector<2x8x8xf32>
    %139 = tpu.matmul %137, %138, %cst_52 {dimension_numbers = #tpu.dot_dimension_numbers<[2], [1], [1], [2], [0, 0, 0, 1, 1, 2], [0], [0]>} : vector<2x8x8xbf16>, vector<2x8x8xbf16>, vector<2x8x8xf32> -> vector<2x8x8xf32>
    "tpu.trace_stop"() : () -> ()
    %140 = vector.shape_cast %139 : vector<2x8x8xf32> to vector<16x8xf32>
    %141 = arith.truncf %140 : vector<16x8xf32> to vector<16x8xbf16>
    %142 = vector.extract_strided_slice %58 {offsets = [24, 0], sizes = [8, 32], strides = [1, 1]} : vector<32x32xf32> to vector<8x32xf32>
    %143 = arith.truncf %142 : vector<8x32xf32> to vector<8x32xbf16>
    %cst_53 = arith.constant dense<0.000000e+00> : vector<16x32xf32>
    %144 = tpu.matmul %141, %143, %cst_53 {dimension_numbers = #tpu.dot_dimension_numbers<[1], [0], [0], [1], [0, 0, 1, 1], [], []>} : vector<16x8xbf16>, vector<8x32xbf16>, vector<16x32xf32> -> vector<16x32xf32>
    %145 = arith.addf %123, %144 : vector<16x32xf32>
    %c0_54 = arith.constant 0 : index
    %c0_55 = arith.constant 0 : index
    %c0_56 = arith.constant 0 : index
    %146 = vector.load %arg10[%c0_54, %c0_55, %c0_56] : memref<4x1x32xf32, #tpu.memory_space<vmem>>, vector<1x1x32xf32>
    %147 = vector.shape_cast %146 : vector<1x1x32xf32> to vector<1x32xf32>
    %148 = vector.broadcast %147 : vector<1x32xf32> to vector<16x32xf32>
    %149 = arith.addf %145, %148 : vector<16x32xf32>
    %150 = arith.addf %24, %149 : vector<16x32xf32>
    %c0_57 = arith.constant 0 : index
    %c0_58 = arith.constant 0 : index
    %c0_59 = arith.constant 0 : index
    %151 = vector.load %arg11[%c0_57, %c0_58, %c0_59] : memref<4x1x32xf32, #tpu.memory_space<vmem>>, vector<1x1x32xf32>
    %152 = vector.shape_cast %151 : vector<1x1x32xf32> to vector<1x32xf32>
    %c0_60 = arith.constant 0 : index
    %c0_61 = arith.constant 0 : index
    %c0_62 = arith.constant 0 : index
    %153 = vector.load %arg12[%c0_60, %c0_61, %c0_62] : memref<4x1x32xf32, #tpu.memory_space<vmem>>, vector<1x1x32xf32>
    %154 = vector.shape_cast %153 : vector<1x1x32xf32> to vector<1x32xf32>
    %cst_63 = arith.constant dense<0.000000e+00> : vector<16xf32>
    %155 = vector.multi_reduction <add>, %150, %cst_63 [1] : vector<16x32xf32> to vector<16xf32>
    %156 = vector.shape_cast %155 : vector<16xf32> to vector<16x1xf32>
    %cst_64 = arith.constant 3.200000e+01 : f32
    %157 = vector.broadcast %cst_64 : f32 to vector<16x1xf32>
    %158 = arith.divf %156, %157 : vector<16x1xf32>
    %159 = vector.broadcast %158 : vector<16x1xf32> to vector<16x32xf32>
    %160 = arith.subf %150, %159 : vector<16x32xf32>
    %161 = arith.mulf %160, %160 : vector<16x32xf32>
    %cst_65 = arith.constant dense<0.000000e+00> : vector<16xf32>
    %162 = vector.multi_reduction <add>, %161, %cst_65 [1] : vector<16x32xf32> to vector<16xf32>
    %163 = vector.shape_cast %162 : vector<16xf32> to vector<16x1xf32>
    %cst_66 = arith.constant 3.200000e+01 : f32
    %164 = vector.broadcast %cst_66 : f32 to vector<16x1xf32>
    %165 = arith.divf %163, %164 : vector<16x1xf32>
    %166 = vector.broadcast %158 : vector<16x1xf32> to vector<16x32xf32>
    %167 = arith.subf %150, %166 : vector<16x32xf32>
    %cst_67 = arith.constant 9.99999996E-13 : f32
    %168 = vector.broadcast %cst_67 : f32 to vector<16x1xf32>
    %169 = arith.addf %165, %168 : vector<16x1xf32>
    %170 = math.rsqrt %169 : vector<16x1xf32>
    %171 = vector.broadcast %170 : vector<16x1xf32> to vector<16x32xf32>
    %172 = arith.mulf %167, %171 : vector<16x32xf32>
    %173 = vector.broadcast %152 : vector<1x32xf32> to vector<16x32xf32>
    %174 = arith.mulf %173, %172 : vector<16x32xf32>
    %175 = vector.broadcast %154 : vector<1x32xf32> to vector<16x32xf32>
    %176 = arith.addf %174, %175 : vector<16x32xf32>
    %c0_68 = arith.constant 0 : index
    %c0_69 = arith.constant 0 : index
    %c0_70 = arith.constant 0 : index
    %177 = vector.load %arg13[%c0_68, %c0_69, %c0_70] : memref<4x32x128xbf16, #tpu.memory_space<vmem>>, vector<1x32x128xbf16>
    %178 = vector.shape_cast %177 : vector<1x32x128xbf16> to vector<32x128xbf16>
    %c0_71 = arith.constant 0 : index
    %c0_72 = arith.constant 0 : index
    %c0_73 = arith.constant 0 : index
    %179 = vector.load %arg14[%c0_71, %c0_72, %c0_73] : memref<4x1x128xf32, #tpu.memory_space<vmem>>, vector<1x1x128xf32>
    %180 = vector.shape_cast %179 : vector<1x1x128xf32> to vector<1x128xf32>
    %181 = arith.truncf %176 : vector<16x32xf32> to vector<16x32xbf16>
    %cst_74 = arith.constant dense<0.000000e+00> : vector<16x128xf32>
    %182 = tpu.matmul %181, %178, %cst_74 {dimension_numbers = #tpu.dot_dimension_numbers<[1], [0], [0], [1], [0, 0, 1, 1], [], []>} : vector<16x32xbf16>, vector<32x128xbf16>, vector<16x128xf32> -> vector<16x128xf32>
    %183 = vector.broadcast %180 : vector<1x128xf32> to vector<16x128xf32>
    %184 = arith.addf %182, %183 : vector<16x128xf32>
    %cst_75 = arith.constant 5.000000e-01 : f32
    %185 = vector.broadcast %cst_75 : f32 to vector<16x128xf32>
    %186 = arith.mulf %184, %185 : vector<16x128xf32>
    %cst_76 = arith.constant 0.707106769 : f32
    %187 = vector.broadcast %cst_76 : f32 to vector<16x128xf32>
    %188 = arith.mulf %184, %187 : vector<16x128xf32>
    %189 = math.erf %188 : vector<16x128xf32>
    %cst_77 = arith.constant 1.000000e+00 : f32
    %190 = vector.broadcast %cst_77 : f32 to vector<16x128xf32>
    %191 = arith.addf %190, %189 : vector<16x128xf32>
    %192 = arith.mulf %186, %191 : vector<16x128xf32>
    %c0_78 = arith.constant 0 : index
    %c0_79 = arith.constant 0 : index
    %c0_80 = arith.constant 0 : index
    %193 = vector.load %arg15[%c0_78, %c0_79, %c0_80] : memref<4x128x32xbf16, #tpu.memory_space<vmem>>, vector<1x128x32xbf16>
    %194 = vector.shape_cast %193 : vector<1x128x32xbf16> to vector<128x32xbf16>
    %c0_81 = arith.constant 0 : index
    %c0_82 = arith.constant 0 : index
    %c0_83 = arith.constant 0 : index
    %195 = vector.load %arg16[%c0_81, %c0_82, %c0_83] : memref<4x1x32xf32, #tpu.memory_space<vmem>>, vector<1x1x32xf32>
    %196 = vector.shape_cast %195 : vector<1x1x32xf32> to vector<1x32xf32>
    %197 = arith.truncf %192 : vector<16x128xf32> to vector<16x128xbf16>
    %cst_84 = arith.constant dense<0.000000e+00> : vector<16x32xf32>
    %198 = tpu.matmul %197, %194, %cst_84 {dimension_numbers = #tpu.dot_dimension_numbers<[1], [0], [0], [1], [0, 0, 1, 1], [], []>} : vector<16x128xbf16>, vector<128x32xbf16>, vector<16x32xf32> -> vector<16x32xf32>
    %199 = vector.broadcast %196 : vector<1x32xf32> to vector<16x32xf32>
    %200 = arith.addf %198, %199 : vector<16x32xf32>
    %201 = arith.addf %176, %200 : vector<16x32xf32>
    %c0_85 = arith.constant 0 : index
    %c0_86 = arith.constant 0 : index
    %c0_87 = arith.constant 0 : index
    %202 = vector.load %arg17[%c0_85, %c0_86, %c0_87] : memref<4x1x32xf32, #tpu.memory_space<vmem>>, vector<1x1x32xf32>
    %203 = vector.shape_cast %202 : vector<1x1x32xf32> to vector<1x32xf32>
    %c0_88 = arith.constant 0 : index
    %c0_89 = arith.constant 0 : index
    %c0_90 = arith.constant 0 : index
    %204 = vector.load %arg18[%c0_88, %c0_89, %c0_90] : memref<4x1x32xf32, #tpu.memory_space<vmem>>, vector<1x1x32xf32>
    %205 = vector.shape_cast %204 : vector<1x1x32xf32> to vector<1x32xf32>
    %cst_91 = arith.constant dense<0.000000e+00> : vector<16xf32>
    %206 = vector.multi_reduction <add>, %201, %cst_91 [1] : vector<16x32xf32> to vector<16xf32>
    %207 = vector.shape_cast %206 : vector<16xf32> to vector<16x1xf32>
    %cst_92 = arith.constant 3.200000e+01 : f32
    %208 = vector.broadcast %cst_92 : f32 to vector<16x1xf32>
    %209 = arith.divf %207, %208 : vector<16x1xf32>
    %210 = vector.broadcast %209 : vector<16x1xf32> to vector<16x32xf32>
    %211 = arith.subf %201, %210 : vector<16x32xf32>
    %212 = arith.mulf %211, %211 : vector<16x32xf32>
    %cst_93 = arith.constant dense<0.000000e+00> : vector<16xf32>
    %213 = vector.multi_reduction <add>, %212, %cst_93 [1] : vector<16x32xf32> to vector<16xf32>
    %214 = vector.shape_cast %213 : vector<16xf32> to vector<16x1xf32>
    %cst_94 = arith.constant 3.200000e+01 : f32
    %215 = vector.broadcast %cst_94 : f32 to vector<16x1xf32>
    %216 = arith.divf %214, %215 : vector<16x1xf32>
    %217 = vector.broadcast %209 : vector<16x1xf32> to vector<16x32xf32>
    %218 = arith.subf %201, %217 : vector<16x32xf32>
    %cst_95 = arith.constant 9.99999996E-13 : f32
    %219 = vector.broadcast %cst_95 : f32 to vector<16x1xf32>
    %220 = arith.addf %216, %219 : vector<16x1xf32>
    %221 = math.rsqrt %220 : vector<16x1xf32>
    %222 = vector.broadcast %221 : vector<16x1xf32> to vector<16x32xf32>
    %223 = arith.mulf %218, %222 : vector<16x32xf32>
    %224 = vector.broadcast %203 : vector<1x32xf32> to vector<16x32xf32>
    %225 = arith.mulf %224, %223 : vector<16x32xf32>
    %226 = vector.broadcast %205 : vector<1x32xf32> to vector<16x32xf32>
    %227 = arith.addf %225, %226 : vector<16x32xf32>
    %c1 = arith.constant 1 : index
    %c0_96 = arith.constant 0 : index
    %c0_97 = arith.constant 0 : index
    %228 = vector.load %arg3[%c1, %c0_96, %c0_97] : memref<4x32x32xbf16, #tpu.memory_space<vmem>>, vector<1x32x32xbf16>
    %229 = vector.shape_cast %228 : vector<1x32x32xbf16> to vector<32x32xbf16>
    %c1_98 = arith.constant 1 : index
    %c0_99 = arith.constant 0 : index
    %c0_100 = arith.constant 0 : index
    %230 = vector.load %arg4[%c1_98, %c0_99, %c0_100] : memref<4x1x32xf32, #tpu.memory_space<vmem>>, vector<1x1x32xf32>
    %231 = vector.shape_cast %230 : vector<1x1x32xf32> to vector<1x32xf32>
    %232 = arith.truncf %227 : vector<16x32xf32> to vector<16x32xbf16>
    %cst_101 = arith.constant dense<0.000000e+00> : vector<16x32xf32>
    %233 = tpu.matmul %232, %229, %cst_101 {dimension_numbers = #tpu.dot_dimension_numbers<[1], [0], [0], [1], [0, 0, 1, 1], [], []>} : vector<16x32xbf16>, vector<32x32xbf16>, vector<16x32xf32> -> vector<16x32xf32>
    %234 = vector.broadcast %231 : vector<1x32xf32> to vector<16x32xf32>
    %235 = arith.addf %233, %234 : vector<16x32xf32>
    %236 = vector.shape_cast %235 : vector<16x32xf32> to vector<2x8x32xf32>
    %c1_102 = arith.constant 1 : index
    %c0_103 = arith.constant 0 : index
    %c0_104 = arith.constant 0 : index
    %237 = vector.load %arg5[%c1_102, %c0_103, %c0_104] : memref<4x32x32xbf16, #tpu.memory_space<vmem>>, vector<1x32x32xbf16>
    %238 = vector.shape_cast %237 : vector<1x32x32xbf16> to vector<32x32xbf16>
    %c1_105 = arith.constant 1 : index
    %c0_106 = arith.constant 0 : index
    %c0_107 = arith.constant 0 : index
    %239 = vector.load %arg6[%c1_105, %c0_106, %c0_107] : memref<4x1x32xf32, #tpu.memory_space<vmem>>, vector<1x1x32xf32>
    %240 = vector.shape_cast %239 : vector<1x1x32xf32> to vector<1x32xf32>
    %241 = arith.truncf %227 : vector<16x32xf32> to vector<16x32xbf16>
    %cst_108 = arith.constant dense<0.000000e+00> : vector<16x32xf32>
    %242 = tpu.matmul %241, %238, %cst_108 {dimension_numbers = #tpu.dot_dimension_numbers<[1], [0], [0], [1], [0, 0, 1, 1], [], []>} : vector<16x32xbf16>, vector<32x32xbf16>, vector<16x32xf32> -> vector<16x32xf32>
    %243 = vector.broadcast %240 : vector<1x32xf32> to vector<16x32xf32>
    %244 = arith.addf %242, %243 : vector<16x32xf32>
    %245 = vector.shape_cast %244 : vector<16x32xf32> to vector<2x8x32xf32>
    %c1_109 = arith.constant 1 : index
    %c0_110 = arith.constant 0 : index
    %c0_111 = arith.constant 0 : index
    %246 = vector.load %arg7[%c1_109, %c0_110, %c0_111] : memref<4x32x32xbf16, #tpu.memory_space<vmem>>, vector<1x32x32xbf16>
    %247 = vector.shape_cast %246 : vector<1x32x32xbf16> to vector<32x32xbf16>
    %c1_112 = arith.constant 1 : index
    %c0_113 = arith.constant 0 : index
    %c0_114 = arith.constant 0 : index
    %248 = vector.load %arg8[%c1_112, %c0_113, %c0_114] : memref<4x1x32xf32, #tpu.memory_space<vmem>>, vector<1x1x32xf32>
    %249 = vector.shape_cast %248 : vector<1x1x32xf32> to vector<1x32xf32>
    %250 = arith.truncf %227 : vector<16x32xf32> to vector<16x32xbf16>
    %cst_115 = arith.constant dense<0.000000e+00> : vector<16x32xf32>
    %251 = tpu.matmul %250, %247, %cst_115 {dimension_numbers = #tpu.dot_dimension_numbers<[1], [0], [0], [1], [0, 0, 1, 1], [], []>} : vector<16x32xbf16>, vector<32x32xbf16>, vector<16x32xf32> -> vector<16x32xf32>
    %252 = vector.broadcast %249 : vector<1x32xf32> to vector<16x32xf32>
    %253 = arith.addf %251, %252 : vector<16x32xf32>
    %254 = vector.shape_cast %253 : vector<16x32xf32> to vector<2x8x32xf32>
    %cst_116 = arith.constant 0.353553385 : f32
    %255 = vector.broadcast %cst_116 : f32 to vector<2x8x32xf32>
    %256 = arith.mulf %236, %255 : vector<2x8x32xf32>
    %257 = arith.truncf %256 : vector<2x8x32xf32> to vector<2x8x32xbf16>
    %258 = arith.truncf %245 : vector<2x8x32xf32> to vector<2x8x32xbf16>
    %259 = arith.truncf %254 : vector<2x8x32xf32> to vector<2x8x32xbf16>
    %c1_117 = arith.constant 1 : index
    %c0_118 = arith.constant 0 : index
    %c0_119 = arith.constant 0 : index
    %260 = vector.load %arg9[%c1_117, %c0_118, %c0_119] : memref<4x32x32xf32, #tpu.memory_space<vmem>>, vector<1x32x32xf32>
    %261 = vector.shape_cast %260 : vector<1x32x32xf32> to vector<32x32xf32>
    %262 = vector.extract_strided_slice %257 {offsets = [0, 0, 0], sizes = [2, 8, 8], strides = [1, 1, 1]} : vector<2x8x32xbf16> to vector<2x8x8xbf16>
    %263 = vector.extract_strided_slice %258 {offsets = [0, 0, 0], sizes = [2, 8, 8], strides = [1, 1, 1]} : vector<2x8x32xbf16> to vector<2x8x8xbf16>
    "tpu.trace_start"() <{level = 10 : i32, message = "bsw,btw->bst"}> : () -> ()
    %cst_120 = arith.constant dense<0.000000e+00> : vector<2x8x8xf32>
    %264 = tpu.matmul %262, %263, %cst_120 {dimension_numbers = #tpu.dot_dimension_numbers<[2], [2], [1], [1], [0, 0, 0, 1, 1, 1], [0], [0]>} : vector<2x8x8xbf16>, vector<2x8x8xbf16>, vector<2x8x8xf32> -> vector<2x8x8xf32>
    "tpu.trace_stop"() : () -> ()
    %cst_121 = arith.constant dense<0xFF800000> : vector<2x8xf32>
    %265 = vector.multi_reduction <maximumf>, %264, %cst_121 [2] : vector<2x8x8xf32> to vector<2x8xf32>
    %266 = vector.shape_cast %265 : vector<2x8xf32> to vector<2x8x1xf32>
    %267 = vector.broadcast %266 : vector<2x8x1xf32> to vector<2x8x8xf32>
    %268 = arith.subf %264, %267 : vector<2x8x8xf32>
    %269 = math.exp %268 : vector<2x8x8xf32>
    %cst_122 = arith.constant dense<0.000000e+00> : vector<2x8xf32>
    %270 = vector.multi_reduction <add>, %269, %cst_122 [2] : vector<2x8x8xf32> to vector<2x8xf32>
    %271 = vector.shape_cast %270 : vector<2x8xf32> to vector<2x8x1xf32>
    %272 = tpu.reciprocal %271 {approx = true} : vector<2x8x1xf32> -> vector<2x8x1xf32>
    %273 = vector.broadcast %272 : vector<2x8x1xf32> to vector<2x8x8xf32>
    %274 = arith.mulf %269, %273 : vector<2x8x8xf32>
    %275 = arith.truncf %274 : vector<2x8x8xf32> to vector<2x8x8xbf16>
    %276 = vector.extract_strided_slice %259 {offsets = [0, 0, 0], sizes = [2, 8, 8], strides = [1, 1, 1]} : vector<2x8x32xbf16> to vector<2x8x8xbf16>
    "tpu.trace_start"() <{level = 10 : i32, message = "bst,btw->bsw"}> : () -> ()
    %cst_123 = arith.constant dense<0.000000e+00> : vector<2x8x8xf32>
    %277 = tpu.matmul %275, %276, %cst_123 {dimension_numbers = #tpu.dot_dimension_numbers<[2], [1], [1], [2], [0, 0, 0, 1, 1, 2], [0], [0]>} : vector<2x8x8xbf16>, vector<2x8x8xbf16>, vector<2x8x8xf32> -> vector<2x8x8xf32>
    "tpu.trace_stop"() : () -> ()
    %278 = vector.shape_cast %277 : vector<2x8x8xf32> to vector<16x8xf32>
    %279 = arith.truncf %278 : vector<16x8xf32> to vector<16x8xbf16>
    %280 = vector.extract_strided_slice %261 {offsets = [0, 0], sizes = [8, 32], strides = [1, 1]} : vector<32x32xf32> to vector<8x32xf32>
    %281 = arith.truncf %280 : vector<8x32xf32> to vector<8x32xbf16>
    %cst_124 = arith.constant dense<0.000000e+00> : vector<16x32xf32>
    %282 = tpu.matmul %279, %281, %cst_124 {dimension_numbers = #tpu.dot_dimension_numbers<[1], [0], [0], [1], [0, 0, 1, 1], [], []>} : vector<16x8xbf16>, vector<8x32xbf16>, vector<16x32xf32> -> vector<16x32xf32>
    %283 = vector.extract_strided_slice %257 {offsets = [0, 0, 8], sizes = [2, 8, 8], strides = [1, 1, 1]} : vector<2x8x32xbf16> to vector<2x8x8xbf16>
    %284 = vector.extract_strided_slice %258 {offsets = [0, 0, 8], sizes = [2, 8, 8], strides = [1, 1, 1]} : vector<2x8x32xbf16> to vector<2x8x8xbf16>
    "tpu.trace_start"() <{level = 10 : i32, message = "bsw,btw->bst"}> : () -> ()
    %cst_125 = arith.constant dense<0.000000e+00> : vector<2x8x8xf32>
    %285 = tpu.matmul %283, %284, %cst_125 {dimension_numbers = #tpu.dot_dimension_numbers<[2], [2], [1], [1], [0, 0, 0, 1, 1, 1], [0], [0]>} : vector<2x8x8xbf16>, vector<2x8x8xbf16>, vector<2x8x8xf32> -> vector<2x8x8xf32>
    "tpu.trace_stop"() : () -> ()
    %cst_126 = arith.constant dense<0xFF800000> : vector<2x8xf32>
    %286 = vector.multi_reduction <maximumf>, %285, %cst_126 [2] : vector<2x8x8xf32> to vector<2x8xf32>
    %287 = vector.shape_cast %286 : vector<2x8xf32> to vector<2x8x1xf32>
    %288 = vector.broadcast %287 : vector<2x8x1xf32> to vector<2x8x8xf32>
    %289 = arith.subf %285, %288 : vector<2x8x8xf32>
    %290 = math.exp %289 : vector<2x8x8xf32>
    %cst_127 = arith.constant dense<0.000000e+00> : vector<2x8xf32>
    %291 = vector.multi_reduction <add>, %290, %cst_127 [2] : vector<2x8x8xf32> to vector<2x8xf32>
    %292 = vector.shape_cast %291 : vector<2x8xf32> to vector<2x8x1xf32>
    %293 = tpu.reciprocal %292 {approx = true} : vector<2x8x1xf32> -> vector<2x8x1xf32>
    %294 = vector.broadcast %293 : vector<2x8x1xf32> to vector<2x8x8xf32>
    %295 = arith.mulf %290, %294 : vector<2x8x8xf32>
    %296 = arith.truncf %295 : vector<2x8x8xf32> to vector<2x8x8xbf16>
    %297 = vector.extract_strided_slice %259 {offsets = [0, 0, 8], sizes = [2, 8, 8], strides = [1, 1, 1]} : vector<2x8x32xbf16> to vector<2x8x8xbf16>
    "tpu.trace_start"() <{level = 10 : i32, message = "bst,btw->bsw"}> : () -> ()
    %cst_128 = arith.constant dense<0.000000e+00> : vector<2x8x8xf32>
    %298 = tpu.matmul %296, %297, %cst_128 {dimension_numbers = #tpu.dot_dimension_numbers<[2], [1], [1], [2], [0, 0, 0, 1, 1, 2], [0], [0]>} : vector<2x8x8xbf16>, vector<2x8x8xbf16>, vector<2x8x8xf32> -> vector<2x8x8xf32>
    "tpu.trace_stop"() : () -> ()
    %299 = vector.shape_cast %298 : vector<2x8x8xf32> to vector<16x8xf32>
    %300 = arith.truncf %299 : vector<16x8xf32> to vector<16x8xbf16>
    %301 = vector.extract_strided_slice %261 {offsets = [8, 0], sizes = [8, 32], strides = [1, 1]} : vector<32x32xf32> to vector<8x32xf32>
    %302 = arith.truncf %301 : vector<8x32xf32> to vector<8x32xbf16>
    %cst_129 = arith.constant dense<0.000000e+00> : vector<16x32xf32>
    %303 = tpu.matmul %300, %302, %cst_129 {dimension_numbers = #tpu.dot_dimension_numbers<[1], [0], [0], [1], [0, 0, 1, 1], [], []>} : vector<16x8xbf16>, vector<8x32xbf16>, vector<16x32xf32> -> vector<16x32xf32>
    %304 = arith.addf %282, %303 : vector<16x32xf32>
    %305 = vector.extract_strided_slice %257 {offsets = [0, 0, 16], sizes = [2, 8, 8], strides = [1, 1, 1]} : vector<2x8x32xbf16> to vector<2x8x8xbf16>
    %306 = vector.extract_strided_slice %258 {offsets = [0, 0, 16], sizes = [2, 8, 8], strides = [1, 1, 1]} : vector<2x8x32xbf16> to vector<2x8x8xbf16>
    "tpu.trace_start"() <{level = 10 : i32, message = "bsw,btw->bst"}> : () -> ()
    %cst_130 = arith.constant dense<0.000000e+00> : vector<2x8x8xf32>
    %307 = tpu.matmul %305, %306, %cst_130 {dimension_numbers = #tpu.dot_dimension_numbers<[2], [2], [1], [1], [0, 0, 0, 1, 1, 1], [0], [0]>} : vector<2x8x8xbf16>, vector<2x8x8xbf16>, vector<2x8x8xf32> -> vector<2x8x8xf32>
    "tpu.trace_stop"() : () -> ()
    %cst_131 = arith.constant dense<0xFF800000> : vector<2x8xf32>
    %308 = vector.multi_reduction <maximumf>, %307, %cst_131 [2] : vector<2x8x8xf32> to vector<2x8xf32>
    %309 = vector.shape_cast %308 : vector<2x8xf32> to vector<2x8x1xf32>
    %310 = vector.broadcast %309 : vector<2x8x1xf32> to vector<2x8x8xf32>
    %311 = arith.subf %307, %310 : vector<2x8x8xf32>
    %312 = math.exp %311 : vector<2x8x8xf32>
    %cst_132 = arith.constant dense<0.000000e+00> : vector<2x8xf32>
    %313 = vector.multi_reduction <add>, %312, %cst_132 [2] : vector<2x8x8xf32> to vector<2x8xf32>
    %314 = vector.shape_cast %313 : vector<2x8xf32> to vector<2x8x1xf32>
    %315 = tpu.reciprocal %314 {approx = true} : vector<2x8x1xf32> -> vector<2x8x1xf32>
    %316 = vector.broadcast %315 : vector<2x8x1xf32> to vector<2x8x8xf32>
    %317 = arith.mulf %312, %316 : vector<2x8x8xf32>
    %318 = arith.truncf %317 : vector<2x8x8xf32> to vector<2x8x8xbf16>
    %319 = vector.extract_strided_slice %259 {offsets = [0, 0, 16], sizes = [2, 8, 8], strides = [1, 1, 1]} : vector<2x8x32xbf16> to vector<2x8x8xbf16>
    "tpu.trace_start"() <{level = 10 : i32, message = "bst,btw->bsw"}> : () -> ()
    %cst_133 = arith.constant dense<0.000000e+00> : vector<2x8x8xf32>
    %320 = tpu.matmul %318, %319, %cst_133 {dimension_numbers = #tpu.dot_dimension_numbers<[2], [1], [1], [2], [0, 0, 0, 1, 1, 2], [0], [0]>} : vector<2x8x8xbf16>, vector<2x8x8xbf16>, vector<2x8x8xf32> -> vector<2x8x8xf32>
    "tpu.trace_stop"() : () -> ()
    %321 = vector.shape_cast %320 : vector<2x8x8xf32> to vector<16x8xf32>
    %322 = arith.truncf %321 : vector<16x8xf32> to vector<16x8xbf16>
    %323 = vector.extract_strided_slice %261 {offsets = [16, 0], sizes = [8, 32], strides = [1, 1]} : vector<32x32xf32> to vector<8x32xf32>
    %324 = arith.truncf %323 : vector<8x32xf32> to vector<8x32xbf16>
    %cst_134 = arith.constant dense<0.000000e+00> : vector<16x32xf32>
    %325 = tpu.matmul %322, %324, %cst_134 {dimension_numbers = #tpu.dot_dimension_numbers<[1], [0], [0], [1], [0, 0, 1, 1], [], []>} : vector<16x8xbf16>, vector<8x32xbf16>, vector<16x32xf32> -> vector<16x32xf32>
    %326 = arith.addf %304, %325 : vector<16x32xf32>
    %327 = vector.extract_strided_slice %257 {offsets = [0, 0, 24], sizes = [2, 8, 8], strides = [1, 1, 1]} : vector<2x8x32xbf16> to vector<2x8x8xbf16>
    %328 = vector.extract_strided_slice %258 {offsets = [0, 0, 24], sizes = [2, 8, 8], strides = [1, 1, 1]} : vector<2x8x32xbf16> to vector<2x8x8xbf16>
    "tpu.trace_start"() <{level = 10 : i32, message = "bsw,btw->bst"}> : () -> ()
    %cst_135 = arith.constant dense<0.000000e+00> : vector<2x8x8xf32>
    %329 = tpu.matmul %327, %328, %cst_135 {dimension_numbers = #tpu.dot_dimension_numbers<[2], [2], [1], [1], [0, 0, 0, 1, 1, 1], [0], [0]>} : vector<2x8x8xbf16>, vector<2x8x8xbf16>, vector<2x8x8xf32> -> vector<2x8x8xf32>
    "tpu.trace_stop"() : () -> ()
    %cst_136 = arith.constant dense<0xFF800000> : vector<2x8xf32>
    %330 = vector.multi_reduction <maximumf>, %329, %cst_136 [2] : vector<2x8x8xf32> to vector<2x8xf32>
    %331 = vector.shape_cast %330 : vector<2x8xf32> to vector<2x8x1xf32>
    %332 = vector.broadcast %331 : vector<2x8x1xf32> to vector<2x8x8xf32>
    %333 = arith.subf %329, %332 : vector<2x8x8xf32>
    %334 = math.exp %333 : vector<2x8x8xf32>
    %cst_137 = arith.constant dense<0.000000e+00> : vector<2x8xf32>
    %335 = vector.multi_reduction <add>, %334, %cst_137 [2] : vector<2x8x8xf32> to vector<2x8xf32>
    %336 = vector.shape_cast %335 : vector<2x8xf32> to vector<2x8x1xf32>
    %337 = tpu.reciprocal %336 {approx = true} : vector<2x8x1xf32> -> vector<2x8x1xf32>
    %338 = vector.broadcast %337 : vector<2x8x1xf32> to vector<2x8x8xf32>
    %339 = arith.mulf %334, %338 : vector<2x8x8xf32>
    %340 = arith.truncf %339 : vector<2x8x8xf32> to vector<2x8x8xbf16>
    %341 = vector.extract_strided_slice %259 {offsets = [0, 0, 24], sizes = [2, 8, 8], strides = [1, 1, 1]} : vector<2x8x32xbf16> to vector<2x8x8xbf16>
    "tpu.trace_start"() <{level = 10 : i32, message = "bst,btw->bsw"}> : () -> ()
    %cst_138 = arith.constant dense<0.000000e+00> : vector<2x8x8xf32>
    %342 = tpu.matmul %340, %341, %cst_138 {dimension_numbers = #tpu.dot_dimension_numbers<[2], [1], [1], [2], [0, 0, 0, 1, 1, 2], [0], [0]>} : vector<2x8x8xbf16>, vector<2x8x8xbf16>, vector<2x8x8xf32> -> vector<2x8x8xf32>
    "tpu.trace_stop"() : () -> ()
    %343 = vector.shape_cast %342 : vector<2x8x8xf32> to vector<16x8xf32>
    %344 = arith.truncf %343 : vector<16x8xf32> to vector<16x8xbf16>
    %345 = vector.extract_strided_slice %261 {offsets = [24, 0], sizes = [8, 32], strides = [1, 1]} : vector<32x32xf32> to vector<8x32xf32>
    %346 = arith.truncf %345 : vector<8x32xf32> to vector<8x32xbf16>
    %cst_139 = arith.constant dense<0.000000e+00> : vector<16x32xf32>
    %347 = tpu.matmul %344, %346, %cst_139 {dimension_numbers = #tpu.dot_dimension_numbers<[1], [0], [0], [1], [0, 0, 1, 1], [], []>} : vector<16x8xbf16>, vector<8x32xbf16>, vector<16x32xf32> -> vector<16x32xf32>
    %348 = arith.addf %326, %347 : vector<16x32xf32>
    %c1_140 = arith.constant 1 : index
    %c0_141 = arith.constant 0 : index
    %c0_142 = arith.constant 0 : index
    %349 = vector.load %arg10[%c1_140, %c0_141, %c0_142] : memref<4x1x32xf32, #tpu.memory_space<vmem>>, vector<1x1x32xf32>
    %350 = vector.shape_cast %349 : vector<1x1x32xf32> to vector<1x32xf32>
    %351 = vector.broadcast %350 : vector<1x32xf32> to vector<16x32xf32>
    %352 = arith.addf %348, %351 : vector<16x32xf32>
    %353 = arith.addf %227, %352 : vector<16x32xf32>
    %c1_143 = arith.constant 1 : index
    %c0_144 = arith.constant 0 : index
    %c0_145 = arith.constant 0 : index
    %354 = vector.load %arg11[%c1_143, %c0_144, %c0_145] : memref<4x1x32xf32, #tpu.memory_space<vmem>>, vector<1x1x32xf32>
    %355 = vector.shape_cast %354 : vector<1x1x32xf32> to vector<1x32xf32>
    %c1_146 = arith.constant 1 : index
    %c0_147 = arith.constant 0 : index
    %c0_148 = arith.constant 0 : index
    %356 = vector.load %arg12[%c1_146, %c0_147, %c0_148] : memref<4x1x32xf32, #tpu.memory_space<vmem>>, vector<1x1x32xf32>
    %357 = vector.shape_cast %356 : vector<1x1x32xf32> to vector<1x32xf32>
    %cst_149 = arith.constant dense<0.000000e+00> : vector<16xf32>
    %358 = vector.multi_reduction <add>, %353, %cst_149 [1] : vector<16x32xf32> to vector<16xf32>
    %359 = vector.shape_cast %358 : vector<16xf32> to vector<16x1xf32>
    %cst_150 = arith.constant 3.200000e+01 : f32
    %360 = vector.broadcast %cst_150 : f32 to vector<16x1xf32>
    %361 = arith.divf %359, %360 : vector<16x1xf32>
    %362 = vector.broadcast %361 : vector<16x1xf32> to vector<16x32xf32>
    %363 = arith.subf %353, %362 : vector<16x32xf32>
    %364 = arith.mulf %363, %363 : vector<16x32xf32>
    %cst_151 = arith.constant dense<0.000000e+00> : vector<16xf32>
    %365 = vector.multi_reduction <add>, %364, %cst_151 [1] : vector<16x32xf32> to vector<16xf32>
    %366 = vector.shape_cast %365 : vector<16xf32> to vector<16x1xf32>
    %cst_152 = arith.constant 3.200000e+01 : f32
    %367 = vector.broadcast %cst_152 : f32 to vector<16x1xf32>
    %368 = arith.divf %366, %367 : vector<16x1xf32>
    %369 = vector.broadcast %361 : vector<16x1xf32> to vector<16x32xf32>
    %370 = arith.subf %353, %369 : vector<16x32xf32>
    %cst_153 = arith.constant 9.99999996E-13 : f32
    %371 = vector.broadcast %cst_153 : f32 to vector<16x1xf32>
    %372 = arith.addf %368, %371 : vector<16x1xf32>
    %373 = math.rsqrt %372 : vector<16x1xf32>
    %374 = vector.broadcast %373 : vector<16x1xf32> to vector<16x32xf32>
    %375 = arith.mulf %370, %374 : vector<16x32xf32>
    %376 = vector.broadcast %355 : vector<1x32xf32> to vector<16x32xf32>
    %377 = arith.mulf %376, %375 : vector<16x32xf32>
    %378 = vector.broadcast %357 : vector<1x32xf32> to vector<16x32xf32>
    %379 = arith.addf %377, %378 : vector<16x32xf32>
    %c1_154 = arith.constant 1 : index
    %c0_155 = arith.constant 0 : index
    %c0_156 = arith.constant 0 : index
    %380 = vector.load %arg13[%c1_154, %c0_155, %c0_156] : memref<4x32x128xbf16, #tpu.memory_space<vmem>>, vector<1x32x128xbf16>
    %381 = vector.shape_cast %380 : vector<1x32x128xbf16> to vector<32x128xbf16>
    %c1_157 = arith.constant 1 : index
    %c0_158 = arith.constant 0 : index
    %c0_159 = arith.constant 0 : index
    %382 = vector.load %arg14[%c1_157, %c0_158, %c0_159] : memref<4x1x128xf32, #tpu.memory_space<vmem>>, vector<1x1x128xf32>
    %383 = vector.shape_cast %382 : vector<1x1x128xf32> to vector<1x128xf32>
    %384 = arith.truncf %379 : vector<16x32xf32> to vector<16x32xbf16>
    %cst_160 = arith.constant dense<0.000000e+00> : vector<16x128xf32>
    %385 = tpu.matmul %384, %381, %cst_160 {dimension_numbers = #tpu.dot_dimension_numbers<[1], [0], [0], [1], [0, 0, 1, 1], [], []>} : vector<16x32xbf16>, vector<32x128xbf16>, vector<16x128xf32> -> vector<16x128xf32>
    %386 = vector.broadcast %383 : vector<1x128xf32> to vector<16x128xf32>
    %387 = arith.addf %385, %386 : vector<16x128xf32>
    %cst_161 = arith.constant 5.000000e-01 : f32
    %388 = vector.broadcast %cst_161 : f32 to vector<16x128xf32>
    %389 = arith.mulf %387, %388 : vector<16x128xf32>
    %cst_162 = arith.constant 0.707106769 : f32
    %390 = vector.broadcast %cst_162 : f32 to vector<16x128xf32>
    %391 = arith.mulf %387, %390 : vector<16x128xf32>
    %392 = math.erf %391 : vector<16x128xf32>
    %cst_163 = arith.constant 1.000000e+00 : f32
    %393 = vector.broadcast %cst_163 : f32 to vector<16x128xf32>
    %394 = arith.addf %393, %392 : vector<16x128xf32>
    %395 = arith.mulf %389, %394 : vector<16x128xf32>
    %c1_164 = arith.constant 1 : index
    %c0_165 = arith.constant 0 : index
    %c0_166 = arith.constant 0 : index
    %396 = vector.load %arg15[%c1_164, %c0_165, %c0_166] : memref<4x128x32xbf16, #tpu.memory_space<vmem>>, vector<1x128x32xbf16>
    %397 = vector.shape_cast %396 : vector<1x128x32xbf16> to vector<128x32xbf16>
    %c1_167 = arith.constant 1 : index
    %c0_168 = arith.constant 0 : index
    %c0_169 = arith.constant 0 : index
    %398 = vector.load %arg16[%c1_167, %c0_168, %c0_169] : memref<4x1x32xf32, #tpu.memory_space<vmem>>, vector<1x1x32xf32>
    %399 = vector.shape_cast %398 : vector<1x1x32xf32> to vector<1x32xf32>
    %400 = arith.truncf %395 : vector<16x128xf32> to vector<16x128xbf16>
    %cst_170 = arith.constant dense<0.000000e+00> : vector<16x32xf32>
    %401 = tpu.matmul %400, %397, %cst_170 {dimension_numbers = #tpu.dot_dimension_numbers<[1], [0], [0], [1], [0, 0, 1, 1], [], []>} : vector<16x128xbf16>, vector<128x32xbf16>, vector<16x32xf32> -> vector<16x32xf32>
    %402 = vector.broadcast %399 : vector<1x32xf32> to vector<16x32xf32>
    %403 = arith.addf %401, %402 : vector<16x32xf32>
    %404 = arith.addf %379, %403 : vector<16x32xf32>
    %c1_171 = arith.constant 1 : index
    %c0_172 = arith.constant 0 : index
    %c0_173 = arith.constant 0 : index
    %405 = vector.load %arg17[%c1_171, %c0_172, %c0_173] : memref<4x1x32xf32, #tpu.memory_space<vmem>>, vector<1x1x32xf32>
    %406 = vector.shape_cast %405 : vector<1x1x32xf32> to vector<1x32xf32>
    %c1_174 = arith.constant 1 : index
    %c0_175 = arith.constant 0 : index
    %c0_176 = arith.constant 0 : index
    %407 = vector.load %arg18[%c1_174, %c0_175, %c0_176] : memref<4x1x32xf32, #tpu.memory_space<vmem>>, vector<1x1x32xf32>
    %408 = vector.shape_cast %407 : vector<1x1x32xf32> to vector<1x32xf32>
    %cst_177 = arith.constant dense<0.000000e+00> : vector<16xf32>
    %409 = vector.multi_reduction <add>, %404, %cst_177 [1] : vector<16x32xf32> to vector<16xf32>
    %410 = vector.shape_cast %409 : vector<16xf32> to vector<16x1xf32>
    %cst_178 = arith.constant 3.200000e+01 : f32
    %411 = vector.broadcast %cst_178 : f32 to vector<16x1xf32>
    %412 = arith.divf %410, %411 : vector<16x1xf32>
    %413 = vector.broadcast %412 : vector<16x1xf32> to vector<16x32xf32>
    %414 = arith.subf %404, %413 : vector<16x32xf32>
    %415 = arith.mulf %414, %414 : vector<16x32xf32>
    %cst_179 = arith.constant dense<0.000000e+00> : vector<16xf32>
    %416 = vector.multi_reduction <add>, %415, %cst_179 [1] : vector<16x32xf32> to vector<16xf32>
    %417 = vector.shape_cast %416 : vector<16xf32> to vector<16x1xf32>
    %cst_180 = arith.constant 3.200000e+01 : f32
    %418 = vector.broadcast %cst_180 : f32 to vector<16x1xf32>
    %419 = arith.divf %417, %418 : vector<16x1xf32>
    %420 = vector.broadcast %412 : vector<16x1xf32> to vector<16x32xf32>
    %421 = arith.subf %404, %420 : vector<16x32xf32>
    %cst_181 = arith.constant 9.99999996E-13 : f32
    %422 = vector.broadcast %cst_181 : f32 to vector<16x1xf32>
    %423 = arith.addf %419, %422 : vector<16x1xf32>
    %424 = math.rsqrt %423 : vector<16x1xf32>
    %425 = vector.broadcast %424 : vector<16x1xf32> to vector<16x32xf32>
    %426 = arith.mulf %421, %425 : vector<16x32xf32>
    %427 = vector.broadcast %406 : vector<1x32xf32> to vector<16x32xf32>
    %428 = arith.mulf %427, %426 : vector<16x32xf32>
    %429 = vector.broadcast %408 : vector<1x32xf32> to vector<16x32xf32>
    %430 = arith.addf %428, %429 : vector<16x32xf32>
    %c2 = arith.constant 2 : index
    %c0_182 = arith.constant 0 : index
    %c0_183 = arith.constant 0 : index
    %431 = vector.load %arg3[%c2, %c0_182, %c0_183] : memref<4x32x32xbf16, #tpu.memory_space<vmem>>, vector<1x32x32xbf16>
    %432 = vector.shape_cast %431 : vector<1x32x32xbf16> to vector<32x32xbf16>
    %c2_184 = arith.constant 2 : index
    %c0_185 = arith.constant 0 : index
    %c0_186 = arith.constant 0 : index
    %433 = vector.load %arg4[%c2_184, %c0_185, %c0_186] : memref<4x1x32xf32, #tpu.memory_space<vmem>>, vector<1x1x32xf32>
    %434 = vector.shape_cast %433 : vector<1x1x32xf32> to vector<1x32xf32>
    %435 = arith.truncf %430 : vector<16x32xf32> to vector<16x32xbf16>
    %cst_187 = arith.constant dense<0.000000e+00> : vector<16x32xf32>
    %436 = tpu.matmul %435, %432, %cst_187 {dimension_numbers = #tpu.dot_dimension_numbers<[1], [0], [0], [1], [0, 0, 1, 1], [], []>} : vector<16x32xbf16>, vector<32x32xbf16>, vector<16x32xf32> -> vector<16x32xf32>
    %437 = vector.broadcast %434 : vector<1x32xf32> to vector<16x32xf32>
    %438 = arith.addf %436, %437 : vector<16x32xf32>
    %439 = vector.shape_cast %438 : vector<16x32xf32> to vector<2x8x32xf32>
    %c2_188 = arith.constant 2 : index
    %c0_189 = arith.constant 0 : index
    %c0_190 = arith.constant 0 : index
    %440 = vector.load %arg5[%c2_188, %c0_189, %c0_190] : memref<4x32x32xbf16, #tpu.memory_space<vmem>>, vector<1x32x32xbf16>
    %441 = vector.shape_cast %440 : vector<1x32x32xbf16> to vector<32x32xbf16>
    %c2_191 = arith.constant 2 : index
    %c0_192 = arith.constant 0 : index
    %c0_193 = arith.constant 0 : index
    %442 = vector.load %arg6[%c2_191, %c0_192, %c0_193] : memref<4x1x32xf32, #tpu.memory_space<vmem>>, vector<1x1x32xf32>
    %443 = vector.shape_cast %442 : vector<1x1x32xf32> to vector<1x32xf32>
    %444 = arith.truncf %430 : vector<16x32xf32> to vector<16x32xbf16>
    %cst_194 = arith.constant dense<0.000000e+00> : vector<16x32xf32>
    %445 = tpu.matmul %444, %441, %cst_194 {dimension_numbers = #tpu.dot_dimension_numbers<[1], [0], [0], [1], [0, 0, 1, 1], [], []>} : vector<16x32xbf16>, vector<32x32xbf16>, vector<16x32xf32> -> vector<16x32xf32>
    %446 = vector.broadcast %443 : vector<1x32xf32> to vector<16x32xf32>
    %447 = arith.addf %445, %446 : vector<16x32xf32>
    %448 = vector.shape_cast %447 : vector<16x32xf32> to vector<2x8x32xf32>
    %c2_195 = arith.constant 2 : index
    %c0_196 = arith.constant 0 : index
    %c0_197 = arith.constant 0 : index
    %449 = vector.load %arg7[%c2_195, %c0_196, %c0_197] : memref<4x32x32xbf16, #tpu.memory_space<vmem>>, vector<1x32x32xbf16>
    %450 = vector.shape_cast %449 : vector<1x32x32xbf16> to vector<32x32xbf16>
    %c2_198 = arith.constant 2 : index
    %c0_199 = arith.constant 0 : index
    %c0_200 = arith.constant 0 : index
    %451 = vector.load %arg8[%c2_198, %c0_199, %c0_200] : memref<4x1x32xf32, #tpu.memory_space<vmem>>, vector<1x1x32xf32>
    %452 = vector.shape_cast %451 : vector<1x1x32xf32> to vector<1x32xf32>
    %453 = arith.truncf %430 : vector<16x32xf32> to vector<16x32xbf16>
    %cst_201 = arith.constant dense<0.000000e+00> : vector<16x32xf32>
    %454 = tpu.matmul %453, %450, %cst_201 {dimension_numbers = #tpu.dot_dimension_numbers<[1], [0], [0], [1], [0, 0, 1, 1], [], []>} : vector<16x32xbf16>, vector<32x32xbf16>, vector<16x32xf32> -> vector<16x32xf32>
    %455 = vector.broadcast %452 : vector<1x32xf32> to vector<16x32xf32>
    %456 = arith.addf %454, %455 : vector<16x32xf32>
    %457 = vector.shape_cast %456 : vector<16x32xf32> to vector<2x8x32xf32>
    %cst_202 = arith.constant 0.353553385 : f32
    %458 = vector.broadcast %cst_202 : f32 to vector<2x8x32xf32>
    %459 = arith.mulf %439, %458 : vector<2x8x32xf32>
    %460 = arith.truncf %459 : vector<2x8x32xf32> to vector<2x8x32xbf16>
    %461 = arith.truncf %448 : vector<2x8x32xf32> to vector<2x8x32xbf16>
    %462 = arith.truncf %457 : vector<2x8x32xf32> to vector<2x8x32xbf16>
    %c2_203 = arith.constant 2 : index
    %c0_204 = arith.constant 0 : index
    %c0_205 = arith.constant 0 : index
    %463 = vector.load %arg9[%c2_203, %c0_204, %c0_205] : memref<4x32x32xf32, #tpu.memory_space<vmem>>, vector<1x32x32xf32>
    %464 = vector.shape_cast %463 : vector<1x32x32xf32> to vector<32x32xf32>
    %465 = vector.extract_strided_slice %460 {offsets = [0, 0, 0], sizes = [2, 8, 8], strides = [1, 1, 1]} : vector<2x8x32xbf16> to vector<2x8x8xbf16>
    %466 = vector.extract_strided_slice %461 {offsets = [0, 0, 0], sizes = [2, 8, 8], strides = [1, 1, 1]} : vector<2x8x32xbf16> to vector<2x8x8xbf16>
    "tpu.trace_start"() <{level = 10 : i32, message = "bsw,btw->bst"}> : () -> ()
    %cst_206 = arith.constant dense<0.000000e+00> : vector<2x8x8xf32>
    %467 = tpu.matmul %465, %466, %cst_206 {dimension_numbers = #tpu.dot_dimension_numbers<[2], [2], [1], [1], [0, 0, 0, 1, 1, 1], [0], [0]>} : vector<2x8x8xbf16>, vector<2x8x8xbf16>, vector<2x8x8xf32> -> vector<2x8x8xf32>
    "tpu.trace_stop"() : () -> ()
    %cst_207 = arith.constant dense<0xFF800000> : vector<2x8xf32>
    %468 = vector.multi_reduction <maximumf>, %467, %cst_207 [2] : vector<2x8x8xf32> to vector<2x8xf32>
    %469 = vector.shape_cast %468 : vector<2x8xf32> to vector<2x8x1xf32>
    %470 = vector.broadcast %469 : vector<2x8x1xf32> to vector<2x8x8xf32>
    %471 = arith.subf %467, %470 : vector<2x8x8xf32>
    %472 = math.exp %471 : vector<2x8x8xf32>
    %cst_208 = arith.constant dense<0.000000e+00> : vector<2x8xf32>
    %473 = vector.multi_reduction <add>, %472, %cst_208 [2] : vector<2x8x8xf32> to vector<2x8xf32>
    %474 = vector.shape_cast %473 : vector<2x8xf32> to vector<2x8x1xf32>
    %475 = tpu.reciprocal %474 {approx = true} : vector<2x8x1xf32> -> vector<2x8x1xf32>
    %476 = vector.broadcast %475 : vector<2x8x1xf32> to vector<2x8x8xf32>
    %477 = arith.mulf %472, %476 : vector<2x8x8xf32>
    %478 = arith.truncf %477 : vector<2x8x8xf32> to vector<2x8x8xbf16>
    %479 = vector.extract_strided_slice %462 {offsets = [0, 0, 0], sizes = [2, 8, 8], strides = [1, 1, 1]} : vector<2x8x32xbf16> to vector<2x8x8xbf16>
    "tpu.trace_start"() <{level = 10 : i32, message = "bst,btw->bsw"}> : () -> ()
    %cst_209 = arith.constant dense<0.000000e+00> : vector<2x8x8xf32>
    %480 = tpu.matmul %478, %479, %cst_209 {dimension_numbers = #tpu.dot_dimension_numbers<[2], [1], [1], [2], [0, 0, 0, 1, 1, 2], [0], [0]>} : vector<2x8x8xbf16>, vector<2x8x8xbf16>, vector<2x8x8xf32> -> vector<2x8x8xf32>
    "tpu.trace_stop"() : () -> ()
    %481 = vector.shape_cast %480 : vector<2x8x8xf32> to vector<16x8xf32>
    %482 = arith.truncf %481 : vector<16x8xf32> to vector<16x8xbf16>
    %483 = vector.extract_strided_slice %464 {offsets = [0, 0], sizes = [8, 32], strides = [1, 1]} : vector<32x32xf32> to vector<8x32xf32>
    %484 = arith.truncf %483 : vector<8x32xf32> to vector<8x32xbf16>
    %cst_210 = arith.constant dense<0.000000e+00> : vector<16x32xf32>
    %485 = tpu.matmul %482, %484, %cst_210 {dimension_numbers = #tpu.dot_dimension_numbers<[1], [0], [0], [1], [0, 0, 1, 1], [], []>} : vector<16x8xbf16>, vector<8x32xbf16>, vector<16x32xf32> -> vector<16x32xf32>
    %486 = vector.extract_strided_slice %460 {offsets = [0, 0, 8], sizes = [2, 8, 8], strides = [1, 1, 1]} : vector<2x8x32xbf16> to vector<2x8x8xbf16>
    %487 = vector.extract_strided_slice %461 {offsets = [0, 0, 8], sizes = [2, 8, 8], strides = [1, 1, 1]} : vector<2x8x32xbf16> to vector<2x8x8xbf16>
    "tpu.trace_start"() <{level = 10 : i32, message = "bsw,btw->bst"}> : () -> ()
    %cst_211 = arith.constant dense<0.000000e+00> : vector<2x8x8xf32>
    %488 = tpu.matmul %486, %487, %cst_211 {dimension_numbers = #tpu.dot_dimension_numbers<[2], [2], [1], [1], [0, 0, 0, 1, 1, 1], [0], [0]>} : vector<2x8x8xbf16>, vector<2x8x8xbf16>, vector<2x8x8xf32> -> vector<2x8x8xf32>
    "tpu.trace_stop"() : () -> ()
    %cst_212 = arith.constant dense<0xFF800000> : vector<2x8xf32>
    %489 = vector.multi_reduction <maximumf>, %488, %cst_212 [2] : vector<2x8x8xf32> to vector<2x8xf32>
    %490 = vector.shape_cast %489 : vector<2x8xf32> to vector<2x8x1xf32>
    %491 = vector.broadcast %490 : vector<2x8x1xf32> to vector<2x8x8xf32>
    %492 = arith.subf %488, %491 : vector<2x8x8xf32>
    %493 = math.exp %492 : vector<2x8x8xf32>
    %cst_213 = arith.constant dense<0.000000e+00> : vector<2x8xf32>
    %494 = vector.multi_reduction <add>, %493, %cst_213 [2] : vector<2x8x8xf32> to vector<2x8xf32>
    %495 = vector.shape_cast %494 : vector<2x8xf32> to vector<2x8x1xf32>
    %496 = tpu.reciprocal %495 {approx = true} : vector<2x8x1xf32> -> vector<2x8x1xf32>
    %497 = vector.broadcast %496 : vector<2x8x1xf32> to vector<2x8x8xf32>
    %498 = arith.mulf %493, %497 : vector<2x8x8xf32>
    %499 = arith.truncf %498 : vector<2x8x8xf32> to vector<2x8x8xbf16>
    %500 = vector.extract_strided_slice %462 {offsets = [0, 0, 8], sizes = [2, 8, 8], strides = [1, 1, 1]} : vector<2x8x32xbf16> to vector<2x8x8xbf16>
    "tpu.trace_start"() <{level = 10 : i32, message = "bst,btw->bsw"}> : () -> ()
    %cst_214 = arith.constant dense<0.000000e+00> : vector<2x8x8xf32>
    %501 = tpu.matmul %499, %500, %cst_214 {dimension_numbers = #tpu.dot_dimension_numbers<[2], [1], [1], [2], [0, 0, 0, 1, 1, 2], [0], [0]>} : vector<2x8x8xbf16>, vector<2x8x8xbf16>, vector<2x8x8xf32> -> vector<2x8x8xf32>
    "tpu.trace_stop"() : () -> ()
    %502 = vector.shape_cast %501 : vector<2x8x8xf32> to vector<16x8xf32>
    %503 = arith.truncf %502 : vector<16x8xf32> to vector<16x8xbf16>
    %504 = vector.extract_strided_slice %464 {offsets = [8, 0], sizes = [8, 32], strides = [1, 1]} : vector<32x32xf32> to vector<8x32xf32>
    %505 = arith.truncf %504 : vector<8x32xf32> to vector<8x32xbf16>
    %cst_215 = arith.constant dense<0.000000e+00> : vector<16x32xf32>
    %506 = tpu.matmul %503, %505, %cst_215 {dimension_numbers = #tpu.dot_dimension_numbers<[1], [0], [0], [1], [0, 0, 1, 1], [], []>} : vector<16x8xbf16>, vector<8x32xbf16>, vector<16x32xf32> -> vector<16x32xf32>
    %507 = arith.addf %485, %506 : vector<16x32xf32>
    %508 = vector.extract_strided_slice %460 {offsets = [0, 0, 16], sizes = [2, 8, 8], strides = [1, 1, 1]} : vector<2x8x32xbf16> to vector<2x8x8xbf16>
    %509 = vector.extract_strided_slice %461 {offsets = [0, 0, 16], sizes = [2, 8, 8], strides = [1, 1, 1]} : vector<2x8x32xbf16> to vector<2x8x8xbf16>
    "tpu.trace_start"() <{level = 10 : i32, message = "bsw,btw->bst"}> : () -> ()
    %cst_216 = arith.constant dense<0.000000e+00> : vector<2x8x8xf32>
    %510 = tpu.matmul %508, %509, %cst_216 {dimension_numbers = #tpu.dot_dimension_numbers<[2], [2], [1], [1], [0, 0, 0, 1, 1, 1], [0], [0]>} : vector<2x8x8xbf16>, vector<2x8x8xbf16>, vector<2x8x8xf32> -> vector<2x8x8xf32>
    "tpu.trace_stop"() : () -> ()
    %cst_217 = arith.constant dense<0xFF800000> : vector<2x8xf32>
    %511 = vector.multi_reduction <maximumf>, %510, %cst_217 [2] : vector<2x8x8xf32> to vector<2x8xf32>
    %512 = vector.shape_cast %511 : vector<2x8xf32> to vector<2x8x1xf32>
    %513 = vector.broadcast %512 : vector<2x8x1xf32> to vector<2x8x8xf32>
    %514 = arith.subf %510, %513 : vector<2x8x8xf32>
    %515 = math.exp %514 : vector<2x8x8xf32>
    %cst_218 = arith.constant dense<0.000000e+00> : vector<2x8xf32>
    %516 = vector.multi_reduction <add>, %515, %cst_218 [2] : vector<2x8x8xf32> to vector<2x8xf32>
    %517 = vector.shape_cast %516 : vector<2x8xf32> to vector<2x8x1xf32>
    %518 = tpu.reciprocal %517 {approx = true} : vector<2x8x1xf32> -> vector<2x8x1xf32>
    %519 = vector.broadcast %518 : vector<2x8x1xf32> to vector<2x8x8xf32>
    %520 = arith.mulf %515, %519 : vector<2x8x8xf32>
    %521 = arith.truncf %520 : vector<2x8x8xf32> to vector<2x8x8xbf16>
    %522 = vector.extract_strided_slice %462 {offsets = [0, 0, 16], sizes = [2, 8, 8], strides = [1, 1, 1]} : vector<2x8x32xbf16> to vector<2x8x8xbf16>
    "tpu.trace_start"() <{level = 10 : i32, message = "bst,btw->bsw"}> : () -> ()
    %cst_219 = arith.constant dense<0.000000e+00> : vector<2x8x8xf32>
    %523 = tpu.matmul %521, %522, %cst_219 {dimension_numbers = #tpu.dot_dimension_numbers<[2], [1], [1], [2], [0, 0, 0, 1, 1, 2], [0], [0]>} : vector<2x8x8xbf16>, vector<2x8x8xbf16>, vector<2x8x8xf32> -> vector<2x8x8xf32>
    "tpu.trace_stop"() : () -> ()
    %524 = vector.shape_cast %523 : vector<2x8x8xf32> to vector<16x8xf32>
    %525 = arith.truncf %524 : vector<16x8xf32> to vector<16x8xbf16>
    %526 = vector.extract_strided_slice %464 {offsets = [16, 0], sizes = [8, 32], strides = [1, 1]} : vector<32x32xf32> to vector<8x32xf32>
    %527 = arith.truncf %526 : vector<8x32xf32> to vector<8x32xbf16>
    %cst_220 = arith.constant dense<0.000000e+00> : vector<16x32xf32>
    %528 = tpu.matmul %525, %527, %cst_220 {dimension_numbers = #tpu.dot_dimension_numbers<[1], [0], [0], [1], [0, 0, 1, 1], [], []>} : vector<16x8xbf16>, vector<8x32xbf16>, vector<16x32xf32> -> vector<16x32xf32>
    %529 = arith.addf %507, %528 : vector<16x32xf32>
    %530 = vector.extract_strided_slice %460 {offsets = [0, 0, 24], sizes = [2, 8, 8], strides = [1, 1, 1]} : vector<2x8x32xbf16> to vector<2x8x8xbf16>
    %531 = vector.extract_strided_slice %461 {offsets = [0, 0, 24], sizes = [2, 8, 8], strides = [1, 1, 1]} : vector<2x8x32xbf16> to vector<2x8x8xbf16>
    "tpu.trace_start"() <{level = 10 : i32, message = "bsw,btw->bst"}> : () -> ()
    %cst_221 = arith.constant dense<0.000000e+00> : vector<2x8x8xf32>
    %532 = tpu.matmul %530, %531, %cst_221 {dimension_numbers = #tpu.dot_dimension_numbers<[2], [2], [1], [1], [0, 0, 0, 1, 1, 1], [0], [0]>} : vector<2x8x8xbf16>, vector<2x8x8xbf16>, vector<2x8x8xf32> -> vector<2x8x8xf32>
    "tpu.trace_stop"() : () -> ()
    %cst_222 = arith.constant dense<0xFF800000> : vector<2x8xf32>
    %533 = vector.multi_reduction <maximumf>, %532, %cst_222 [2] : vector<2x8x8xf32> to vector<2x8xf32>
    %534 = vector.shape_cast %533 : vector<2x8xf32> to vector<2x8x1xf32>
    %535 = vector.broadcast %534 : vector<2x8x1xf32> to vector<2x8x8xf32>
    %536 = arith.subf %532, %535 : vector<2x8x8xf32>
    %537 = math.exp %536 : vector<2x8x8xf32>
    %cst_223 = arith.constant dense<0.000000e+00> : vector<2x8xf32>
    %538 = vector.multi_reduction <add>, %537, %cst_223 [2] : vector<2x8x8xf32> to vector<2x8xf32>
    %539 = vector.shape_cast %538 : vector<2x8xf32> to vector<2x8x1xf32>
    %540 = tpu.reciprocal %539 {approx = true} : vector<2x8x1xf32> -> vector<2x8x1xf32>
    %541 = vector.broadcast %540 : vector<2x8x1xf32> to vector<2x8x8xf32>
    %542 = arith.mulf %537, %541 : vector<2x8x8xf32>
    %543 = arith.truncf %542 : vector<2x8x8xf32> to vector<2x8x8xbf16>
    %544 = vector.extract_strided_slice %462 {offsets = [0, 0, 24], sizes = [2, 8, 8], strides = [1, 1, 1]} : vector<2x8x32xbf16> to vector<2x8x8xbf16>
    "tpu.trace_start"() <{level = 10 : i32, message = "bst,btw->bsw"}> : () -> ()
    %cst_224 = arith.constant dense<0.000000e+00> : vector<2x8x8xf32>
    %545 = tpu.matmul %543, %544, %cst_224 {dimension_numbers = #tpu.dot_dimension_numbers<[2], [1], [1], [2], [0, 0, 0, 1, 1, 2], [0], [0]>} : vector<2x8x8xbf16>, vector<2x8x8xbf16>, vector<2x8x8xf32> -> vector<2x8x8xf32>
    "tpu.trace_stop"() : () -> ()
    %546 = vector.shape_cast %545 : vector<2x8x8xf32> to vector<16x8xf32>
    %547 = arith.truncf %546 : vector<16x8xf32> to vector<16x8xbf16>
    %548 = vector.extract_strided_slice %464 {offsets = [24, 0], sizes = [8, 32], strides = [1, 1]} : vector<32x32xf32> to vector<8x32xf32>
    %549 = arith.truncf %548 : vector<8x32xf32> to vector<8x32xbf16>
    %cst_225 = arith.constant dense<0.000000e+00> : vector<16x32xf32>
    %550 = tpu.matmul %547, %549, %cst_225 {dimension_numbers = #tpu.dot_dimension_numbers<[1], [0], [0], [1], [0, 0, 1, 1], [], []>} : vector<16x8xbf16>, vector<8x32xbf16>, vector<16x32xf32> -> vector<16x32xf32>
    %551 = arith.addf %529, %550 : vector<16x32xf32>
    %c2_226 = arith.constant 2 : index
    %c0_227 = arith.constant 0 : index
    %c0_228 = arith.constant 0 : index
    %552 = vector.load %arg10[%c2_226, %c0_227, %c0_228] : memref<4x1x32xf32, #tpu.memory_space<vmem>>, vector<1x1x32xf32>
    %553 = vector.shape_cast %552 : vector<1x1x32xf32> to vector<1x32xf32>
    %554 = vector.broadcast %553 : vector<1x32xf32> to vector<16x32xf32>
    %555 = arith.addf %551, %554 : vector<16x32xf32>
    %556 = arith.addf %430, %555 : vector<16x32xf32>
    %c2_229 = arith.constant 2 : index
    %c0_230 = arith.constant 0 : index
    %c0_231 = arith.constant 0 : index
    %557 = vector.load %arg11[%c2_229, %c0_230, %c0_231] : memref<4x1x32xf32, #tpu.memory_space<vmem>>, vector<1x1x32xf32>
    %558 = vector.shape_cast %557 : vector<1x1x32xf32> to vector<1x32xf32>
    %c2_232 = arith.constant 2 : index
    %c0_233 = arith.constant 0 : index
    %c0_234 = arith.constant 0 : index
    %559 = vector.load %arg12[%c2_232, %c0_233, %c0_234] : memref<4x1x32xf32, #tpu.memory_space<vmem>>, vector<1x1x32xf32>
    %560 = vector.shape_cast %559 : vector<1x1x32xf32> to vector<1x32xf32>
    %cst_235 = arith.constant dense<0.000000e+00> : vector<16xf32>
    %561 = vector.multi_reduction <add>, %556, %cst_235 [1] : vector<16x32xf32> to vector<16xf32>
    %562 = vector.shape_cast %561 : vector<16xf32> to vector<16x1xf32>
    %cst_236 = arith.constant 3.200000e+01 : f32
    %563 = vector.broadcast %cst_236 : f32 to vector<16x1xf32>
    %564 = arith.divf %562, %563 : vector<16x1xf32>
    %565 = vector.broadcast %564 : vector<16x1xf32> to vector<16x32xf32>
    %566 = arith.subf %556, %565 : vector<16x32xf32>
    %567 = arith.mulf %566, %566 : vector<16x32xf32>
    %cst_237 = arith.constant dense<0.000000e+00> : vector<16xf32>
    %568 = vector.multi_reduction <add>, %567, %cst_237 [1] : vector<16x32xf32> to vector<16xf32>
    %569 = vector.shape_cast %568 : vector<16xf32> to vector<16x1xf32>
    %cst_238 = arith.constant 3.200000e+01 : f32
    %570 = vector.broadcast %cst_238 : f32 to vector<16x1xf32>
    %571 = arith.divf %569, %570 : vector<16x1xf32>
    %572 = vector.broadcast %564 : vector<16x1xf32> to vector<16x32xf32>
    %573 = arith.subf %556, %572 : vector<16x32xf32>
    %cst_239 = arith.constant 9.99999996E-13 : f32
    %574 = vector.broadcast %cst_239 : f32 to vector<16x1xf32>
    %575 = arith.addf %571, %574 : vector<16x1xf32>
    %576 = math.rsqrt %575 : vector<16x1xf32>
    %577 = vector.broadcast %576 : vector<16x1xf32> to vector<16x32xf32>
    %578 = arith.mulf %573, %577 : vector<16x32xf32>
    %579 = vector.broadcast %558 : vector<1x32xf32> to vector<16x32xf32>
    %580 = arith.mulf %579, %578 : vector<16x32xf32>
    %581 = vector.broadcast %560 : vector<1x32xf32> to vector<16x32xf32>
    %582 = arith.addf %580, %581 : vector<16x32xf32>
    %c2_240 = arith.constant 2 : index
    %c0_241 = arith.constant 0 : index
    %c0_242 = arith.constant 0 : index
    %583 = vector.load %arg13[%c2_240, %c0_241, %c0_242] : memref<4x32x128xbf16, #tpu.memory_space<vmem>>, vector<1x32x128xbf16>
    %584 = vector.shape_cast %583 : vector<1x32x128xbf16> to vector<32x128xbf16>
    %c2_243 = arith.constant 2 : index
    %c0_244 = arith.constant 0 : index
    %c0_245 = arith.constant 0 : index
    %585 = vector.load %arg14[%c2_243, %c0_244, %c0_245] : memref<4x1x128xf32, #tpu.memory_space<vmem>>, vector<1x1x128xf32>
    %586 = vector.shape_cast %585 : vector<1x1x128xf32> to vector<1x128xf32>
    %587 = arith.truncf %582 : vector<16x32xf32> to vector<16x32xbf16>
    %cst_246 = arith.constant dense<0.000000e+00> : vector<16x128xf32>
    %588 = tpu.matmul %587, %584, %cst_246 {dimension_numbers = #tpu.dot_dimension_numbers<[1], [0], [0], [1], [0, 0, 1, 1], [], []>} : vector<16x32xbf16>, vector<32x128xbf16>, vector<16x128xf32> -> vector<16x128xf32>
    %589 = vector.broadcast %586 : vector<1x128xf32> to vector<16x128xf32>
    %590 = arith.addf %588, %589 : vector<16x128xf32>
    %cst_247 = arith.constant 5.000000e-01 : f32
    %591 = vector.broadcast %cst_247 : f32 to vector<16x128xf32>
    %592 = arith.mulf %590, %591 : vector<16x128xf32>
    %cst_248 = arith.constant 0.707106769 : f32
    %593 = vector.broadcast %cst_248 : f32 to vector<16x128xf32>
    %594 = arith.mulf %590, %593 : vector<16x128xf32>
    %595 = math.erf %594 : vector<16x128xf32>
    %cst_249 = arith.constant 1.000000e+00 : f32
    %596 = vector.broadcast %cst_249 : f32 to vector<16x128xf32>
    %597 = arith.addf %596, %595 : vector<16x128xf32>
    %598 = arith.mulf %592, %597 : vector<16x128xf32>
    %c2_250 = arith.constant 2 : index
    %c0_251 = arith.constant 0 : index
    %c0_252 = arith.constant 0 : index
    %599 = vector.load %arg15[%c2_250, %c0_251, %c0_252] : memref<4x128x32xbf16, #tpu.memory_space<vmem>>, vector<1x128x32xbf16>
    %600 = vector.shape_cast %599 : vector<1x128x32xbf16> to vector<128x32xbf16>
    %c2_253 = arith.constant 2 : index
    %c0_254 = arith.constant 0 : index
    %c0_255 = arith.constant 0 : index
    %601 = vector.load %arg16[%c2_253, %c0_254, %c0_255] : memref<4x1x32xf32, #tpu.memory_space<vmem>>, vector<1x1x32xf32>
    %602 = vector.shape_cast %601 : vector<1x1x32xf32> to vector<1x32xf32>
    %603 = arith.truncf %598 : vector<16x128xf32> to vector<16x128xbf16>
    %cst_256 = arith.constant dense<0.000000e+00> : vector<16x32xf32>
    %604 = tpu.matmul %603, %600, %cst_256 {dimension_numbers = #tpu.dot_dimension_numbers<[1], [0], [0], [1], [0, 0, 1, 1], [], []>} : vector<16x128xbf16>, vector<128x32xbf16>, vector<16x32xf32> -> vector<16x32xf32>
    %605 = vector.broadcast %602 : vector<1x32xf32> to vector<16x32xf32>
    %606 = arith.addf %604, %605 : vector<16x32xf32>
    %607 = arith.addf %582, %606 : vector<16x32xf32>
    %c2_257 = arith.constant 2 : index
    %c0_258 = arith.constant 0 : index
    %c0_259 = arith.constant 0 : index
    %608 = vector.load %arg17[%c2_257, %c0_258, %c0_259] : memref<4x1x32xf32, #tpu.memory_space<vmem>>, vector<1x1x32xf32>
    %609 = vector.shape_cast %608 : vector<1x1x32xf32> to vector<1x32xf32>
    %c2_260 = arith.constant 2 : index
    %c0_261 = arith.constant 0 : index
    %c0_262 = arith.constant 0 : index
    %610 = vector.load %arg18[%c2_260, %c0_261, %c0_262] : memref<4x1x32xf32, #tpu.memory_space<vmem>>, vector<1x1x32xf32>
    %611 = vector.shape_cast %610 : vector<1x1x32xf32> to vector<1x32xf32>
    %cst_263 = arith.constant dense<0.000000e+00> : vector<16xf32>
    %612 = vector.multi_reduction <add>, %607, %cst_263 [1] : vector<16x32xf32> to vector<16xf32>
    %613 = vector.shape_cast %612 : vector<16xf32> to vector<16x1xf32>
    %cst_264 = arith.constant 3.200000e+01 : f32
    %614 = vector.broadcast %cst_264 : f32 to vector<16x1xf32>
    %615 = arith.divf %613, %614 : vector<16x1xf32>
    %616 = vector.broadcast %615 : vector<16x1xf32> to vector<16x32xf32>
    %617 = arith.subf %607, %616 : vector<16x32xf32>
    %618 = arith.mulf %617, %617 : vector<16x32xf32>
    %cst_265 = arith.constant dense<0.000000e+00> : vector<16xf32>
    %619 = vector.multi_reduction <add>, %618, %cst_265 [1] : vector<16x32xf32> to vector<16xf32>
    %620 = vector.shape_cast %619 : vector<16xf32> to vector<16x1xf32>
    %cst_266 = arith.constant 3.200000e+01 : f32
    %621 = vector.broadcast %cst_266 : f32 to vector<16x1xf32>
    %622 = arith.divf %620, %621 : vector<16x1xf32>
    %623 = vector.broadcast %615 : vector<16x1xf32> to vector<16x32xf32>
    %624 = arith.subf %607, %623 : vector<16x32xf32>
    %cst_267 = arith.constant 9.99999996E-13 : f32
    %625 = vector.broadcast %cst_267 : f32 to vector<16x1xf32>
    %626 = arith.addf %622, %625 : vector<16x1xf32>
    %627 = math.rsqrt %626 : vector<16x1xf32>
    %628 = vector.broadcast %627 : vector<16x1xf32> to vector<16x32xf32>
    %629 = arith.mulf %624, %628 : vector<16x32xf32>
    %630 = vector.broadcast %609 : vector<1x32xf32> to vector<16x32xf32>
    %631 = arith.mulf %630, %629 : vector<16x32xf32>
    %632 = vector.broadcast %611 : vector<1x32xf32> to vector<16x32xf32>
    %633 = arith.addf %631, %632 : vector<16x32xf32>
    %c3 = arith.constant 3 : index
    %c0_268 = arith.constant 0 : index
    %c0_269 = arith.constant 0 : index
    %634 = vector.load %arg3[%c3, %c0_268, %c0_269] : memref<4x32x32xbf16, #tpu.memory_space<vmem>>, vector<1x32x32xbf16>
    %635 = vector.shape_cast %634 : vector<1x32x32xbf16> to vector<32x32xbf16>
    %c3_270 = arith.constant 3 : index
    %c0_271 = arith.constant 0 : index
    %c0_272 = arith.constant 0 : index
    %636 = vector.load %arg4[%c3_270, %c0_271, %c0_272] : memref<4x1x32xf32, #tpu.memory_space<vmem>>, vector<1x1x32xf32>
    %637 = vector.shape_cast %636 : vector<1x1x32xf32> to vector<1x32xf32>
    %638 = arith.truncf %633 : vector<16x32xf32> to vector<16x32xbf16>
    %cst_273 = arith.constant dense<0.000000e+00> : vector<16x32xf32>
    %639 = tpu.matmul %638, %635, %cst_273 {dimension_numbers = #tpu.dot_dimension_numbers<[1], [0], [0], [1], [0, 0, 1, 1], [], []>} : vector<16x32xbf16>, vector<32x32xbf16>, vector<16x32xf32> -> vector<16x32xf32>
    %640 = vector.broadcast %637 : vector<1x32xf32> to vector<16x32xf32>
    %641 = arith.addf %639, %640 : vector<16x32xf32>
    %642 = vector.shape_cast %641 : vector<16x32xf32> to vector<2x8x32xf32>
    %c3_274 = arith.constant 3 : index
    %c0_275 = arith.constant 0 : index
    %c0_276 = arith.constant 0 : index
    %643 = vector.load %arg5[%c3_274, %c0_275, %c0_276] : memref<4x32x32xbf16, #tpu.memory_space<vmem>>, vector<1x32x32xbf16>
    %644 = vector.shape_cast %643 : vector<1x32x32xbf16> to vector<32x32xbf16>
    %c3_277 = arith.constant 3 : index
    %c0_278 = arith.constant 0 : index
    %c0_279 = arith.constant 0 : index
    %645 = vector.load %arg6[%c3_277, %c0_278, %c0_279] : memref<4x1x32xf32, #tpu.memory_space<vmem>>, vector<1x1x32xf32>
    %646 = vector.shape_cast %645 : vector<1x1x32xf32> to vector<1x32xf32>
    %647 = arith.truncf %633 : vector<16x32xf32> to vector<16x32xbf16>
    %cst_280 = arith.constant dense<0.000000e+00> : vector<16x32xf32>
    %648 = tpu.matmul %647, %644, %cst_280 {dimension_numbers = #tpu.dot_dimension_numbers<[1], [0], [0], [1], [0, 0, 1, 1], [], []>} : vector<16x32xbf16>, vector<32x32xbf16>, vector<16x32xf32> -> vector<16x32xf32>
    %649 = vector.broadcast %646 : vector<1x32xf32> to vector<16x32xf32>
    %650 = arith.addf %648, %649 : vector<16x32xf32>
    %651 = vector.shape_cast %650 : vector<16x32xf32> to vector<2x8x32xf32>
    %c3_281 = arith.constant 3 : index
    %c0_282 = arith.constant 0 : index
    %c0_283 = arith.constant 0 : index
    %652 = vector.load %arg7[%c3_281, %c0_282, %c0_283] : memref<4x32x32xbf16, #tpu.memory_space<vmem>>, vector<1x32x32xbf16>
    %653 = vector.shape_cast %652 : vector<1x32x32xbf16> to vector<32x32xbf16>
    %c3_284 = arith.constant 3 : index
    %c0_285 = arith.constant 0 : index
    %c0_286 = arith.constant 0 : index
    %654 = vector.load %arg8[%c3_284, %c0_285, %c0_286] : memref<4x1x32xf32, #tpu.memory_space<vmem>>, vector<1x1x32xf32>
    %655 = vector.shape_cast %654 : vector<1x1x32xf32> to vector<1x32xf32>
    %656 = arith.truncf %633 : vector<16x32xf32> to vector<16x32xbf16>
    %cst_287 = arith.constant dense<0.000000e+00> : vector<16x32xf32>
    %657 = tpu.matmul %656, %653, %cst_287 {dimension_numbers = #tpu.dot_dimension_numbers<[1], [0], [0], [1], [0, 0, 1, 1], [], []>} : vector<16x32xbf16>, vector<32x32xbf16>, vector<16x32xf32> -> vector<16x32xf32>
    %658 = vector.broadcast %655 : vector<1x32xf32> to vector<16x32xf32>
    %659 = arith.addf %657, %658 : vector<16x32xf32>
    %660 = vector.shape_cast %659 : vector<16x32xf32> to vector<2x8x32xf32>
    %cst_288 = arith.constant 0.353553385 : f32
    %661 = vector.broadcast %cst_288 : f32 to vector<2x8x32xf32>
    %662 = arith.mulf %642, %661 : vector<2x8x32xf32>
    %663 = arith.truncf %662 : vector<2x8x32xf32> to vector<2x8x32xbf16>
    %664 = arith.truncf %651 : vector<2x8x32xf32> to vector<2x8x32xbf16>
    %665 = arith.truncf %660 : vector<2x8x32xf32> to vector<2x8x32xbf16>
    %c3_289 = arith.constant 3 : index
    %c0_290 = arith.constant 0 : index
    %c0_291 = arith.constant 0 : index
    %666 = vector.load %arg9[%c3_289, %c0_290, %c0_291] : memref<4x32x32xf32, #tpu.memory_space<vmem>>, vector<1x32x32xf32>
    %667 = vector.shape_cast %666 : vector<1x32x32xf32> to vector<32x32xf32>
    %668 = vector.extract_strided_slice %663 {offsets = [0, 0, 0], sizes = [2, 8, 8], strides = [1, 1, 1]} : vector<2x8x32xbf16> to vector<2x8x8xbf16>
    %669 = vector.extract_strided_slice %664 {offsets = [0, 0, 0], sizes = [2, 8, 8], strides = [1, 1, 1]} : vector<2x8x32xbf16> to vector<2x8x8xbf16>
    "tpu.trace_start"() <{level = 10 : i32, message = "bsw,btw->bst"}> : () -> ()
    %cst_292 = arith.constant dense<0.000000e+00> : vector<2x8x8xf32>
    %670 = tpu.matmul %668, %669, %cst_292 {dimension_numbers = #tpu.dot_dimension_numbers<[2], [2], [1], [1], [0, 0, 0, 1, 1, 1], [0], [0]>} : vector<2x8x8xbf16>, vector<2x8x8xbf16>, vector<2x8x8xf32> -> vector<2x8x8xf32>
    "tpu.trace_stop"() : () -> ()
    %cst_293 = arith.constant dense<0xFF800000> : vector<2x8xf32>
    %671 = vector.multi_reduction <maximumf>, %670, %cst_293 [2] : vector<2x8x8xf32> to vector<2x8xf32>
    %672 = vector.shape_cast %671 : vector<2x8xf32> to vector<2x8x1xf32>
    %673 = vector.broadcast %672 : vector<2x8x1xf32> to vector<2x8x8xf32>
    %674 = arith.subf %670, %673 : vector<2x8x8xf32>
    %675 = math.exp %674 : vector<2x8x8xf32>
    %cst_294 = arith.constant dense<0.000000e+00> : vector<2x8xf32>
    %676 = vector.multi_reduction <add>, %675, %cst_294 [2] : vector<2x8x8xf32> to vector<2x8xf32>
    %677 = vector.shape_cast %676 : vector<2x8xf32> to vector<2x8x1xf32>
    %678 = tpu.reciprocal %677 {approx = true} : vector<2x8x1xf32> -> vector<2x8x1xf32>
    %679 = vector.broadcast %678 : vector<2x8x1xf32> to vector<2x8x8xf32>
    %680 = arith.mulf %675, %679 : vector<2x8x8xf32>
    %681 = arith.truncf %680 : vector<2x8x8xf32> to vector<2x8x8xbf16>
    %682 = vector.extract_strided_slice %665 {offsets = [0, 0, 0], sizes = [2, 8, 8], strides = [1, 1, 1]} : vector<2x8x32xbf16> to vector<2x8x8xbf16>
    "tpu.trace_start"() <{level = 10 : i32, message = "bst,btw->bsw"}> : () -> ()
    %cst_295 = arith.constant dense<0.000000e+00> : vector<2x8x8xf32>
    %683 = tpu.matmul %681, %682, %cst_295 {dimension_numbers = #tpu.dot_dimension_numbers<[2], [1], [1], [2], [0, 0, 0, 1, 1, 2], [0], [0]>} : vector<2x8x8xbf16>, vector<2x8x8xbf16>, vector<2x8x8xf32> -> vector<2x8x8xf32>
    "tpu.trace_stop"() : () -> ()
    %684 = vector.shape_cast %683 : vector<2x8x8xf32> to vector<16x8xf32>
    %685 = arith.truncf %684 : vector<16x8xf32> to vector<16x8xbf16>
    %686 = vector.extract_strided_slice %667 {offsets = [0, 0], sizes = [8, 32], strides = [1, 1]} : vector<32x32xf32> to vector<8x32xf32>
    %687 = arith.truncf %686 : vector<8x32xf32> to vector<8x32xbf16>
    %cst_296 = arith.constant dense<0.000000e+00> : vector<16x32xf32>
    %688 = tpu.matmul %685, %687, %cst_296 {dimension_numbers = #tpu.dot_dimension_numbers<[1], [0], [0], [1], [0, 0, 1, 1], [], []>} : vector<16x8xbf16>, vector<8x32xbf16>, vector<16x32xf32> -> vector<16x32xf32>
    %689 = vector.extract_strided_slice %663 {offsets = [0, 0, 8], sizes = [2, 8, 8], strides = [1, 1, 1]} : vector<2x8x32xbf16> to vector<2x8x8xbf16>
    %690 = vector.extract_strided_slice %664 {offsets = [0, 0, 8], sizes = [2, 8, 8], strides = [1, 1, 1]} : vector<2x8x32xbf16> to vector<2x8x8xbf16>
    "tpu.trace_start"() <{level = 10 : i32, message = "bsw,btw->bst"}> : () -> ()
    %cst_297 = arith.constant dense<0.000000e+00> : vector<2x8x8xf32>
    %691 = tpu.matmul %689, %690, %cst_297 {dimension_numbers = #tpu.dot_dimension_numbers<[2], [2], [1], [1], [0, 0, 0, 1, 1, 1], [0], [0]>} : vector<2x8x8xbf16>, vector<2x8x8xbf16>, vector<2x8x8xf32> -> vector<2x8x8xf32>
    "tpu.trace_stop"() : () -> ()
    %cst_298 = arith.constant dense<0xFF800000> : vector<2x8xf32>
    %692 = vector.multi_reduction <maximumf>, %691, %cst_298 [2] : vector<2x8x8xf32> to vector<2x8xf32>
    %693 = vector.shape_cast %692 : vector<2x8xf32> to vector<2x8x1xf32>
    %694 = vector.broadcast %693 : vector<2x8x1xf32> to vector<2x8x8xf32>
    %695 = arith.subf %691, %694 : vector<2x8x8xf32>
    %696 = math.exp %695 : vector<2x8x8xf32>
    %cst_299 = arith.constant dense<0.000000e+00> : vector<2x8xf32>
    %697 = vector.multi_reduction <add>, %696, %cst_299 [2] : vector<2x8x8xf32> to vector<2x8xf32>
    %698 = vector.shape_cast %697 : vector<2x8xf32> to vector<2x8x1xf32>
    %699 = tpu.reciprocal %698 {approx = true} : vector<2x8x1xf32> -> vector<2x8x1xf32>
    %700 = vector.broadcast %699 : vector<2x8x1xf32> to vector<2x8x8xf32>
    %701 = arith.mulf %696, %700 : vector<2x8x8xf32>
    %702 = arith.truncf %701 : vector<2x8x8xf32> to vector<2x8x8xbf16>
    %703 = vector.extract_strided_slice %665 {offsets = [0, 0, 8], sizes = [2, 8, 8], strides = [1, 1, 1]} : vector<2x8x32xbf16> to vector<2x8x8xbf16>
    "tpu.trace_start"() <{level = 10 : i32, message = "bst,btw->bsw"}> : () -> ()
    %cst_300 = arith.constant dense<0.000000e+00> : vector<2x8x8xf32>
    %704 = tpu.matmul %702, %703, %cst_300 {dimension_numbers = #tpu.dot_dimension_numbers<[2], [1], [1], [2], [0, 0, 0, 1, 1, 2], [0], [0]>} : vector<2x8x8xbf16>, vector<2x8x8xbf16>, vector<2x8x8xf32> -> vector<2x8x8xf32>
    "tpu.trace_stop"() : () -> ()
    %705 = vector.shape_cast %704 : vector<2x8x8xf32> to vector<16x8xf32>
    %706 = arith.truncf %705 : vector<16x8xf32> to vector<16x8xbf16>
    %707 = vector.extract_strided_slice %667 {offsets = [8, 0], sizes = [8, 32], strides = [1, 1]} : vector<32x32xf32> to vector<8x32xf32>
    %708 = arith.truncf %707 : vector<8x32xf32> to vector<8x32xbf16>
    %cst_301 = arith.constant dense<0.000000e+00> : vector<16x32xf32>
    %709 = tpu.matmul %706, %708, %cst_301 {dimension_numbers = #tpu.dot_dimension_numbers<[1], [0], [0], [1], [0, 0, 1, 1], [], []>} : vector<16x8xbf16>, vector<8x32xbf16>, vector<16x32xf32> -> vector<16x32xf32>
    %710 = arith.addf %688, %709 : vector<16x32xf32>
    %711 = vector.extract_strided_slice %663 {offsets = [0, 0, 16], sizes = [2, 8, 8], strides = [1, 1, 1]} : vector<2x8x32xbf16> to vector<2x8x8xbf16>
    %712 = vector.extract_strided_slice %664 {offsets = [0, 0, 16], sizes = [2, 8, 8], strides = [1, 1, 1]} : vector<2x8x32xbf16> to vector<2x8x8xbf16>
    "tpu.trace_start"() <{level = 10 : i32, message = "bsw,btw->bst"}> : () -> ()
    %cst_302 = arith.constant dense<0.000000e+00> : vector<2x8x8xf32>
    %713 = tpu.matmul %711, %712, %cst_302 {dimension_numbers = #tpu.dot_dimension_numbers<[2], [2], [1], [1], [0, 0, 0, 1, 1, 1], [0], [0]>} : vector<2x8x8xbf16>, vector<2x8x8xbf16>, vector<2x8x8xf32> -> vector<2x8x8xf32>
    "tpu.trace_stop"() : () -> ()
    %cst_303 = arith.constant dense<0xFF800000> : vector<2x8xf32>
    %714 = vector.multi_reduction <maximumf>, %713, %cst_303 [2] : vector<2x8x8xf32> to vector<2x8xf32>
    %715 = vector.shape_cast %714 : vector<2x8xf32> to vector<2x8x1xf32>
    %716 = vector.broadcast %715 : vector<2x8x1xf32> to vector<2x8x8xf32>
    %717 = arith.subf %713, %716 : vector<2x8x8xf32>
    %718 = math.exp %717 : vector<2x8x8xf32>
    %cst_304 = arith.constant dense<0.000000e+00> : vector<2x8xf32>
    %719 = vector.multi_reduction <add>, %718, %cst_304 [2] : vector<2x8x8xf32> to vector<2x8xf32>
    %720 = vector.shape_cast %719 : vector<2x8xf32> to vector<2x8x1xf32>
    %721 = tpu.reciprocal %720 {approx = true} : vector<2x8x1xf32> -> vector<2x8x1xf32>
    %722 = vector.broadcast %721 : vector<2x8x1xf32> to vector<2x8x8xf32>
    %723 = arith.mulf %718, %722 : vector<2x8x8xf32>
    %724 = arith.truncf %723 : vector<2x8x8xf32> to vector<2x8x8xbf16>
    %725 = vector.extract_strided_slice %665 {offsets = [0, 0, 16], sizes = [2, 8, 8], strides = [1, 1, 1]} : vector<2x8x32xbf16> to vector<2x8x8xbf16>
    "tpu.trace_start"() <{level = 10 : i32, message = "bst,btw->bsw"}> : () -> ()
    %cst_305 = arith.constant dense<0.000000e+00> : vector<2x8x8xf32>
    %726 = tpu.matmul %724, %725, %cst_305 {dimension_numbers = #tpu.dot_dimension_numbers<[2], [1], [1], [2], [0, 0, 0, 1, 1, 2], [0], [0]>} : vector<2x8x8xbf16>, vector<2x8x8xbf16>, vector<2x8x8xf32> -> vector<2x8x8xf32>
    "tpu.trace_stop"() : () -> ()
    %727 = vector.shape_cast %726 : vector<2x8x8xf32> to vector<16x8xf32>
    %728 = arith.truncf %727 : vector<16x8xf32> to vector<16x8xbf16>
    %729 = vector.extract_strided_slice %667 {offsets = [16, 0], sizes = [8, 32], strides = [1, 1]} : vector<32x32xf32> to vector<8x32xf32>
    %730 = arith.truncf %729 : vector<8x32xf32> to vector<8x32xbf16>
    %cst_306 = arith.constant dense<0.000000e+00> : vector<16x32xf32>
    %731 = tpu.matmul %728, %730, %cst_306 {dimension_numbers = #tpu.dot_dimension_numbers<[1], [0], [0], [1], [0, 0, 1, 1], [], []>} : vector<16x8xbf16>, vector<8x32xbf16>, vector<16x32xf32> -> vector<16x32xf32>
    %732 = arith.addf %710, %731 : vector<16x32xf32>
    %733 = vector.extract_strided_slice %663 {offsets = [0, 0, 24], sizes = [2, 8, 8], strides = [1, 1, 1]} : vector<2x8x32xbf16> to vector<2x8x8xbf16>
    %734 = vector.extract_strided_slice %664 {offsets = [0, 0, 24], sizes = [2, 8, 8], strides = [1, 1, 1]} : vector<2x8x32xbf16> to vector<2x8x8xbf16>
    "tpu.trace_start"() <{level = 10 : i32, message = "bsw,btw->bst"}> : () -> ()
    %cst_307 = arith.constant dense<0.000000e+00> : vector<2x8x8xf32>
    %735 = tpu.matmul %733, %734, %cst_307 {dimension_numbers = #tpu.dot_dimension_numbers<[2], [2], [1], [1], [0, 0, 0, 1, 1, 1], [0], [0]>} : vector<2x8x8xbf16>, vector<2x8x8xbf16>, vector<2x8x8xf32> -> vector<2x8x8xf32>
    "tpu.trace_stop"() : () -> ()
    %cst_308 = arith.constant dense<0xFF800000> : vector<2x8xf32>
    %736 = vector.multi_reduction <maximumf>, %735, %cst_308 [2] : vector<2x8x8xf32> to vector<2x8xf32>
    %737 = vector.shape_cast %736 : vector<2x8xf32> to vector<2x8x1xf32>
    %738 = vector.broadcast %737 : vector<2x8x1xf32> to vector<2x8x8xf32>
    %739 = arith.subf %735, %738 : vector<2x8x8xf32>
    %740 = math.exp %739 : vector<2x8x8xf32>
    %cst_309 = arith.constant dense<0.000000e+00> : vector<2x8xf32>
    %741 = vector.multi_reduction <add>, %740, %cst_309 [2] : vector<2x8x8xf32> to vector<2x8xf32>
    %742 = vector.shape_cast %741 : vector<2x8xf32> to vector<2x8x1xf32>
    %743 = tpu.reciprocal %742 {approx = true} : vector<2x8x1xf32> -> vector<2x8x1xf32>
    %744 = vector.broadcast %743 : vector<2x8x1xf32> to vector<2x8x8xf32>
    %745 = arith.mulf %740, %744 : vector<2x8x8xf32>
    %746 = arith.truncf %745 : vector<2x8x8xf32> to vector<2x8x8xbf16>
    %747 = vector.extract_strided_slice %665 {offsets = [0, 0, 24], sizes = [2, 8, 8], strides = [1, 1, 1]} : vector<2x8x32xbf16> to vector<2x8x8xbf16>
    "tpu.trace_start"() <{level = 10 : i32, message = "bst,btw->bsw"}> : () -> ()
    %cst_310 = arith.constant dense<0.000000e+00> : vector<2x8x8xf32>
    %748 = tpu.matmul %746, %747, %cst_310 {dimension_numbers = #tpu.dot_dimension_numbers<[2], [1], [1], [2], [0, 0, 0, 1, 1, 2], [0], [0]>} : vector<2x8x8xbf16>, vector<2x8x8xbf16>, vector<2x8x8xf32> -> vector<2x8x8xf32>
    "tpu.trace_stop"() : () -> ()
    %749 = vector.shape_cast %748 : vector<2x8x8xf32> to vector<16x8xf32>
    %750 = arith.truncf %749 : vector<16x8xf32> to vector<16x8xbf16>
    %751 = vector.extract_strided_slice %667 {offsets = [24, 0], sizes = [8, 32], strides = [1, 1]} : vector<32x32xf32> to vector<8x32xf32>
    %752 = arith.truncf %751 : vector<8x32xf32> to vector<8x32xbf16>
    %cst_311 = arith.constant dense<0.000000e+00> : vector<16x32xf32>
    %753 = tpu.matmul %750, %752, %cst_311 {dimension_numbers = #tpu.dot_dimension_numbers<[1], [0], [0], [1], [0, 0, 1, 1], [], []>} : vector<16x8xbf16>, vector<8x32xbf16>, vector<16x32xf32> -> vector<16x32xf32>
    %754 = arith.addf %732, %753 : vector<16x32xf32>
    %c3_312 = arith.constant 3 : index
    %c0_313 = arith.constant 0 : index
    %c0_314 = arith.constant 0 : index
    %755 = vector.load %arg10[%c3_312, %c0_313, %c0_314] : memref<4x1x32xf32, #tpu.memory_space<vmem>>, vector<1x1x32xf32>
    %756 = vector.shape_cast %755 : vector<1x1x32xf32> to vector<1x32xf32>
    %757 = vector.broadcast %756 : vector<1x32xf32> to vector<16x32xf32>
    %758 = arith.addf %754, %757 : vector<16x32xf32>
    %759 = arith.addf %633, %758 : vector<16x32xf32>
    %c3_315 = arith.constant 3 : index
    %c0_316 = arith.constant 0 : index
    %c0_317 = arith.constant 0 : index
    %760 = vector.load %arg11[%c3_315, %c0_316, %c0_317] : memref<4x1x32xf32, #tpu.memory_space<vmem>>, vector<1x1x32xf32>
    %761 = vector.shape_cast %760 : vector<1x1x32xf32> to vector<1x32xf32>
    %c3_318 = arith.constant 3 : index
    %c0_319 = arith.constant 0 : index
    %c0_320 = arith.constant 0 : index
    %762 = vector.load %arg12[%c3_318, %c0_319, %c0_320] : memref<4x1x32xf32, #tpu.memory_space<vmem>>, vector<1x1x32xf32>
    %763 = vector.shape_cast %762 : vector<1x1x32xf32> to vector<1x32xf32>
    %cst_321 = arith.constant dense<0.000000e+00> : vector<16xf32>
    %764 = vector.multi_reduction <add>, %759, %cst_321 [1] : vector<16x32xf32> to vector<16xf32>
    %765 = vector.shape_cast %764 : vector<16xf32> to vector<16x1xf32>
    %cst_322 = arith.constant 3.200000e+01 : f32
    %766 = vector.broadcast %cst_322 : f32 to vector<16x1xf32>
    %767 = arith.divf %765, %766 : vector<16x1xf32>
    %768 = vector.broadcast %767 : vector<16x1xf32> to vector<16x32xf32>
    %769 = arith.subf %759, %768 : vector<16x32xf32>
    %770 = arith.mulf %769, %769 : vector<16x32xf32>
    %cst_323 = arith.constant dense<0.000000e+00> : vector<16xf32>
    %771 = vector.multi_reduction <add>, %770, %cst_323 [1] : vector<16x32xf32> to vector<16xf32>
    %772 = vector.shape_cast %771 : vector<16xf32> to vector<16x1xf32>
    %cst_324 = arith.constant 3.200000e+01 : f32
    %773 = vector.broadcast %cst_324 : f32 to vector<16x1xf32>
    %774 = arith.divf %772, %773 : vector<16x1xf32>
    %775 = vector.broadcast %767 : vector<16x1xf32> to vector<16x32xf32>
    %776 = arith.subf %759, %775 : vector<16x32xf32>
    %cst_325 = arith.constant 9.99999996E-13 : f32
    %777 = vector.broadcast %cst_325 : f32 to vector<16x1xf32>
    %778 = arith.addf %774, %777 : vector<16x1xf32>
    %779 = math.rsqrt %778 : vector<16x1xf32>
    %780 = vector.broadcast %779 : vector<16x1xf32> to vector<16x32xf32>
    %781 = arith.mulf %776, %780 : vector<16x32xf32>
    %782 = vector.broadcast %761 : vector<1x32xf32> to vector<16x32xf32>
    %783 = arith.mulf %782, %781 : vector<16x32xf32>
    %784 = vector.broadcast %763 : vector<1x32xf32> to vector<16x32xf32>
    %785 = arith.addf %783, %784 : vector<16x32xf32>
    %c3_326 = arith.constant 3 : index
    %c0_327 = arith.constant 0 : index
    %c0_328 = arith.constant 0 : index
    %786 = vector.load %arg13[%c3_326, %c0_327, %c0_328] : memref<4x32x128xbf16, #tpu.memory_space<vmem>>, vector<1x32x128xbf16>
    %787 = vector.shape_cast %786 : vector<1x32x128xbf16> to vector<32x128xbf16>
    %c3_329 = arith.constant 3 : index
    %c0_330 = arith.constant 0 : index
    %c0_331 = arith.constant 0 : index
    %788 = vector.load %arg14[%c3_329, %c0_330, %c0_331] : memref<4x1x128xf32, #tpu.memory_space<vmem>>, vector<1x1x128xf32>
    %789 = vector.shape_cast %788 : vector<1x1x128xf32> to vector<1x128xf32>
    %790 = arith.truncf %785 : vector<16x32xf32> to vector<16x32xbf16>
    %cst_332 = arith.constant dense<0.000000e+00> : vector<16x128xf32>
    %791 = tpu.matmul %790, %787, %cst_332 {dimension_numbers = #tpu.dot_dimension_numbers<[1], [0], [0], [1], [0, 0, 1, 1], [], []>} : vector<16x32xbf16>, vector<32x128xbf16>, vector<16x128xf32> -> vector<16x128xf32>
    %792 = vector.broadcast %789 : vector<1x128xf32> to vector<16x128xf32>
    %793 = arith.addf %791, %792 : vector<16x128xf32>
    %cst_333 = arith.constant 5.000000e-01 : f32
    %794 = vector.broadcast %cst_333 : f32 to vector<16x128xf32>
    %795 = arith.mulf %793, %794 : vector<16x128xf32>
    %cst_334 = arith.constant 0.707106769 : f32
    %796 = vector.broadcast %cst_334 : f32 to vector<16x128xf32>
    %797 = arith.mulf %793, %796 : vector<16x128xf32>
    %798 = math.erf %797 : vector<16x128xf32>
    %cst_335 = arith.constant 1.000000e+00 : f32
    %799 = vector.broadcast %cst_335 : f32 to vector<16x128xf32>
    %800 = arith.addf %799, %798 : vector<16x128xf32>
    %801 = arith.mulf %795, %800 : vector<16x128xf32>
    %c3_336 = arith.constant 3 : index
    %c0_337 = arith.constant 0 : index
    %c0_338 = arith.constant 0 : index
    %802 = vector.load %arg15[%c3_336, %c0_337, %c0_338] : memref<4x128x32xbf16, #tpu.memory_space<vmem>>, vector<1x128x32xbf16>
    %803 = vector.shape_cast %802 : vector<1x128x32xbf16> to vector<128x32xbf16>
    %c3_339 = arith.constant 3 : index
    %c0_340 = arith.constant 0 : index
    %c0_341 = arith.constant 0 : index
    %804 = vector.load %arg16[%c3_339, %c0_340, %c0_341] : memref<4x1x32xf32, #tpu.memory_space<vmem>>, vector<1x1x32xf32>
    %805 = vector.shape_cast %804 : vector<1x1x32xf32> to vector<1x32xf32>
    %806 = arith.truncf %801 : vector<16x128xf32> to vector<16x128xbf16>
    %cst_342 = arith.constant dense<0.000000e+00> : vector<16x32xf32>
    %807 = tpu.matmul %806, %803, %cst_342 {dimension_numbers = #tpu.dot_dimension_numbers<[1], [0], [0], [1], [0, 0, 1, 1], [], []>} : vector<16x128xbf16>, vector<128x32xbf16>, vector<16x32xf32> -> vector<16x32xf32>
    %808 = vector.broadcast %805 : vector<1x32xf32> to vector<16x32xf32>
    %809 = arith.addf %807, %808 : vector<16x32xf32>
    %810 = arith.addf %785, %809 : vector<16x32xf32>
    %c3_343 = arith.constant 3 : index
    %c0_344 = arith.constant 0 : index
    %c0_345 = arith.constant 0 : index
    %811 = vector.load %arg17[%c3_343, %c0_344, %c0_345] : memref<4x1x32xf32, #tpu.memory_space<vmem>>, vector<1x1x32xf32>
    %812 = vector.shape_cast %811 : vector<1x1x32xf32> to vector<1x32xf32>
    %c3_346 = arith.constant 3 : index
    %c0_347 = arith.constant 0 : index
    %c0_348 = arith.constant 0 : index
    %813 = vector.load %arg18[%c3_346, %c0_347, %c0_348] : memref<4x1x32xf32, #tpu.memory_space<vmem>>, vector<1x1x32xf32>
    %814 = vector.shape_cast %813 : vector<1x1x32xf32> to vector<1x32xf32>
    %cst_349 = arith.constant dense<0.000000e+00> : vector<16xf32>
    %815 = vector.multi_reduction <add>, %810, %cst_349 [1] : vector<16x32xf32> to vector<16xf32>
    %816 = vector.shape_cast %815 : vector<16xf32> to vector<16x1xf32>
    %cst_350 = arith.constant 3.200000e+01 : f32
    %817 = vector.broadcast %cst_350 : f32 to vector<16x1xf32>
    %818 = arith.divf %816, %817 : vector<16x1xf32>
    %819 = vector.broadcast %818 : vector<16x1xf32> to vector<16x32xf32>
    %820 = arith.subf %810, %819 : vector<16x32xf32>
    %821 = arith.mulf %820, %820 : vector<16x32xf32>
    %cst_351 = arith.constant dense<0.000000e+00> : vector<16xf32>
    %822 = vector.multi_reduction <add>, %821, %cst_351 [1] : vector<16x32xf32> to vector<16xf32>
    %823 = vector.shape_cast %822 : vector<16xf32> to vector<16x1xf32>
    %cst_352 = arith.constant 3.200000e+01 : f32
    %824 = vector.broadcast %cst_352 : f32 to vector<16x1xf32>
    %825 = arith.divf %823, %824 : vector<16x1xf32>
    %826 = vector.broadcast %818 : vector<16x1xf32> to vector<16x32xf32>
    %827 = arith.subf %810, %826 : vector<16x32xf32>
    %cst_353 = arith.constant 9.99999996E-13 : f32
    %828 = vector.broadcast %cst_353 : f32 to vector<16x1xf32>
    %829 = arith.addf %825, %828 : vector<16x1xf32>
    %830 = math.rsqrt %829 : vector<16x1xf32>
    %831 = vector.broadcast %830 : vector<16x1xf32> to vector<16x32xf32>
    %832 = arith.mulf %827, %831 : vector<16x32xf32>
    %833 = vector.broadcast %812 : vector<1x32xf32> to vector<16x32xf32>
    %834 = arith.mulf %833, %832 : vector<16x32xf32>
    %835 = vector.broadcast %814 : vector<1x32xf32> to vector<16x32xf32>
    %836 = arith.addf %834, %835 : vector<16x32xf32>
    %837 = arith.addf %633, %836 : vector<16x32xf32>
    %c0_354 = arith.constant 0 : index
    %c0_355 = arith.constant 0 : index
    %838 = vector.load %arg19[%c0_354, %c0_355] : memref<16x32xf32, #tpu.memory_space<vmem>>, vector<16x32xf32>
    tpu.vector_store %arg19[%c0_354, %c0_355], %837 {strides = array<i32>} : memref<16x32xf32, #tpu.memory_space<vmem>>, vector<16x32xf32>,
    return
  }
}

</mosaic_0001>

<bundles_post_ra>
// kernel: tpu_custom_call.1
= control target key start
LH: loop header
LB: loop body
LE: loop exit
PB: predicated region body
PF: predicated region fallthrough
CT: control target
= control target key end

     0   :  { %s6549_s0 = inlined_call_operand.hbm [shape: f32[16,32], index: 0, kind: input, shape index: {}]   ;;  %s6550_s1 = inlined_call_operand.hbm [shape: f32[1,32], index: 1, kind: input, shape index: {}]   ;;  %s6551_s2 = inlined_call_operand.hbm [shape: f32[1,32], index: 2, kind: input, shape index: {}]   ;;  %s6552_s3 = inlined_call_operand.vmem [shape: bf16[4,32,32], index: 3, kind: input, shape index: {}]   ;;  %s6553_s4 = inlined_call_operand.hbm [shape: f32[4,1,32], index: 4, kind: input, shape index: {}]   ;;  %s6554_s5 = inlined_call_operand.vmem [shape: bf16[4,32,32], index: 5, kind: input, shape index: {}]   ;;  %s6555_s6 = inlined_call_operand.hbm [shape: f32[4,1,32], index: 6, kind: input, shape index: {}]   ;;  %s6556_s7 = inlined_call_operand.vmem [shape: bf16[4,32,32], index: 7, kind: input, shape index: {}]   ;;  %s6557_s8 = inlined_call_operand.vmem [shape: f32[4,1,32], index: 8, kind: input, shape index: {}]   ;;  %s6558_s9 = inlined_call_operand.vmem [shape: f32[4,32,32], index: 9, kind: input, shape index: {}]   ;;  %s6559_s10 = inlined_call_operand.hbm [shape: f32[4,1,32], index: 10, kind: input, shape index: {}]   ;;  %s6560_s11 = inlined_call_operand.hbm [shape: f32[4,1,32], index: 11, kind: input, shape index: {}]   ;;  %s6561_s12 = inlined_call_operand.vmem [shape: f32[4,1,32], index: 12, kind: input, shape index: {}]   ;;  %s6562_s13 = inlined_call_operand.hbm [shape: bf16[4,32,128], index: 13, kind: input, shape index: {}]   ;;  %s6563_s14 = inlined_call_operand.hbm [shape: f32[4,1,128], index: 14, kind: input, shape index: {}]   ;;  %s6564_s15 = inlined_call_operand.vmem [shape: bf16[4,128,32], index: 15, kind: input, shape index: {}]   ;;  %s6565_s16 = inlined_call_operand.vmem [shape: f32[4,1,32], index: 16, kind: input, shape index: {}]   ;;  %s6566_s17 = inlined_call_operand.hbm [shape: f32[4,1,32], index: 17, kind: input, shape index: {}]   ;;  %s6567_s18 = inlined_call_operand.hbm [shape: f32[4,1,32], index: 18, kind: input, shape index: {}]   ;;  %s6568_s19 = inlined_call_operand.hbm [shape: f32[16,32], index: 19, kind: output, shape index: {}]  }
   0x1   :  { %6570 = sst [smem:[#allocation28_spill]] %s6549_s0 }
   0x2   :  { %6571 = sst [smem:[#allocation29_spill]] %s6550_s1 }
   0x3   :  { %6572 = sst [smem:[#allocation30_spill]] %s6551_s2 }
   0x4   :  { %6573 = sst [smem:[#allocation31_spill]] %s6552_s3 }
   0x5   :  { %24 = vsyncpa [#allocation3], 0 }
   0x6   :  { %25 = vsyncpa [#allocation6], 0 }
   0x7   :  { %26 = vsyncpa [#allocation9], 0 }
   0x8   :  { %27 = vsyncpa [#allocation12], 0 }
   0x9   :  { %28 = vsyncpa [#allocation15], 0 }
   0xa   :  { %29 = vsyncpa [#allocation18], 0  ;;  %s6574_s20 = sld [smem:[#allocation29_spill]] }
  0x10   :  { %s49_s21 = sshll.u32 %s6574_s20, 4  ;;  %s50_s21 = int_to_ptr.hbm [resolvable:$true] %s49_s21 }
  0x11   :  { %30 = vsyncpa [#allocation4], 0  ;;  %s5432_s1 = smov [#allocation5]   ;;  %s72_s24 = sshll.u32 %s6553_s4, 4  ;;  %s73_s24 = int_to_ptr.hbm [resolvable:$true] %s72_s24 }
  0x12   :  { %s51_s22 = sshll.u32 %s5432_s1, 4  ;;  %s5433_s25 = smov [#allocation8]   ;;  %s52_s22 = int_to_ptr.vmem [resolvable:$true] %s51_s22 }
  0x13   :  { %54 = dma.hbm_to_vmem [thread:$0]  %s50_s21, 16, %s52_s22, [#allocation6]  }
  0x14   :  { %s74_s3 = sshll.u32 %s5433_s25, 4  ;;  %s5434_s26 = smov 16   ;;  %s75_s3 = int_to_ptr.vmem [resolvable:$true] %s74_s3 }
  0x15   :  { %s5435_s27 = smov 1   ;;  %s106_s0 = sshll.u32 %s6559_s10, 4  ;;  %s107_s0 = int_to_ptr.hbm [resolvable:$true] %s106_s0 }
  0x16   :  { %80 = dma.hbm_to_vmem [thread:$0]  %s73_s24, 64, %s75_s3, [#allocation9], %s5434_s26, %s5434_s26, %s5435_s27  }
  0x17   :  { %s5436_s30 = smov [#allocation11]   ;;  %s134_s1 = sshll.u32 %s6562_s13, 4  ;;  %s135_s1 = int_to_ptr.hbm [resolvable:$true] %s134_s1 }
  0x18   :  { %s108_s20 = sshll.u32 %s5436_s30, 4  ;;  %s5437_s22 = smov [#allocation14]   ;;  %s109_s20 = int_to_ptr.vmem [resolvable:$true] %s108_s20 }
  0x19   :  { %114 = dma.hbm_to_vmem [thread:$0]  %s107_s0, 64, %s109_s20, [#allocation12], %s5434_s26, %s5434_s26, %s5435_s27  }
  0x1a   :  { %s136_s2 = sshll.u32 %s5437_s22, 4  ;;  %s5438_s23 = smov 64   ;;  %s137_s2 = int_to_ptr.vmem [resolvable:$true] %s136_s2 }
  0x1b   :  { %s5439_s24 = smov 4   ;;  %s164_s3 = sshll.u32 %s6566_s17, 4  ;;  %s165_s3 = int_to_ptr.hbm [resolvable:$true] %s164_s3 }
  0x1c   :  { %142 = dma.hbm_to_vmem [thread:$0]  %s135_s1, 1024, %s137_s2, [#allocation15], %s5438_s23, %s5438_s23, %s5439_s24  }
  0x1d   :  { %s5440_s28 = smov [#allocation17]   ;;  %s6575_s4 = sld [smem:[#allocation28_spill]] }
  0x1e   :  { %s166_s29 = sshll.u32 %s5440_s28, 4  ;;  %s5441_s0 = smov [#allocation2]   ;;  %s167_s29 = int_to_ptr.vmem [resolvable:$true] %s166_s29 }
  0x1f   :  { %172 = dma.hbm_to_vmem [thread:$0]  %s165_s3, 64, %s167_s29, [#allocation18], %s5434_s26, %s5434_s26, %s5435_s27  }
  0x20   :  { %s37_s20 = sshll.u32 %s5441_s0, 4  ;;  %s5442_s1 = smov 128   ;;  %s38_s20 = int_to_ptr.vmem [resolvable:$true] %s37_s20 }
  0x21   :  { %s5443_s22 = smov 8   ;;  %s6576_s23 = sld [smem:[#allocation30_spill]] }
  0x22   :  { %s5444_s10 = smov [#allocation7]   ;;  %s87_s29 = sshll.u32 %s6555_s6, 4  ;;  %s88_s29 = int_to_ptr.hbm [resolvable:$true] %s87_s29 }
  0x23   :  { %s35_s21 = sshll.u32 %s6575_s4, 4  ;;  %s62_s25 = sshll.u32 %s5444_s10, 4  ;;  %s36_s21 = int_to_ptr.hbm [resolvable:$true] %s35_s21  ;;  %s63_s25 = int_to_ptr.vmem [resolvable:$true] %s62_s25 }
  0x24   :  { %43 = dma.hbm_to_vmem [thread:$0]  %s36_s21, 256, %s38_s20, [#allocation3], %s5442_s1, %s5442_s1, %s5443_s22  }
  0x25   :  { %s5445_s13 = smov [#allocation10]   ;;  %s119_s21 = sshll.u32 %s6560_s11, 4  ;;  %s120_s21 = int_to_ptr.hbm [resolvable:$true] %s119_s21 }
  0x26   :  { %s89_s30 = sshll.u32 %s5445_s13, 4  ;;  %s147_s2 = sshll.u32 %s6563_s14, 4  ;;  %s90_s30 = int_to_ptr.vmem [resolvable:$true] %s89_s30  ;;  %s148_s2 = int_to_ptr.hbm [resolvable:$true] %s147_s2 }
  0x27   :  { %s60_s24 = sshll.u32 %s6576_s23, 4  ;;  %s5446_s23 = smov [#allocation13]   ;;  %s61_s24 = int_to_ptr.hbm [resolvable:$true] %s60_s24 }
  0x28   :  { %65 = dma.hbm_to_vmem [thread:$0]  %s61_s24, 16, %s63_s25, [#allocation6]  }
  0x29   :  { %95 = dma.hbm_to_vmem [thread:$0]  %s88_s29, 64, %s90_s30, [#allocation9], %s5434_s26, %s5434_s26, %s5435_s27  }
  0x2a   :  { %s121_s6 = sshll.u32 %s5446_s23, 4  ;;  %s5447_s24 = smov [#allocation16]   ;;  %s122_s6 = int_to_ptr.vmem [resolvable:$true] %s121_s6 }
  0x2b   :  { %127 = dma.hbm_to_vmem [thread:$0]  %s120_s21, 64, %s122_s6, [#allocation12], %s5434_s26, %s5434_s26, %s5435_s27  }
  0x2c   :  { %s149_s11 = sshll.u32 %s5447_s24, 4  ;;  %s177_s28 = sshll.u32 %s6567_s18, 4  ;;  %s150_s11 = int_to_ptr.vmem [resolvable:$true] %s149_s11  ;;  %s178_s28 = int_to_ptr.hbm [resolvable:$true] %s177_s28 }
  0x2d   :  { %155 = dma.hbm_to_vmem [thread:$0]  %s148_s2, 64, %s150_s11, [#allocation15], %s5434_s26, %s5434_s26, %s5435_s27  }
  0x2e   :  { %s5448_s14 = smov [#allocation19]  }
  0x2f   :  { %s179_s3 = sshll.u32 %s5448_s14, 4  ;;  %s180_s3 = int_to_ptr.vmem [resolvable:$true] %s179_s3 }
  0x30   :  { %185 = dma.hbm_to_vmem [thread:$0]  %s178_s28, 64, %s180_s3, [#allocation18], %s5434_s26, %s5434_s26, %s5435_s27  }
  0x31   :  { %5418 = dma.done.wait [#allocation3], 256  }
  0x32   :  { %5419 = vsyncadd [#allocation3], 4294967040 }
  0x33   :  { %5420 = dma.done.wait [#allocation6], 32  }
  0x34   :  { %5421 = vsyncadd [#allocation6], 4294967264 }
  0x35   :  { %5422 = dma.done.wait [#allocation9], 128  }
  0x36   :  { %5423 = vsyncadd [#allocation9], 4294967168 }
  0x37   :  { %5424 = dma.done.wait [#allocation12], 128  }
  0x38   :  { %5425 = vsyncadd [#allocation12], 4294967168 }
  0x39   :  { %5426 = dma.done.wait [#allocation15], 1088  }
  0x3a   :  { %5427 = vsyncadd [#allocation15], 4294966208 }
  0x3b   :  { %5428 = dma.done.wait [#allocation18], 128  }
  0x3c   :  { %5429 = vsyncadd [#allocation18], 4294967168  ;;  %vm235_vm0 = vcmask 261120   ;;  %v231_v0 = vld [vmem:[#allocation2] sm:$0xff]  ;;  %v232_v1 = vld [vmem:[#allocation2 + $0x8] sm:$0xff]  ;;  %v5449_v4 = vmov 32.0  }
  0x3d   :  { %v236_v2 = vsel %vm235_vm0, %v231_v0, 0.0  ;;  %v239_v3 = vsel %vm235_vm0, %v232_v1, 0.0  ;;  %4948 = vrcp.f32 %v5449_v4  ;;  %s6577_s27 = sld [smem:[#allocation31_spill]]  ;;  %v4823_v22 = vld [vmem:[%s6554_s5 + $0x8] sm:$0xff]  ;;  %v4822_v26 = vld [vmem:[%s6554_s5] sm:$0xff]  ;;  %vm415_vm8 = vcmask 64512  }
  0x3e   :  { %237 = vadd.xlane.f32.xlu0 %v236_v2  ;;  %v4825_v23 = vld [vmem:[%s6556_s7 + $0x8] sm:$0xff]  ;;  %361 = vmatpush.bf16.msra.mxu1 %v4823_v22  ;;  %v4824_v28 = vld [vmem:[%s6556_s7] sm:$0xff]  ;;  %v4906_v46 = vld [vmem:[#allocation5] ss:$0 sm:$0xff]  ;;  %s5450_s11 = smov 120   ;;  %vm481_vm9 = vcmask 1043456  }
  0x3f   :  { %395 = vmatpush.bf16.msra.mxu3 %v4825_v23  ;;  %v4907_v51 = vld [vmem:[#allocation7] ss:$0 sm:$0xff]  ;;  %v4908_v56 = vld [vmem:[#allocation8] ss:$0 sm:$0xff]  ;;  %v4909_v57 = vld [vmem:[#allocation10] ss:$0 sm:$0xff] }
  0x40   :  { %s5451_s10 = smov 112   ;;  %s5452_s25 = smov 104  }
  0x42   :  { %362 = vmatpush.bf16.msra.mxu1 %v4822_v26 }
  0x43   :  { %v4949_v5 = vpop.eup %4948  ;;  %v4821_v21 = vld [vmem:[%s6577_s27 + $0x8] sm:$0xff]  ;;  %v4820_v25 = vld [vmem:[%s6577_s27] sm:$0xff]  ;;  %396 = vmatpush.bf16.msra.mxu3 %v4824_v28 }
  0x44   :  { %v243_v6 = vmul.f32 32.0, %v4949_v5  ;;  %vm247_vm1 = vweird.f32 %v4949_v5  ;;  %327 = vmatpush.bf16.msra.mxu0 %v4821_v21 }
  0x46   :  { %240 = vadd.xlane.f32.xlu0 %v239_v3  ;;  %v244_v7 = vsub.f32 1.0, %v243_v6 }
  0x48   :  { %v245_v8 = vmul.f32 %v4949_v5, %v244_v7  ;;  %328 = vmatpush.bf16.msra.mxu0 %v4820_v25 }
  0x4a   :  { %v246_v9 = vadd.f32 %v4949_v5, %v245_v8 }
  0x4c   :  { %v5613_v10 = vsel %vm247_vm1, %v4949_v5, %v246_v9 }
  0xb1   :  { %v238_v11 = vpop.xlane.xlu0 %237 }
  0xb2   :  { %v249_v12 = vmul.f32 %v5613_v10, %v238_v11 }
  0xb4   :  { %v251_v13 = vsub.f32 %v231_v0, %v249_v12  ;;  %v4910_v0 = vld [vmem:[%s6557_s8] ss:$0 sm:$0xff] }
  0xb6   :  { %v253_v14 = vmul.f32 %v251_v13, %v251_v13 }
  0xb8   :  { %v255_v15 = vsel %vm235_vm0, %v253_v14, 0.0 }
  0xb9   :  { %256 = vadd.xlane.f32.xlu1 %v255_v15  ;;  %v241_v16 = vpop.xlane.xlu0 %240 }
  0xba   :  { %v250_v17 = vmul.f32 %v5613_v10, %v241_v16 }
  0xbc   :  { %v252_v18 = vsub.f32 %v232_v1, %v250_v17 }
  0xbe   :  { %v254_v19 = vmul.f32 %v252_v18, %v252_v18 }
  0xc0   :  { %v258_v20 = vsel %vm235_vm0, %v254_v19, 0.0 }
  0xc1   :  { %259 = vadd.xlane.f32.xlu1 %v258_v20 }
 0x12c   :  { %v257_v24 = vpop.xlane.xlu1 %256 }
 0x12d   :  { %v261_v27 = vmul.f32 %v257_v24, %v5613_v10 }
 0x12f   :  { %v263_v29 = vadd.f32 1e-12, %v261_v27 }
 0x131   :  { %4950 = vrsqrt.f32 %v263_v29  ;;  %vm271_vm3 = vweird.f32 %v263_v29 }
 0x134   :  { %v260_v30 = vpop.xlane.xlu1 %259 }
 0x135   :  { %v262_v31 = vmul.f32 %v260_v30, %v5613_v10 }
 0x137   :  { %v4951_v32 = vpop.eup %4950  ;;  %v264_v33 = vadd.f32 1e-12, %v262_v31 }
 0x138   :  { %v266_v34 = vmul.f32 %v4951_v32, %v263_v29  ;;  %vm272_vm2 = vweird.f32 %v4951_v32 }
 0x139   :  { %4952 = vrsqrt.f32 %v264_v33  ;;  %vm273_vm4 = vmor %vm271_vm3, %vm272_vm2  ;;  %vm281_vm6 = vweird.f32 %v264_v33 }
 0x13a   :  { %v267_v35 = vmul.f32 %v4951_v32, %v266_v34 }
 0x13c   :  { %v268_v36 = vmul.f32 0.5, %v267_v35 }
 0x13e   :  { %v269_v37 = vsub.f32 1.5, %v268_v36 }
 0x13f   :  { %v4953_v38 = vpop.eup %4952 }
 0x140   :  { %v270_v39 = vmul.f32 %v4951_v32, %v269_v37  ;;  %v276_v40 = vmul.f32 %v4953_v38, %v264_v33  ;;  %vm282_vm5 = vweird.f32 %v4953_v38 }
 0x141   :  { %vm283_vm7 = vmor %vm281_vm6, %vm282_vm5 }
 0x142   :  { %v277_v41 = vmul.f32 %v4953_v38, %v276_v40  ;;  %v274_v42 = vsel %vm273_vm4, %v4951_v32, %v270_v39 }
 0x143   :  { %v285_v45 = vmul.f32 %v274_v42, %v251_v13 }
 0x144   :  { %v278_v43 = vmul.f32 0.5, %v277_v41 }
 0x145   :  { %v290_v50 = vmul.f32 %v4906_v46, %v285_v45 }
 0x146   :  { %v279_v44 = vsub.f32 1.5, %v278_v43 }
 0x147   :  { %v5639_v53 = vadd.f32 %v4907_v51, %v290_v50 }
 0x148   :  { %v280_v47 = vmul.f32 %v4953_v38, %v279_v44 }
 0x14a   :  { %v284_v48 = vsel %vm283_vm7, %v4953_v38, %v280_v47 }
 0x14b   :  { %v286_v49 = vmul.f32 %v284_v48, %v252_v18 }
 0x14d   :  { %v291_v52 = vmul.f32 %v4906_v46, %v286_v49 }
 0x14f   :  { %v5641_v54 = vadd.f32 %v4907_v51, %v291_v52 }
 0x151   :  { %v302_v55 = vpack.c.bf16 %v5641_v54, %v5639_v53 }
 0x153   :  { %4363 = vmatmul.msk.bf16.vlgmr.msra.gmra.mxu0 %vm235_vm0, %v302_v55  ;;  %4372 = vmatmul.msk.bf16.vlgmr.msra.gmra.mxu1 %vm235_vm0, %v302_v55 }
 0x154   :  { %4381 = vmatmul.msk.bf16.vlgmr.msra.gmra.mxu3 %vm235_vm0, %v302_v55 }
 0x1d0   :  { %v330_v58 = vpop.f32.mrf.mxu0  ;;  %v364_v59 = vpop.f32.mrf.mxu1 }
 0x1d1   :  { %v331_v60 = vadd.f32 %v4908_v56, %v330_v58  ;;  %v365_v61 = vadd.f32 %v4909_v57, %v364_v59 }
 0x1d3   :  { %v403_v62 = vmul.f32 0.35355338, %v331_v60  ;;  %v407_v63 = vpack.c.bf16 %v365_v61, %v365_v61 }
 0x1d5   :  { %v525_v1 = vunpack.c.l.b16 %v407_v63  ;;  %v420_v2 = vsel %vm415_vm8, %v407_v63, 0  ;;  %v405_v3 = vpack.c.bf16 %v403_v62, %v403_v62 }
 0x1d6   :  { %429 = vmatpush.bf16.xpose.msrb.mxu3 %v420_v2 }
 0x1d7   :  { %v5652_v4 = vpack.c.b16 %v525_v1, %v525_v1  ;;  %v398_v5 = vpop.f32.mrf.mxu3  ;;  %v520_v13 = vunpack.c.l.b16 %v405_v3 }
 0x1d8   :  { %v399_v6 = vadd.f32 %v4910_v0, %v398_v5  ;;  %v332_v7 = vpop.f32.mrf.mxu0  ;;  %v366_v8 = vpop.f32.mrf.mxu1 }
 0x1d9   :  { %v333_v9 = vadd.f32 %v4908_v56, %v332_v7  ;;  %v367_v11 = vadd.f32 %v4909_v57, %v366_v8  ;;  %527 = vrot.lane.b32.xlu2 %v5652_v4, %s5450_s11  ;;  %v5661_v22 = vpack.c.b16 %v520_v13, %v520_v13 }
 0x1da   :  { %v409_v12 = vpack.c.bf16 %v399_v6, %v399_v6 }
 0x1db   :  { %v404_v14 = vmul.f32 0.35355338, %v333_v9  ;;  %v408_v15 = vpack.c.bf16 %v367_v11, %v367_v11 }
 0x1dc   :  { %v483_v16 = vsel %vm481_vm9, %v409_v12, 0  ;;  %v602_v39 = vunpack.c.l.b16 %v409_v12 }
 0x1dd   :  { %v406_v17 = vpack.c.bf16 %v404_v14, %v404_v14  ;;  %v554_v18 = vunpack.c.l.b16 %v408_v15  ;;  %492 = vmatpush.bf16.msrb.mxu1 %v483_v16  ;;  %4382 = vmatmul.msk.bf16.vlgmr.msrb.gmra.mxu3 %vm415_vm8, %v405_v3  ;;  %v439_v19 = vsel %vm415_vm8, %v408_v15, 0  ;;  %v412_v15 = vld [vmem:[%s6558_s9 + $0x8] sm:$0xff] }
 0x1de   :  { %448 = vmatpush.bf16.xpose.msrb.mxu0 %v439_v19  ;;  %v5677_v40 = vpack.c.b16 %v602_v39, %v602_v39 }
 0x1df   :  { %v400_v20 = vpop.f32.mrf.mxu3  ;;  %v5659_v21 = vpack.c.b16 %v554_v18, %v554_v18  ;;  %v549_v23 = vunpack.c.l.b16 %v406_v17 }
 0x1e0   :  { %v401_v24 = vadd.f32 %v4910_v0, %v400_v20 }
 0x1e1   :  { %556 = vrot.lane.b32.xlu0 %v5659_v21, %s5450_s11  ;;  %522 = vrot.lane.b32.xlu2 %v5661_v22, %s5450_s11  ;;  %v550_v25 = vpack.c.b16 %v549_v23, %v549_v23 }
 0x1e2   :  { %v410_v26 = vpack.c.bf16 %v401_v24, %v401_v24 }
 0x1e3   :  { %551 = vrot.lane.b32.xlu1 %v550_v25, %s5450_s11 }
 0x1e4   :  { %v502_v27 = vsel %vm481_vm9, %v410_v26, 0  ;;  %v626_v57 = vunpack.c.l.b16 %v410_v26 }
 0x1e5   :  { %511 = vmatpush.bf16.msra.mxu2 %v502_v27  ;;  %4383 = vmatmul.msk.bf16.vlgmr.msrb.gmra.mxu0 %vm415_vm8, %v406_v17  ;;  %v650_v17 = vpack.c.bf16 %v412_v15, %v412_v15 }
 0x1e6   :  { %v5689_v58 = vpack.c.b16 %v626_v57, %v626_v57 }
 0x1e7   :  { %v655_v18 = vsel %vm481_vm9, %v650_v17, 0 }
 0x233   :  { %v528_v28 = vpop.permute.xlu2 %527 }
 0x234   :  { %v533_v29 = vsel %vm415_vm8, %v528_v28, 0 }
 0x235   :  { %542 = vmatpush.bf16.xpose.msra.mxu3 %v533_v29 }
 0x23b   :  { %v523_v30 = vpop.permute.xlu2 %522 }
 0x23c   :  { %4386 = vmatmul.msk.bf16.vlgmr.msra.gmra.mxu3 %vm415_vm8, %v523_v30 }
 0x23d   :  { %664 = vmatpush.bf16.msrb.mxu3 %v655_v18 }
 0x253   :  { %v557_v31 = vpop.permute.xlu0 %556 }
 0x254   :  { %v562_v32 = vsel %vm415_vm8, %v557_v31, 0 }
 0x255   :  { %571 = vmatpush.bf16.xpose.msra.mxu0 %v562_v32  ;;  %v552_v33 = vpop.permute.xlu1 %551 }
 0x25c   :  { %4387 = vmatmul.msk.bf16.vlgmr.msra.gmra.mxu0 %vm415_vm8, %v552_v33 }
 0x260   :  { %v431_v34 = vpop.f32.mrf.mxu3 }
 0x261   :  { %v454_v35 = vsel %vm415_vm8, %v431_v34, -inf }
 0x262   :  { %v5675_v36 = vpop.f32.mrf.mxu0  ;;  %455 = vmax.xlane.f32.xlu2 %v454_v35 }
 0x263   :  { %v457_v55 = vsel %vm415_vm8, %v5675_v36, -inf }
 0x268   :  { %v433_v37 = vpop.f32.mrf.mxu3 }
 0x26a   :  { %v452_v38 = vpop.f32.mrf.mxu0 }
 0x27a   :  { %604 = vrot.lane.b32.xlu2 %v5677_v40, %s5450_s11 }
 0x2bf   :  { %v544_v41 = vpop.f32.mrf.mxu3 }
 0x2c0   :  { %v577_v42 = vsel %vm415_vm8, %v544_v41, -inf }
 0x2c1   :  { %578 = vmax.xlane.f32.xlu0 %v577_v42 }
 0x2c7   :  { %v546_v43 = vpop.f32.mrf.mxu3 }
 0x2d5   :  { %v456_v44 = vpop.xlane.xlu2 %455  ;;  %693 = vrot.lane.b32.xlu0 %v5652_v4, %s5451_s10 }
 0x2d6   :  { %v460_v45 = vsub.f32 %v431_v34, %v456_v44 }
 0x2d8   :  { %v462_v46 = vmul.f32 1.442695, %v460_v45 }
 0x2d9   :  { %v573_v47 = vpop.f32.mrf.mxu0 }
 0x2da   :  { %4954 = vpow2.f32 %v462_v46  ;;  %v580_v56 = vsel %vm415_vm8, %v573_v47, -inf }
 0x2dd   :  { %v605_v48 = vpop.permute.xlu2 %604 }
 0x2de   :  { %v610_v49 = vsel %vm481_vm9, %v605_v48, 0 }
 0x2df   :  { %619 = vmatpush.bf16.msra.mxu1 %v610_v49 }
 0x2e0   :  { %v4955_v50 = vpop.eup %4954 }
 0x2e1   :  { %v575_v51 = vpop.f32.mrf.mxu0  ;;  %v466_v52 = vsel %vm415_vm8, %v4955_v50, 0.0 }
 0x2e2   :  { %467 = vadd.xlane.f32.xlu1 %v466_v52 }
 0x2ea   :  { %458 = vmax.xlane.f32.xlu1 %v457_v55 }
 0x2f2   :  { %581 = vmax.xlane.f32.xlu1 %v580_v56 }
 0x30b   :  { %628 = vrot.lane.b32.xlu1 %v5689_v58, %s5450_s11 }
 0x313   :  { %716 = vrot.lane.b32.xlu1 %v5659_v21, %s5451_s10 }
 0x31b   :  { %714 = vrot.lane.b32.xlu1 %v550_v25, %s5451_s10 }
 0x323   :  { %761 = vrot.lane.b32.xlu1 %v5677_v40, %s5451_s10 }
 0x32b   :  { %827 = vrot.lane.b32.xlu1 %v5661_v22, %s5452_s25 }
 0x333   :  { %850 = vrot.lane.b32.xlu1 %v550_v25, %s5452_s25 }
 0x334   :  { %v579_v59 = vpop.xlane.xlu0 %578 }
 0x335   :  { %v583_v60 = vsub.f32 %v544_v41, %v579_v59 }
 0x337   :  { %v585_v61 = vmul.f32 1.442695, %v583_v60 }
 0x339   :  { %4956 = vpow2.f32 %v585_v61 }
 0x33f   :  { %v4957_v62 = vpop.eup %4956 }
 0x340   :  { %v589_v63 = vsel %vm415_vm8, %v4957_v62, 0.0 }
 0x341   :  { %590 = vadd.xlane.f32.xlu2 %v589_v63 }
 0x347   :  { %v694_v5 = vpop.permute.xlu0 %693 }
 0x348   :  { %v699_v7 = vsel %vm415_vm8, %v694_v5, 0 }
 0x355   :  { %v468_v0 = vpop.xlane.xlu1 %467 }
 0x356   :  { %4958 = vrcp.f32 %v468_v0 }
 0x359   :  { %691 = vrot.lane.b32.xlu2 %v5661_v22, %s5451_s10 }
 0x35c   :  { %v4959_v1 = vpop.eup %4958 }
 0x35d   :  { %v459_v2 = vpop.xlane.xlu1 %458  ;;  %v474_v3 = vmul.f32 %v4959_v1, %v4955_v50  ;;  %v411_v50 = vld [vmem:[%s6558_s9] sm:$0xff] }
 0x35e   :  { %v461_v13 = vsub.f32 %v5675_v36, %v459_v2  ;;  %v518_v51 = vpack.c.bf16 %v411_v50, %v411_v50 }
 0x35f   :  { %v476_v6 = vpack.c.bf16 %v474_v3, %v474_v3 }
 0x360   :  { %v464_v16 = vmul.f32 1.442695, %v461_v13  ;;  %v675_v52 = vsel %vm481_vm9, %v518_v51, 0 }
 0x361   :  { %4384 = vmatmul.msk.bf16.vlgmr.msrb.gmra.mxu1 %vm415_vm8, %v476_v6  ;;  %684 = vmatpush.bf16.msrb.mxu0 %v675_v52 }
 0x362   :  { %708 = vmatpush.bf16.xpose.msrb.mxu1 %v699_v7 }
 0x365   :  { %v582_v8 = vpop.xlane.xlu1 %581 }
 0x366   :  { %v584_v9 = vsub.f32 %v573_v47, %v582_v8 }
 0x368   :  { %v587_v11 = vmul.f32 1.442695, %v584_v9 }
 0x36a   :  { %4960 = vpow2.f32 %v587_v11 }
 0x36b   :  { %4962 = vpow2.f32 %v464_v16 }
 0x370   :  { %v4961_v12 = vpop.eup %4960 }
 0x371   :  { %v592_v14 = vsel %vm415_vm8, %v4961_v12, 0.0  ;;  %v4963_v20 = vpop.eup %4962 }
 0x372   :  { %593 = vadd.xlane.f32.xlu0 %v592_v14  ;;  %v469_v23 = vsel %vm415_vm8, %v4963_v20, 0.0 }
 0x37d   :  { %v629_v19 = vpop.permute.xlu1 %628 }
 0x37e   :  { %v634_v22 = vsel %vm481_vm9, %v629_v19, 0 }
 0x37f   :  { %643 = vmatpush.bf16.msrb.mxu2 %v634_v22 }
 0x382   :  { %470 = vadd.xlane.f32.xlu2 %v469_v23 }
 0x385   :  { %v717_v24 = vpop.permute.xlu1 %716 }
 0x386   :  { %v722_v41 = vsel %vm415_vm8, %v717_v24, 0 }
 0x38d   :  { %v715_v25 = vpop.permute.xlu1 %714 }
 0x395   :  { %v762_v26 = vpop.permute.xlu1 %761 }
 0x396   :  { %v767_v27 = vsel %vm481_vm9, %v762_v26, 0 }
 0x397   :  { %776 = vmatpush.bf16.msra.mxu3 %v767_v27 }
 0x39d   :  { %v828_v8 = vpop.permute.xlu1 %827 }
 0x3b4   :  { %v591_v28 = vpop.xlane.xlu2 %590 }
 0x3b5   :  { %4964 = vrcp.f32 %v591_v28 }
 0x3bb   :  { %v4965_v29 = vpop.eup %4964 }
 0x3bc   :  { %v597_v30 = vmul.f32 %v4965_v29, %v4957_v62  ;;  %v692_v32 = vpop.permute.xlu2 %691 }
 0x3be   :  { %v599_v31 = vpack.c.bf16 %v597_v30, %v597_v30 }
 0x3c0   :  { %4388 = vmatmul.msk.bf16.vlgmr.msra.gmra.mxu1 %vm415_vm8, %v599_v31 }
 0x3d0   :  { %4392 = vmatmul.msk.bf16.vlgmr.msrb.gmra.mxu1 %vm415_vm8, %v692_v32 }
 0x3de   :  { %v494_v33 = vpop.f32.mrf.mxu1 }
 0x3e5   :  { %v594_v38 = vpop.xlane.xlu0 %593 }
 0x3e6   :  { %v496_v34 = vpop.f32.mrf.mxu1 }
 0x3e7   :  { %v413_v34 = vld [vmem:[%s6558_s9 + $0x10] sm:$0xff] }
 0x3f5   :  { %v471_v35 = vpop.xlane.xlu2 %470 }
 0x3f6   :  { %4966 = vrcp.f32 %v471_v35  ;;  %v804_v35 = vpack.c.bf16 %v413_v34, %v413_v34 }
 0x3f7   :  { %4968 = vrcp.f32 %v594_v38 }
 0x3fc   :  { %v4967_v36 = vpop.eup %4966 }
 0x3fd   :  { %v475_v37 = vmul.f32 %v4967_v36, %v4963_v20  ;;  %v4969_v42 = vpop.eup %4968  ;;  %v809_v36 = vsel %vm481_vm9, %v804_v35, 0 }
 0x3fe   :  { %v598_v43 = vmul.f32 %v4969_v42, %v4961_v12  ;;  %v851_v12 = vpop.permute.xlu1 %850  ;;  %818 = vmatpush.bf16.msra.mxu1 %v809_v36 }
 0x3ff   :  { %v477_v39 = vpack.c.bf16 %v475_v37, %v475_v37 }
 0x400   :  { %v600_v44 = vpack.c.bf16 %v598_v43, %v598_v43 }
 0x401   :  { %4385 = vmatmul.msk.bf16.vlgmr.msra.gmra.mxu2 %vm415_vm8, %v477_v39 }
 0x402   :  { %731 = vmatpush.bf16.xpose.msra.mxu2 %v722_v41 }
 0x411   :  { %4389 = vmatmul.msk.bf16.vlgmr.msrb.gmra.mxu2 %vm415_vm8, %v600_v44 }
 0x421   :  { %4393 = vmatmul.msk.bf16.vlgmr.msra.gmra.mxu2 %vm415_vm8, %v715_v25 }
 0x43d   :  { %v621_v45 = vpop.f32.mrf.mxu1 }
 0x445   :  { %v623_v46 = vpop.f32.mrf.mxu1 }
 0x44d   :  { %v710_v47 = vpop.f32.mrf.mxu1 }
 0x44e   :  { %v737_v48 = vsel %vm415_vm8, %v710_v47, -inf }
 0x44f   :  { %738 = vmax.xlane.f32.xlu2 %v737_v48 }
 0x455   :  { %v712_v49 = vpop.f32.mrf.mxu1 }
 0x467   :  { %829 = vrot.lane.b32.xlu2 %v5652_v4, %s5452_s25 }
 0x46f   :  { %782 = vrot.lane.b32.xlu2 %v5689_v58, %s5451_s10 }
 0x484   :  { %v513_v55 = vpop.f32.mrf.mxu2 }
 0x485   :  { %v517_v56 = vpack.c.bf16 %v513_v55, %v494_v33 }
 0x487   :  { %4391 = vmatmul.msk.bf16.vlgmr.msrb.gmra.mxu0 %vm415_vm8, %v517_v56 }
 0x48c   :  { %v515_v57 = vpop.f32.mrf.mxu2 }
 0x494   :  { %v645_v59 = vpop.f32.mrf.mxu2 }
 0x495   :  { %v649_v60 = vpack.c.bf16 %v645_v59, %v621_v45 }
 0x497   :  { %4390 = vmatmul.msk.bf16.vlgmr.msrb.gmra.mxu3 %vm415_vm8, %v649_v60 }
 0x49c   :  { %v647_v61 = vpop.f32.mrf.mxu2 }
 0x4a4   :  { %v733_v62 = vpop.f32.mrf.mxu2 }
 0x4a5   :  { %v740_v63 = vsel %vm415_vm8, %v733_v62, -inf }
 0x4a6   :  { %741 = vmax.xlane.f32.xlu1 %v740_v63 }
 0x4ac   :  { %v735_v0 = vpop.f32.mrf.mxu2 }
 0x4c2   :  { %v739_v1 = vpop.xlane.xlu2 %738 }
 0x4c3   :  { %v743_v4 = vsub.f32 %v710_v47, %v739_v1 }
 0x4c5   :  { %v745_v2 = vmul.f32 1.442695, %v743_v4 }
 0x4c7   :  { %4970 = vpow2.f32 %v745_v2 }
 0x4ca   :  { %v830_v3 = vpop.permute.xlu2 %829 }
 0x4cb   :  { %v835_v5 = vsel %vm415_vm8, %v830_v3, 0 }
 0x4cc   :  { %844 = vmatpush.bf16.xpose.msrb.mxu2 %v835_v5 }
 0x4cd   :  { %v4971_v6 = vpop.eup %4970 }
 0x4ce   :  { %v749_v7 = vsel %vm415_vm8, %v4971_v6, 0.0 }
 0x4cf   :  { %750 = vadd.xlane.f32.xlu0 %v749_v7 }
 0x4d2   :  { %v783_v9 = vpop.permute.xlu2 %782 }
 0x4d3   :  { %v788_v11 = vsel %vm481_vm9, %v783_v9, 0  ;;  %4397 = vmatmul.msk.bf16.vlgmr.msrb.gmra.mxu2 %vm415_vm8, %v828_v8 }
 0x4d4   :  { %797 = vmatpush.bf16.msra.mxu0 %v788_v11 }
 0x4e3   :  { %852 = vrot.lane.b32.xlu0 %v5659_v21, %s5452_s25 }
 0x504   :  { %v686_v14 = vpop.f32.mrf.mxu0 }
 0x50c   :  { %v688_v50 = vpop.f32.mrf.mxu0 }
 0x519   :  { %v742_v13 = vpop.xlane.xlu1 %741 }
 0x51a   :  { %v744_v15 = vsub.f32 %v733_v62, %v742_v13  ;;  %v666_v16 = vpop.f32.mrf.mxu3 }
 0x51b   :  { %v5739_v17 = vadd.f32 %v686_v14, %v666_v16 }
 0x51c   :  { %v747_v18 = vmul.f32 1.442695, %v744_v15 }
 0x51e   :  { %4972 = vpow2.f32 %v747_v18 }
 0x522   :  { %v668_v37 = vpop.f32.mrf.mxu3 }
 0x524   :  { %v4973_v19 = vpop.eup %4972 }
 0x525   :  { %v752_v20 = vsel %vm415_vm8, %v4973_v19, 0.0 }
 0x526   :  { %753 = vadd.xlane.f32.xlu0 %v752_v20 }
 0x542   :  { %v751_v22 = vpop.xlane.xlu0 %750 }
 0x543   :  { %4974 = vrcp.f32 %v751_v22 }
 0x549   :  { %v4975_v23 = vpop.eup %4974 }
 0x54a   :  { %v757_v24 = vmul.f32 %v4975_v23, %v4971_v6 }
 0x54c   :  { %v759_v25 = vpack.c.bf16 %v757_v24, %v757_v24  ;;  %v689_v24 = vadd.f32 %v688_v50, %v668_v37 }
 0x54e   :  { %4394 = vmatmul.msk.bf16.vlgmr.msra.gmra.mxu3 %vm415_vm8, %v759_v25 }
 0x555   :  { %v853_v21 = vpop.permute.xlu0 %852 }
 0x556   :  { %v858_v26 = vsel %vm415_vm8, %v853_v21, 0  ;;  %v846_v27 = vpop.f32.mrf.mxu2 }
 0x557   :  { %867 = vmatpush.bf16.xpose.msrb.mxu3 %v858_v26  ;;  %v873_v28 = vsel %vm415_vm8, %v846_v27, -inf }
 0x558   :  { %874 = vmax.xlane.f32.xlu2 %v873_v28 }
 0x55e   :  { %v848_v29 = vpop.f32.mrf.mxu2  ;;  %4398 = vmatmul.msk.bf16.vlgmr.msrb.gmra.mxu3 %vm415_vm8, %v851_v12  ;;  %v414_v12 = vld [vmem:[%s6558_s9 + $0x18] sm:$0xff] }
 0x55f   :  { %v940_v13 = vpack.c.bf16 %v414_v12, %v414_v12 }
 0x561   :  { %v945_v14 = vsel %vm481_vm9, %v940_v13, 0  ;;  %v4835_v13 = vld [vmem:[%s6564_s15 + $0x38] sm:$0xff] }
 0x562   :  { %954 = vmatpush.bf16.msra.mxu2 %v945_v14 }
 0x570   :  { %918 = vrot.lane.b32.xlu2 %v5689_v58, %s5452_s25 }
 0x599   :  { %v754_v30 = vpop.xlane.xlu0 %753 }
 0x59a   :  { %4976 = vrcp.f32 %v754_v30 }
 0x5a0   :  { %v4977_v31 = vpop.eup %4976 }
 0x5a1   :  { %v758_v32 = vmul.f32 %v4977_v31, %v4973_v19  ;;  %v4911_v19 = vld [vmem:[#allocation11] ss:$0 sm:$0xff] }
 0x5a3   :  { %v760_v33 = vpack.c.bf16 %v758_v32, %v758_v32 }
 0x5a5   :  { %4395 = vmatmul.msk.bf16.vlgmr.msra.gmra.mxu0 %vm415_vm8, %v760_v33 }
 0x5cb   :  { %v875_v38 = vpop.xlane.xlu2 %874 }
 0x5cc   :  { %v879_v39 = vsub.f32 %v846_v27, %v875_v38 }
 0x5ce   :  { %v881_v41 = vmul.f32 1.442695, %v879_v39 }
 0x5d0   :  { %4978 = vpow2.f32 %v881_v41 }
 0x5d1   :  { %v778_v58 = vpop.f32.mrf.mxu3 }
 0x5d3   :  { %v919_v42 = vpop.permute.xlu2 %918 }
 0x5d4   :  { %v924_v43 = vsel %vm481_vm9, %v919_v42, 0 }
 0x5d5   :  { %933 = vmatpush.bf16.msrb.mxu1 %v924_v43 }
 0x5d6   :  { %v4979_v44 = vpop.eup %4978 }
 0x5d7   :  { %v885_v45 = vsel %vm415_vm8, %v4979_v44, 0.0 }
 0x5d8   :  { %886 = vadd.xlane.f32.xlu0 %v885_v45 }
 0x5d9   :  { %v780_v46 = vpop.f32.mrf.mxu3 }
 0x5e1   :  { %v869_v47 = vpop.f32.mrf.mxu3 }
 0x5e2   :  { %v876_v48 = vsel %vm415_vm8, %v869_v47, -inf }
 0x5e3   :  { %877 = vmax.xlane.f32.xlu1 %v876_v48 }
 0x5e9   :  { %v871_v49 = vpop.f32.mrf.mxu3 }
 0x5ec   :  { %897 = vrot.lane.b32.xlu0 %v5677_v40, %s5452_s25 }
 0x622   :  { %v799_v51 = vpop.f32.mrf.mxu0 }
 0x623   :  { %v803_v52 = vpack.c.bf16 %v799_v51, %v778_v58 }
 0x625   :  { %4396 = vmatmul.msk.bf16.vlgmr.msra.gmra.mxu1 %vm415_vm8, %v803_v52 }
 0x62a   :  { %v801_v55 = vpop.f32.mrf.mxu0 }
 0x64b   :  { %v887_v56 = vpop.xlane.xlu0 %886 }
 0x64c   :  { %4980 = vrcp.f32 %v887_v56 }
 0x652   :  { %v4981_v61 = vpop.eup %4980 }
 0x653   :  { %v893_v62 = vmul.f32 %v4981_v61, %v4979_v44  ;;  %v4826_v44 = vld [vmem:[#allocation14] sm:$0xff] }
 0x655   :  { %v895_v40 = vpack.c.bf16 %v893_v62, %v893_v62 }
 0x656   :  { %v878_v57 = vpop.xlane.xlu1 %877 }
 0x657   :  { %v880_v59 = vsub.f32 %v869_v47, %v878_v57 }
 0x659   :  { %v883_v60 = vmul.f32 1.442695, %v880_v59 }
 0x65b   :  { %4982 = vpow2.f32 %v883_v60 }
 0x65e   :  { %v898_v63 = vpop.permute.xlu0 %897 }
 0x65f   :  { %v903_v0 = vsel %vm481_vm9, %v898_v63, 0  ;;  %v4912_v63 = vld [vmem:[#allocation13] ss:$0 sm:$0xff] }
 0x660   :  { %912 = vmatpush.bf16.msrb.mxu0 %v903_v0 }
 0x661   :  { %v4983_v1 = vpop.eup %4982 }
 0x662   :  { %v888_v4 = vsel %vm415_vm8, %v4983_v1, 0.0 }
 0x663   :  { %4399 = vmatmul.msk.bf16.vlgmr.msrb.gmra.mxu0 %vm415_vm8, %v895_v40  ;;  %889 = vadd.xlane.f32.xlu1 %v888_v4  ;;  %v4913_v4 = vld [vmem:[%s6561_s12] ss:$0 sm:$0xff] }
 0x664   :  { %1222 = vmatpush.bf16.msra.mxu0 %v4835_v13 }
 0x6a2   :  { %v820_v2 = vpop.f32.mrf.mxu1 }
 0x6a3   :  { %v825_v3 = vadd.f32 %v820_v2, %v5739_v17 }
 0x6aa   :  { %v822_v15 = vpop.f32.mrf.mxu1 }
 0x6ab   :  { %v826_v21 = vadd.f32 %v822_v15, %v689_v24 }
 0x6d6   :  { %v890_v5 = vpop.xlane.xlu1 %889 }
 0x6d7   :  { %4984 = vrcp.f32 %v890_v5 }
 0x6dd   :  { %v4985_v6 = vpop.eup %4984 }
 0x6de   :  { %v894_v7 = vmul.f32 %v4985_v6, %v4983_v1 }
 0x6e0   :  { %v896_v8 = vpack.c.bf16 %v894_v7, %v894_v7  ;;  %v914_v9 = vpop.f32.mrf.mxu0 }
 0x6e2   :  { %4400 = vmatmul.msk.bf16.vlgmr.msrb.gmra.mxu1 %vm415_vm8, %v896_v8 }
 0x6e8   :  { %v916_v11 = vpop.f32.mrf.mxu0 }
 0x75f   :  { %v935_v16 = vpop.f32.mrf.mxu1 }
 0x760   :  { %v939_v17 = vpack.c.bf16 %v935_v16, %v914_v9  ;;  %v4914_v9 = vld [vmem:[#allocation16] ss:$0 sm:$0xff]  ;;  %v4834_v16 = vld [vmem:[%s6564_s15 + $0x30] sm:$0xff] }
 0x761   :  { %1223 = vmatpush.bf16.msra.mxu0 %v4834_v16 }
 0x762   :  { %4401 = vmatmul.msk.bf16.vlgmr.msra.gmra.mxu2 %vm415_vm8, %v939_v17 }
 0x767   :  { %v937_v18 = vpop.f32.mrf.mxu1 }
 0x7e5   :  { %v956_v20 = vpop.f32.mrf.mxu2 }
 0x7e6   :  { %v961_v22 = vadd.f32 %v956_v20, %v825_v3 }
 0x7e8   :  { %v967_v23 = vadd.f32 %v4911_v19, %v961_v22 }
 0x7ea   :  { %v969_v25 = vadd.f32 %v967_v23, %v5639_v53  ;;  %v4833_v23 = vld [vmem:[%s6564_s15 + $0x28] sm:$0xff] }
 0x7eb   :  { %1224 = vmatpush.bf16.msra.mxu0 %v4833_v23 }
 0x7ec   :  { %v973_v26 = vsel %vm235_vm0, %v969_v25, 0.0 }
 0x7ed   :  { %974 = vadd.xlane.f32.xlu1 %v973_v26  ;;  %v958_v27 = vpop.f32.mrf.mxu2 }
 0x7ee   :  { %v962_v28 = vadd.f32 %v958_v27, %v826_v21  ;;  %v4832_v27 = vld [vmem:[%s6564_s15 + $0x20] sm:$0xff] }
 0x7ef   :  { %1225 = vmatpush.bf16.msra.mxu0 %v4832_v27 }
 0x7f0   :  { %v968_v29 = vadd.f32 %v4911_v19, %v962_v28 }
 0x7f2   :  { %v970_v30 = vadd.f32 %v968_v29, %v5641_v54  ;;  %v4827_v54 = vld [vmem:[#allocation14 + $0x8] sm:$0xff] }
 0x7f3   :  { %1057 = vmatpush.bf16.msra.mxu3 %v4827_v54 }
 0x7f4   :  { %v976_v31 = vsel %vm235_vm0, %v970_v30, 0.0 }
 0x7f5   :  { %977 = vadd.xlane.f32.xlu1 %v976_v31 }
 0x7f7   :  { %1058 = vmatpush.bf16.msra.mxu3 %v4826_v44 }
 0x860   :  { %v975_v32 = vpop.xlane.xlu1 %974 }
 0x861   :  { %v979_v33 = vmul.f32 %v975_v32, %v5613_v10 }
 0x863   :  { %v981_v34 = vsub.f32 %v969_v25, %v979_v33  ;;  %v4831_v33 = vld [vmem:[%s6564_s15 + $0x18] sm:$0xff] }
 0x864   :  { %1226 = vmatpush.bf16.msra.mxu0 %v4831_v33 }
 0x865   :  { %v983_v35 = vmul.f32 %v981_v34, %v981_v34 }
 0x867   :  { %v985_v36 = vsel %vm235_vm0, %v983_v35, 0.0 }
 0x868   :  { %986 = vadd.xlane.f32.xlu0 %v985_v36  ;;  %v978_v53 = vpop.xlane.xlu1 %977 }
 0x869   :  { %v980_v37 = vmul.f32 %v978_v53, %v5613_v10 }
 0x86b   :  { %v982_v38 = vsub.f32 %v970_v30, %v980_v37 }
 0x86d   :  { %v984_v39 = vmul.f32 %v982_v38, %v982_v38 }
 0x86f   :  { %v988_v41 = vsel %vm235_vm0, %v984_v39, 0.0 }
 0x870   :  { %989 = vadd.xlane.f32.xlu1 %v988_v41  ;;  %v4830_v41 = vld [vmem:[%s6564_s15 + $0x10] sm:$0xff] }
 0x871   :  { %1227 = vmatpush.bf16.msra.mxu0 %v4830_v41 }
 0x8db   :  { %v987_v58 = vpop.xlane.xlu0 %986 }
 0x8dc   :  { %v991_v42 = vmul.f32 %v987_v58, %v5613_v10 }
 0x8de   :  { %v993_v43 = vadd.f32 1e-12, %v991_v42 }
 0x8e0   :  { %4986 = vrsqrt.f32 %v993_v43  ;;  %vm1001_vm11 = vweird.f32 %v993_v43 }
 0x8e3   :  { %v990_v45 = vpop.xlane.xlu1 %989 }
 0x8e4   :  { %v992_v46 = vmul.f32 %v990_v45, %v5613_v10 }
 0x8e6   :  { %v4987_v47 = vpop.eup %4986  ;;  %v994_v48 = vadd.f32 1e-12, %v992_v46 }
 0x8e7   :  { %v996_v49 = vmul.f32 %v4987_v47, %v993_v43  ;;  %vm1002_vm10 = vweird.f32 %v4987_v47 }
 0x8e8   :  { %4988 = vrsqrt.f32 %v994_v48  ;;  %vm1003_vm12 = vmor %vm1001_vm11, %vm1002_vm10  ;;  %vm1011_vm14 = vweird.f32 %v994_v48 }
 0x8e9   :  { %v997_v50 = vmul.f32 %v4987_v47, %v996_v49 }
 0x8eb   :  { %v998_v51 = vmul.f32 0.5, %v997_v50 }
 0x8ed   :  { %v999_v52 = vsub.f32 1.5, %v998_v51 }
 0x8ee   :  { %v4989_v55 = vpop.eup %4988 }
 0x8ef   :  { %v1000_v56 = vmul.f32 %v4987_v47, %v999_v52  ;;  %v1006_v57 = vmul.f32 %v4989_v55, %v994_v48  ;;  %vm1012_vm13 = vweird.f32 %v4989_v55 }
 0x8f0   :  { %vm1013_vm15 = vmor %vm1011_vm14, %vm1012_vm13 }
 0x8f1   :  { %v1007_v59 = vmul.f32 %v4989_v55, %v1006_v57  ;;  %v1004_v60 = vsel %vm1003_vm12, %v4987_v47, %v1000_v56  ;;  %v4829_v47 = vld [vmem:[%s6564_s15 + $0x8] sm:$0xff] }
 0x8f2   :  { %v1015_v0 = vmul.f32 %v1004_v60, %v981_v34  ;;  %1228 = vmatpush.bf16.msra.mxu0 %v4829_v47 }
 0x8f3   :  { %v1008_v61 = vmul.f32 0.5, %v1007_v59 }
 0x8f4   :  { %v1020_v2 = vmul.f32 %v4912_v63, %v1015_v0 }
 0x8f5   :  { %v1009_v62 = vsub.f32 1.5, %v1008_v61 }
 0x8f6   :  { %v5782_v6 = vadd.f32 %v4913_v4, %v1020_v2 }
 0x8f7   :  { %v1010_v1 = vmul.f32 %v4989_v55, %v1009_v62 }
 0x8f9   :  { %v1014_v40 = vsel %vm1013_vm15, %v4989_v55, %v1010_v1  ;;  %v4828_v55 = vld [vmem:[%s6564_s15] sm:$0xff] }
 0x8fa   :  { %v1016_v3 = vmul.f32 %v1014_v40, %v982_v38  ;;  %1229 = vmatpush.bf16.msra.mxu0 %v4828_v55 }
 0x8fc   :  { %v1021_v5 = vmul.f32 %v4912_v63, %v1016_v3 }
 0x8fe   :  { %v5784_v7 = vadd.f32 %v4913_v4, %v1021_v5 }
 0x900   :  { %v1032_v8 = vpack.c.bf16 %v5784_v7, %v5782_v6 }
 0x902   :  { %4410 = vmatmul.msk.bf16.vlgmr.msra.gmra.mxu3 %vm235_vm0, %v1032_v8 }
 0x985   :  { %v1060_v11 = vpop.f32.mrf.mxu3 }
 0x986   :  { %v5789_v12 = vadd.f32 %v4914_v9, %v1060_v11 }
 0x988   :  { %v5795_v14 = vmul.f32 0.70710677, %v5789_v12 }
 0x98a   :  { %v1069_v15 = vmul.f32 %v5795_v14, %v5795_v14 }
 0x98c   :  { %v1070_v17 = vmin.f32 %v1069_v15, 16.0 }
 0x98d   :  { %v1062_v18 = vpop.f32.mrf.mxu3 }
 0x98e   :  { %v1071_v19 = vmul.f32 2.1237322e-06, %v1070_v17  ;;  %v1082_v20 = vmul.f32 3.8918573e-05, %v1070_v17  ;;  %v5802_v22 = vadd.f32 %v4914_v9, %v1062_v18 }
 0x990   :  { %v1072_v24 = vadd.f32 0.00028619796, %v1071_v19  ;;  %v1083_v25 = vadd.f32 0.001143296, %v1082_v20  ;;  %v5808_v21 = vmul.f32 0.70710677, %v5802_v22 }
 0x992   :  { %v1084_v26 = vmul.f32 %v1083_v25, %v1070_v17  ;;  %v1109_v28 = vmul.f32 %v5808_v21, %v5808_v21  ;;  %v1073_v29 = vmul.f32 %v1072_v24, %v1070_v17 }
 0x994   :  { %v1085_v30 = vadd.f32 0.014752088, %v1084_v26  ;;  %v1110_v31 = vmin.f32 %v1109_v28, 16.0  ;;  %v1074_v36 = vadd.f32 0.0036580483, %v1073_v29 }
 0x996   :  { %v1086_v32 = vmul.f32 %v1085_v30, %v1070_v17  ;;  %v1111_v34 = vmul.f32 2.1237322e-06, %v1110_v31  ;;  %v1122_v35 = vmul.f32 3.8918573e-05, %v1110_v31  ;;  %v1075_v42 = vmul.f32 %v1074_v36, %v1070_v17 }
 0x998   :  { %v1087_v53 = vadd.f32 0.112945676, %v1086_v32  ;;  %v1112_v37 = vadd.f32 0.00028619796, %v1111_v34  ;;  %v1123_v38 = vadd.f32 0.001143296, %v1122_v35 }
 0x999   :  { %v1076_v49 = vadd.f32 0.05243302, %v1075_v42  ;;  %v4915_v42 = vld [vmem:[%s6565_s16] ss:$0 sm:$0xff] }
 0x99a   :  { %v1088_v39 = vmul.f32 %v1087_v53, %v1070_v17  ;;  %v1113_v54 = vmul.f32 %v1112_v37, %v1110_v31  ;;  %v1124_v58 = vmul.f32 %v1123_v38, %v1110_v31  ;;  %v1065_v37 = vmul.f32 0.5, %v5789_v12 }
 0x99b   :  { %v1077_v57 = vmul.f32 %v1076_v49, %v1070_v17  ;;  %v1066_v38 = vmul.f32 0.5, %v5802_v22 }
 0x99c   :  { %v1089_v43 = vadd.f32 0.4994258, %v1088_v39  ;;  %v1114_v44 = vadd.f32 0.0036580483, %v1113_v54  ;;  %v1125_v45 = vadd.f32 0.014752088, %v1124_v58 }
 0x99d   :  { %v1078_v63 = vadd.f32 0.18741608, %v1077_v57 }
 0x99e   :  { %v1090_v46 = vmul.f32 %v1089_v43, %v1070_v17  ;;  %v1126_v48 = vmul.f32 %v1125_v45, %v1110_v31  ;;  %v1115_v51 = vmul.f32 %v1114_v44, %v1110_v31 }
 0x99f   :  { %v1079_v2 = vmul.f32 %v1078_v63, %v1070_v17 }
 0x9a0   :  { %v1091_v50 = vadd.f32 1.0, %v1090_v46  ;;  %v1127_v52 = vadd.f32 0.112945676, %v1126_v48  ;;  %v1116_v59 = vadd.f32 0.05243302, %v1115_v51 }
 0x9a1   :  { %v1080_v13 = vadd.f32 1.1283791, %v1079_v2 }
 0x9a2   :  { %4990 = vrcp.f32 %v1091_v50  ;;  %v1128_v56 = vmul.f32 %v1127_v52, %v1110_v31  ;;  %v1117_v1 = vmul.f32 %v1116_v59, %v1110_v31  ;;  %v1103_v5 = vand.u32 2147483648, %v1091_v50 }
 0x9a3   :  { %v1101_v9 = vand.u32 2147483647, %v1091_v50  ;;  %vm1097_vm2 = vweird.f32 %v1091_v50  ;;  %v1081_v24 = vmul.f32 %v1080_v13, %v5795_v14 }
 0x9a4   :  { %v1129_v60 = vadd.f32 0.4994258, %v1128_v56  ;;  %v1118_v8 = vadd.f32 0.18741608, %v1117_v1  ;;  %v1104_v18 = vor.u32 1.1754944e-38, %v1103_v5  ;;  %v4836_v1 = vld [vmem:[%s6577_s27 + $0x10] sm:$0xff] }
 0x9a5   :  { %vm1102_vm4 = vcmp.eq.f32.partialorder %v1101_v9, 8.507059e+37 }
 0x9a6   :  { %v1130_v61 = vmul.f32 %v1129_v60, %v1110_v31  ;;  %v1119_v19 = vmul.f32 %v1118_v8, %v1110_v31  ;;  %v4839_v60 = vld [vmem:[%s6554_s5 + $0x18] sm:$0xff] }
 0x9a7   :  { %1362 = vmatpush.bf16.msrb.mxu2 %v4839_v60 }
 0x9a8   :  { %v4991_v62 = vpop.eup %4990  ;;  %v1131_v40 = vadd.f32 1.0, %v1130_v61  ;;  %v1120_v17 = vadd.f32 1.1283791, %v1119_v19  ;;  %v4841_v61 = vld [vmem:[%s6556_s7 + $0x18] sm:$0xff] }
 0x9a9   :  { %v1093_v0 = vmul.f32 %v4991_v62, %v1091_v50  ;;  %vm1098_vm1 = vweird.f32 %v4991_v62  ;;  %1398 = vmatpush.bf16.msrb.mxu3 %v4841_v61 }
 0x9aa   :  { %4992 = vrcp.f32 %v1131_v40  ;;  %vm1099_vm3 = vmor %vm1097_vm2, %vm1098_vm1  ;;  %v1143_v26 = vand.u32 2147483648, %v1131_v40  ;;  %v1141_v29 = vand.u32 2147483647, %v1131_v40  ;;  %vm1137_vm6 = vweird.f32 %v1131_v40 }
 0x9ab   :  { %v1094_v4 = vsub.f32 1.0, %v1093_v0  ;;  %v1121_v34 = vmul.f32 %v1120_v17, %v5808_v21  ;;  %v4916_v17 = vld [vmem:[#allocation17] ss:$0 sm:$0xff] }
 0x9ac   :  { %v1144_v32 = vor.u32 1.1754944e-38, %v1143_v26  ;;  %vm1142_vm10 = vcmp.eq.f32.partialorder %v1141_v29, 8.507059e+37  ;;  %v4917_v29 = vld [vmem:[#allocation19] ss:$0 sm:$0xff] }
 0x9ad   :  { %v1095_v3 = vmul.f32 %v4991_v62, %v1094_v4  ;;  %v4840_v4 = vld [vmem:[%s6556_s7 + $0x10] sm:$0xff] }
 0x9ae   :  { %1399 = vmatpush.bf16.msrb.mxu3 %v4840_v4 }
 0x9af   :  { %v1096_v11 = vadd.f32 %v4991_v62, %v1095_v3 }
 0x9b0   :  { %v4993_v15 = vpop.eup %4992 }
 0x9b1   :  { %v1100_v16 = vsel %vm1099_vm3, %v4991_v62, %v1096_v11  ;;  %v1133_v20 = vmul.f32 %v4993_v15, %v1131_v40  ;;  %vm1138_vm5 = vweird.f32 %v4993_v15  ;;  %v4838_v40 = vld [vmem:[%s6554_s5 + $0x10] sm:$0xff] }
 0x9b2   :  { %v1105_v23 = vsel %vm1102_vm4, %v1104_v18, %v1100_v16  ;;  %vm1139_vm7 = vmor %vm1137_vm6, %vm1138_vm5  ;;  %1363 = vmatpush.bf16.msrb.mxu2 %v4838_v40 }
 0x9b3   :  { %v1134_v25 = vsub.f32 1.0, %v1133_v20  ;;  %v1106_v27 = vmul.f32 %v1105_v23, %v1081_v24 }
 0x9b5   :  { %v1135_v28 = vmul.f32 %v4993_v15, %v1134_v25  ;;  %v4411_v33 = vclamps-f32 %v1106_v27, 1.0 }
 0x9b7   :  { %v1136_v30 = vadd.f32 %v4993_v15, %v1135_v28  ;;  %v1149_v53 = vadd.f32 1.0, %v4411_v33 }
 0x9b9   :  { %v1140_v31 = vsel %vm1139_vm7, %v4993_v15, %v1136_v30  ;;  %v1151_v41 = vmul.f32 %v1149_v53, %v1065_v37 }
 0x9ba   :  { %v1145_v35 = vsel %vm1142_vm10, %v1144_v32, %v1140_v31 }
 0x9bb   :  { %v1146_v36 = vmul.f32 %v1145_v35, %v1121_v34 }
 0x9bd   :  { %v4412_v14 = vclamps-f32 %v1146_v36, 1.0  ;;  %v4918_v36 = vld [vmem:[#allocation8 + $0x1] ss:$0 sm:$0xff] }
 0x9bf   :  { %v1150_v39 = vadd.f32 1.0, %v4412_v14 }
 0x9c1   :  { %v1152_v54 = vmul.f32 %v1150_v39, %v1066_v38  ;;  %v4919_v38 = vld [vmem:[#allocation10 + $0x1] ss:$0 sm:$0xff]  ;;  %v4920_v39 = vld [vmem:[%s6557_s8 + $0x1] ss:$0 sm:$0xff] }
 0x9c3   :  { %v1170_v58 = vpack.c.bf16 %v1152_v54, %v1151_v41 }
 0x9c5   :  { %1230 = vmatmul.bf16.vlgmr.msra.gmra.mxu0 %v1170_v58 }
 0xa42   :  { %v1231_v21 = vpop.f32.mrf.mxu0 }
 0xa43   :  { %v1232_v43 = vadd.f32 %v4915_v42, %v1231_v21 }
 0xa45   :  { %v1236_v44 = vadd.f32 %v1232_v43, %v5782_v6 }
 0xa47   :  { %v1240_v45 = vsel %vm235_vm0, %v1236_v44, 0.0 }
 0xa48   :  { %1241 = vadd.xlane.f32.xlu2 %v1240_v45 }
 0xa4a   :  { %v1233_v46 = vpop.f32.mrf.mxu0 }
 0xa4b   :  { %v1234_v12 = vadd.f32 %v4915_v42, %v1233_v46 }
 0xa4d   :  { %v1237_v22 = vadd.f32 %v1234_v12, %v5784_v7  ;;  %v4837_v7 = vld [vmem:[%s6577_s27 + $0x18] sm:$0xff] }
 0xa4e   :  { %1326 = vmatpush.bf16.msra.mxu1 %v4837_v7 }
 0xa4f   :  { %v1243_v47 = vsel %vm235_vm0, %v1237_v22, 0.0 }
 0xa50   :  { %1244 = vadd.xlane.f32.xlu1 %v1243_v47 }
 0xa52   :  { %1327 = vmatpush.bf16.msra.mxu1 %v4836_v1 }
 0xabb   :  { %v1242_v48 = vpop.xlane.xlu2 %1241 }
 0xabc   :  { %v1246_v49 = vmul.f32 %v1242_v48, %v5613_v10 }
 0xabe   :  { %v1248_v50 = vsub.f32 %v1236_v44, %v1246_v49 }
 0xac0   :  { %v1250_v51 = vmul.f32 %v1248_v50, %v1248_v50 }
 0xac2   :  { %v1252_v52 = vsel %vm235_vm0, %v1250_v51, 0.0 }
 0xac3   :  { %v1245_v55 = vpop.xlane.xlu1 %1244  ;;  %1253 = vadd.xlane.f32.xlu1 %v1252_v52 }
 0xac4   :  { %v1247_v6 = vmul.f32 %v1245_v55, %v5613_v10 }
 0xac6   :  { %v1249_v56 = vsub.f32 %v1237_v22, %v1247_v6 }
 0xac8   :  { %v1251_v57 = vmul.f32 %v1249_v56, %v1249_v56 }
 0xaca   :  { %v1255_v59 = vsel %vm235_vm0, %v1251_v57, 0.0 }
 0xacb   :  { %1256 = vadd.xlane.f32.xlu1 %v1255_v59 }
 0xb36   :  { %v1254_v62 = vpop.xlane.xlu1 %1253 }
 0xb37   :  { %v1258_v63 = vmul.f32 %v1254_v62, %v5613_v10 }
 0xb39   :  { %v1260_v0 = vadd.f32 1e-12, %v1258_v63 }
 0xb3b   :  { %4994 = vrsqrt.f32 %v1260_v0  ;;  %vm1268_vm12 = vweird.f32 %v1260_v0 }
 0xb3e   :  { %v1257_v2 = vpop.xlane.xlu1 %1256 }
 0xb3f   :  { %v1259_v3 = vmul.f32 %v1257_v2, %v5613_v10 }
 0xb41   :  { %v4995_v5 = vpop.eup %4994  ;;  %v1261_v8 = vadd.f32 1e-12, %v1259_v3 }
 0xb42   :  { %v1263_v9 = vmul.f32 %v4995_v5, %v1260_v0  ;;  %vm1269_vm11 = vweird.f32 %v4995_v5 }
 0xb43   :  { %4996 = vrsqrt.f32 %v1261_v8  ;;  %vm1270_vm13 = vmor %vm1268_vm12, %vm1269_vm11  ;;  %vm1278_vm15 = vweird.f32 %v1261_v8 }
 0xb44   :  { %v1264_v11 = vmul.f32 %v4995_v5, %v1263_v9 }
 0xb46   :  { %v1265_v13 = vmul.f32 0.5, %v1264_v11 }
 0xb48   :  { %v1266_v15 = vsub.f32 1.5, %v1265_v13 }
 0xb49   :  { %v4997_v16 = vpop.eup %4996 }
 0xb4a   :  { %v1267_v18 = vmul.f32 %v4995_v5, %v1266_v15  ;;  %v1273_v19 = vmul.f32 %v4997_v16, %v1261_v8  ;;  %vm1279_vm14 = vweird.f32 %v4997_v16 }
 0xb4b   :  { %vm1280_vm1 = vmor %vm1278_vm15, %vm1279_vm14 }
 0xb4c   :  { %v1274_v20 = vmul.f32 %v4997_v16, %v1273_v19  ;;  %v1271_v23 = vsel %vm1270_vm13, %v4995_v5, %v1267_v18 }
 0xb4d   :  { %v1282_v26 = vmul.f32 %v1271_v23, %v1248_v50 }
 0xb4e   :  { %v1275_v24 = vmul.f32 0.5, %v1274_v20 }
 0xb4f   :  { %v1287_v30 = vmul.f32 %v4916_v17, %v1282_v26 }
 0xb50   :  { %v1276_v25 = vsub.f32 1.5, %v1275_v24 }
 0xb51   :  { %v5862_v34 = vadd.f32 %v4917_v29, %v1287_v30 }
 0xb52   :  { %v1277_v27 = vmul.f32 %v4997_v16, %v1276_v25 }
 0xb54   :  { %v1281_v28 = vsel %vm1280_vm1, %v4997_v16, %v1277_v27 }
 0xb55   :  { %v1283_v32 = vmul.f32 %v1281_v28, %v1249_v56 }
 0xb57   :  { %v1288_v33 = vmul.f32 %v4916_v17, %v1283_v32 }
 0xb59   :  { %v5864_v31 = vadd.f32 %v4917_v29, %v1288_v33 }
 0xb5b   :  { %v1301_v35 = vpack.c.bf16 %v5864_v31, %v5862_v34 }
 0xb5d   :  { %4457 = vmatmul.msk.bf16.vlgmr.msra.gmra.mxu1 %vm235_vm0, %v1301_v35  ;;  %4470 = vmatmul.msk.bf16.vlgmr.msrb.gmra.mxu2 %vm235_vm0, %v1301_v35 }
 0xb5e   :  { %4484 = vmatmul.msk.bf16.vlgmr.msrb.gmra.mxu3 %vm235_vm0, %v1301_v35 }
 0xbda   :  { %v1329_v53 = vpop.f32.mrf.mxu1 }
 0xbdb   :  { %v1330_v14 = vadd.f32 %v4918_v36, %v1329_v53 }
 0xbdd   :  { %v1406_v37 = vmul.f32 0.35355338, %v1330_v14 }
 0xbdf   :  { %v1408_v41 = vpack.c.bf16 %v1406_v37, %v1406_v37 }
 0xbe0   :  { %v1365_v54 = vpop.f32.mrf.mxu2 }
 0xbe1   :  { %v1522_v58 = vunpack.c.l.b16 %v1408_v41  ;;  %v1366_v42 = vadd.f32 %v4919_v38, %v1365_v54  ;;  %v1401_v21 = vpop.f32.mrf.mxu3 }
 0xbe2   :  { %v1402_v43 = vadd.f32 %v4920_v39, %v1401_v21  ;;  %v1331_v44 = vpop.f32.mrf.mxu1 }
 0xbe3   :  { %v1410_v45 = vpack.c.bf16 %v1366_v42, %v1366_v42  ;;  %v1332_v46 = vadd.f32 %v4918_v36, %v1331_v44  ;;  %v5874_v12 = vpack.c.b16 %v1522_v58, %v1522_v58 }
 0xbe4   :  { %v1412_v22 = vpack.c.bf16 %v1402_v43, %v1402_v43 }
 0xbe5   :  { %v1423_v47 = vsel %vm415_vm8, %v1410_v45, 0  ;;  %v1527_v48 = vunpack.c.l.b16 %v1410_v45  ;;  %v1407_v49 = vmul.f32 0.35355338, %v1332_v46  ;;  %1524 = vrot.lane.b32.xlu0 %v5874_v12, %s5450_s11 }
 0xbe6   :  { %v1485_v50 = vsel %vm481_vm9, %v1412_v22, 0  ;;  %1432 = vmatpush.bf16.xpose.msrb.mxu1 %v1423_v47  ;;  %v1604_v29 = vunpack.c.l.b16 %v1412_v22 }
 0xbe7   :  { %v5880_v51 = vpack.c.b16 %v1527_v48, %v1527_v48  ;;  %v1409_v52 = vpack.c.bf16 %v1407_v49, %v1407_v49  ;;  %1494 = vmatpush.bf16.msra.mxu3 %v1485_v50 }
 0xbe8   :  { %v1367_v55 = vpop.f32.mrf.mxu2  ;;  %v5905_v30 = vpack.c.b16 %v1604_v29, %v1604_v29 }
 0xbe9   :  { %v1368_v6 = vadd.f32 %v4919_v38, %v1367_v55  ;;  %v1403_v56 = vpop.f32.mrf.mxu3  ;;  %1529 = vrot.lane.b32.xlu1 %v5880_v51, %s5450_s11  ;;  %v1551_v7 = vunpack.c.l.b16 %v1409_v52 }
 0xbea   :  { %v1404_v57 = vadd.f32 %v4920_v39, %v1403_v56 }
 0xbeb   :  { %v1411_v59 = vpack.c.bf16 %v1368_v6, %v1368_v6  ;;  %v5889_v1 = vpack.c.b16 %v1551_v7, %v1551_v7 }
 0xbec   :  { %v1413_v60 = vpack.c.bf16 %v1404_v57, %v1404_v57 }
 0xbed   :  { %v1556_v61 = vunpack.c.l.b16 %v1411_v59  ;;  %4489 = vmatmul.msk.bf16.vlgmr.msrb.gmra.mxu1 %vm415_vm8, %v1408_v41  ;;  %v1442_v62 = vsel %vm415_vm8, %v1411_v59, 0 }
 0xbee   :  { %1451 = vmatpush.bf16.xpose.msra.mxu2 %v1442_v62  ;;  %v1504_v63 = vsel %vm481_vm9, %v1413_v60, 0  ;;  %v1628_v33 = vunpack.c.l.b16 %v1413_v60 }
 0xbef   :  { %1513 = vmatpush.bf16.msrb.mxu0 %v1504_v63  ;;  %v5887_v0 = vpack.c.b16 %v1556_v61, %v1556_v61 }
 0xbf0   :  { %v5912_v35 = vpack.c.b16 %v1628_v33, %v1628_v33 }
 0xbf1   :  { %1558 = vrot.lane.b32.xlu2 %v5887_v0, %s5450_s11  ;;  %1553 = vrot.lane.b32.xlu1 %v5889_v1, %s5450_s11 }
 0xbf5   :  { %4490 = vmatmul.msk.bf16.vlgmr.msra.gmra.mxu2 %vm415_vm8, %v1409_v52 }
 0xc4b   :  { %v1559_v40 = vpop.permute.xlu2 %1558 }
 0xc4c   :  { %v1564_v4 = vsel %vm415_vm8, %v1559_v40, 0 }
 0xc4d   :  { %1573 = vmatpush.bf16.xpose.msrb.mxu2 %v1564_v4 }
 0xc57   :  { %v1525_v5 = vpop.permute.xlu0 %1524 }
 0xc5b   :  { %v1530_v2 = vpop.permute.xlu1 %1529 }
 0xc5c   :  { %v1535_v3 = vsel %vm415_vm8, %v1530_v2, 0 }
 0xc5d   :  { %1544 = vmatpush.bf16.xpose.msra.mxu1 %v1535_v3 }
 0xc63   :  { %v1554_v8 = vpop.permute.xlu1 %1553 }
 0xc64   :  { %4493 = vmatmul.msk.bf16.vlgmr.msra.gmra.mxu1 %vm415_vm8, %v1525_v5  ;;  %4494 = vmatmul.msk.bf16.vlgmr.msrb.gmra.mxu2 %vm415_vm8, %v1554_v8 }
 0xc6a   :  { %v1434_v9 = vpop.f32.mrf.mxu1 }
 0xc6b   :  { %v1457_v11 = vsel %vm415_vm8, %v1434_v9, -inf }
 0xc6c   :  { %1458 = vmax.xlane.f32.xlu0 %v1457_v11 }
 0xc72   :  { %v1436_v13 = vpop.f32.mrf.mxu1 }
 0xc78   :  { %v5901_v15 = vpop.f32.mrf.mxu2 }
 0xc79   :  { %v1460_v47 = vsel %vm415_vm8, %v5901_v15, -inf }
 0xc80   :  { %v1455_v16 = vpop.f32.mrf.mxu2 }
 0xcdf   :  { %v1459_v18 = vpop.xlane.xlu0 %1458 }
 0xce0   :  { %v1463_v19 = vsub.f32 %v1434_v9, %v1459_v18  ;;  %v4485_v9 = vld [vmem:[%s6558_s9 + $0x20] sm:$0xff] }
 0xce1   :  { %v1546_v20 = vpop.f32.mrf.mxu1  ;;  %v1520_v11 = vpack.c.bf16 %v4485_v9, %v4485_v9 }
 0xce2   :  { %v1465_v23 = vmul.f32 1.442695, %v1463_v19  ;;  %v1579_v24 = vsel %vm415_vm8, %v1546_v20, -inf }
 0xce3   :  { %1580 = vmax.xlane.f32.xlu1 %v1579_v24 }
 0xce4   :  { %4998 = vpow2.f32 %v1465_v23 }
 0xce7   :  { %v1575_v25 = vpop.f32.mrf.mxu2 }
 0xce8   :  { %v1582_v32 = vsel %vm415_vm8, %v1575_v25, -inf }
 0xce9   :  { %v1548_v17 = vpop.f32.mrf.mxu1 }
 0xcea   :  { %v4999_v26 = vpop.eup %4998 }
 0xceb   :  { %v1469_v27 = vsel %vm415_vm8, %v4999_v26, 0.0 }
 0xcec   :  { %1470 = vadd.xlane.f32.xlu2 %v1469_v27 }
 0xcef   :  { %v1577_v28 = vpop.f32.mrf.mxu2 }
 0xcfc   :  { %1606 = vrot.lane.b32.xlu1 %v5905_v30, %s5450_s11 }
 0xd04   :  { %1695 = vrot.lane.b32.xlu2 %v5880_v51, %s5451_s10 }
 0xd26   :  { %1583 = vmax.xlane.f32.xlu1 %v1582_v32 }
 0xd3f   :  { %1630 = vrot.lane.b32.xlu1 %v5912_v35, %s5450_s11 }
 0xd56   :  { %v1581_v36 = vpop.xlane.xlu1 %1580 }
 0xd57   :  { %v1585_v53 = vsub.f32 %v1546_v20, %v1581_v36 }
 0xd59   :  { %v1587_v14 = vmul.f32 1.442695, %v1585_v53 }
 0xd5b   :  { %5000 = vpow2.f32 %v1587_v14 }
 0xd5f   :  { %v1471_v37 = vpop.xlane.xlu2 %1470 }
 0xd60   :  { %5002 = vrcp.f32 %v1471_v37 }
 0xd61   :  { %v5001_v38 = vpop.eup %5000 }
 0xd62   :  { %v1591_v39 = vsel %vm415_vm8, %v5001_v38, 0.0 }
 0xd63   :  { %1592 = vadd.xlane.f32.xlu0 %v1591_v39 }
 0xd66   :  { %v5003_v41 = vpop.eup %5002 }
 0xd67   :  { %v1477_v54 = vmul.f32 %v5003_v41, %v4999_v26  ;;  %v1696_v42 = vpop.permute.xlu2 %1695 }
 0xd68   :  { %v1701_v44 = vsel %vm415_vm8, %v1696_v42, 0 }
 0xd69   :  { %v1479_v58 = vpack.c.bf16 %v1477_v54, %v1477_v54 }
 0xd6b   :  { %4491 = vmatmul.msk.bf16.vlgmr.msra.gmra.mxu3 %vm415_vm8, %v1479_v58 }
 0xd6e   :  { %v1607_v21 = vpop.permute.xlu1 %1606 }
 0xd6f   :  { %v1612_v43 = vsel %vm481_vm9, %v1607_v21, 0 }
 0xd70   :  { %1621 = vmatpush.bf16.msrb.mxu3 %v1612_v43 }
 0xd74   :  { %1710 = vmatpush.bf16.xpose.msra.mxu3 %v1701_v44 }
 0xd77   :  { %1693 = vrot.lane.b32.xlu0 %v5874_v12, %s5451_s10 }
 0xd99   :  { %v1584_v45 = vpop.xlane.xlu1 %1583 }
 0xd9a   :  { %v1586_v46 = vsub.f32 %v1575_v25, %v1584_v45 }
 0xd9c   :  { %v1589_v22 = vmul.f32 1.442695, %v1586_v46 }
 0xd9e   :  { %5004 = vpow2.f32 %v1589_v22 }
 0xda1   :  { %1461 = vmax.xlane.f32.xlu0 %v1460_v47 }
 0xda4   :  { %v5924_v48 = vpop.eup %5004 }
 0xda5   :  { %v1594_v49 = vsel %vm415_vm8, %v5924_v48, 0.0 }
 0xda9   :  { %1595 = vadd.xlane.f32.xlu0 %v1594_v49 }
 0xdb1   :  { %v1631_v50 = vpop.permute.xlu1 %1630 }
 0xdb2   :  { %v1636_v52 = vsel %vm481_vm9, %v1631_v50, 0 }
 0xdb3   :  { %1645 = vmatpush.bf16.msra.mxu0 %v1636_v52 }
 0xdbd   :  { %1716 = vrot.lane.b32.xlu0 %v5889_v1, %s5451_s10 }
 0xdc5   :  { %1763 = vrot.lane.b32.xlu0 %v5905_v30, %s5451_s10 }
 0xdcd   :  { %1831 = vrot.lane.b32.xlu0 %v5880_v51, %s5452_s25 }
 0xdd5   :  { %1854 = vrot.lane.b32.xlu0 %v5887_v0, %s5452_s25 }
 0xdd6   :  { %v1593_v55 = vpop.xlane.xlu0 %1592 }
 0xdd7   :  { %5006 = vrcp.f32 %v1593_v55 }
 0xddd   :  { %v5007_v6 = vpop.eup %5006  ;;  %1829 = vrot.lane.b32.xlu0 %v5874_v12, %s5452_s25  ;;  %v4486_v12 = vld [vmem:[%s6558_s9 + $0x28] sm:$0xff] }
 0xdde   :  { %v1599_v56 = vmul.f32 %v5007_v6, %v5001_v38  ;;  %v1652_v62 = vpack.c.bf16 %v4486_v12, %v4486_v12 }
 0xde0   :  { %v1601_v57 = vpack.c.bf16 %v1599_v56, %v1599_v56 }
 0xde2   :  { %4495 = vmatmul.msk.bf16.vlgmr.msrb.gmra.mxu3 %vm415_vm8, %v1601_v57 }
 0xde5   :  { %1852 = vrot.lane.b32.xlu0 %v5889_v1, %s5452_s25  ;;  %v1657_v1 = vsel %vm481_vm9, %v1652_v62, 0 }
 0xde6   :  { %1666 = vmatpush.bf16.msrb.mxu1 %v1657_v1 }
 0xde9   :  { %v1694_v59 = vpop.permute.xlu0 %1693 }
 0xded   :  { %1784 = vrot.lane.b32.xlu0 %v5912_v35, %s5451_s10 }
 0xdee   :  { %v5944_v51 = vpop.f32.mrf.mxu3 }
 0xdf2   :  { %4499 = vmatmul.msk.bf16.vlgmr.msra.gmra.mxu3 %vm415_vm8, %v1694_v59 }
 0xdf6   :  { %v1498_v7 = vpop.f32.mrf.mxu3 }
 0xe14   :  { %v1462_v60 = vpop.xlane.xlu0 %1461 }
 0xe15   :  { %v1464_v61 = vsub.f32 %v5901_v15, %v1462_v60  ;;  %v1677_v15 = vsel %vm481_vm9, %v1520_v11, 0 }
 0xe16   :  { %1686 = vmatpush.bf16.msra.mxu2 %v1677_v15 }
 0xe17   :  { %v1467_v63 = vmul.f32 1.442695, %v1464_v61 }
 0xe19   :  { %5008 = vpow2.f32 %v1467_v63 }
 0xe1c   :  { %v1596_v2 = vpop.xlane.xlu0 %1595 }
 0xe1f   :  { %v5009_v40 = vpop.eup %5008 }
 0xe20   :  { %v1472_v4 = vsel %vm415_vm8, %v5009_v40, 0.0 }
 0xe21   :  { %1473 = vadd.xlane.f32.xlu2 %v1472_v4 }
 0xe2f   :  { %v1717_v3 = vpop.permute.xlu0 %1716 }
 0xe37   :  { %v1764_v5 = vpop.permute.xlu0 %1763 }
 0xe38   :  { %v1769_v8 = vsel %vm481_vm9, %v1764_v5, 0 }
 0xe39   :  { %1718 = vrot.lane.b32.xlu2 %v5887_v0, %s5451_s10  ;;  %1778 = vmatpush.bf16.msra.mxu1 %v1769_v8 }
 0xe3f   :  { %v1832_v13 = vpop.permute.xlu0 %1831 }
 0xe40   :  { %v1837_v38 = vsel %vm415_vm8, %v1832_v13, 0 }
 0xe47   :  { %v1855_v16 = vpop.permute.xlu0 %1854 }
 0xe48   :  { %v1860_v22 = vsel %vm415_vm8, %v1855_v16, 0 }
 0xe4f   :  { %v1830_v18 = vpop.permute.xlu0 %1829 }
 0xe57   :  { %v1853_v19 = vpop.permute.xlu0 %1852 }
 0xe5f   :  { %v1785_v20 = vpop.permute.xlu0 %1784 }
 0xe60   :  { %v1790_v23 = vsel %vm481_vm9, %v1785_v20, 0 }
 0xe61   :  { %1799 = vmatpush.bf16.msrb.mxu2 %v1790_v23 }
 0xe65   :  { %v1623_v24 = vpop.f32.mrf.mxu3 }
 0xe6d   :  { %v1625_v25 = vpop.f32.mrf.mxu3 }
 0xe75   :  { %v1712_v0 = vpop.f32.mrf.mxu3 }
 0xe76   :  { %v1739_v17 = vsel %vm415_vm8, %v1712_v0, -inf }
 0xe77   :  { %1740 = vmax.xlane.f32.xlu1 %v1739_v17 }
 0xe7d   :  { %v1714_v26 = vpop.f32.mrf.mxu3 }
 0xe94   :  { %v1474_v27 = vpop.xlane.xlu2 %1473 }
 0xe95   :  { %5010 = vrcp.f32 %v1474_v27 }
 0xe96   :  { %5012 = vrcp.f32 %v1596_v2 }
 0xe9b   :  { %v5011_v28 = vpop.eup %5010 }
 0xe9c   :  { %v1478_v29 = vmul.f32 %v5011_v28, %v5009_v40  ;;  %v1719_v32 = vpop.permute.xlu2 %1718  ;;  %v5013_v53 = vpop.eup %5012 }
 0xe9d   :  { %v1724_v36 = vsel %vm415_vm8, %v1719_v32, 0  ;;  %v1600_v14 = vmul.f32 %v5013_v53, %v5924_v48  ;;  %v4487_v53 = vld [vmem:[%s6558_s9 + $0x30] sm:$0xff] }
 0xe9e   :  { %v1480_v33 = vpack.c.bf16 %v1478_v29, %v1478_v29 }
 0xe9f   :  { %v1602_v37 = vpack.c.bf16 %v1600_v14, %v1600_v14  ;;  %v1806_v14 = vpack.c.bf16 %v4487_v53, %v4487_v53 }
 0xea0   :  { %4492 = vmatmul.msk.bf16.vlgmr.msrb.gmra.mxu0 %vm415_vm8, %v1480_v33 }
 0xea1   :  { %1733 = vmatpush.bf16.xpose.msrb.mxu0 %v1724_v36 }
 0xeb0   :  { %4496 = vmatmul.msk.bf16.vlgmr.msra.gmra.mxu0 %vm415_vm8, %v1602_v37  ;;  %v1811_v37 = vsel %vm481_vm9, %v1806_v14, 0 }
 0xeb1   :  { %1846 = vmatpush.bf16.xpose.msra.mxu0 %v1837_v38  ;;  %1820 = vmatpush.bf16.msrb.mxu3 %v1811_v37 }
 0xec0   :  { %4500 = vmatmul.msk.bf16.vlgmr.msrb.gmra.mxu0 %vm415_vm8, %v1717_v3 }
 0xed0   :  { %4504 = vmatmul.msk.bf16.vlgmr.msra.gmra.mxu0 %vm415_vm8, %v1830_v18 }
 0xeea   :  { %v1741_v39 = vpop.xlane.xlu1 %1740 }
 0xeeb   :  { %v1745_v41 = vsub.f32 %v1712_v0, %v1741_v39 }
 0xeed   :  { %v1747_v54 = vmul.f32 1.442695, %v1745_v41 }
 0xeef   :  { %5014 = vpow2.f32 %v1747_v54 }
 0xef5   :  { %v5015_v58 = vpop.eup %5014 }
 0xef6   :  { %v1751_v42 = vsel %vm415_vm8, %v5015_v58, 0.0 }
 0xef7   :  { %1752 = vadd.xlane.f32.xlu2 %v1751_v42 }
 0xf1d   :  { %v1515_v21 = vpop.f32.mrf.mxu0 }
 0xf1e   :  { %v1519_v43 = vpack.c.bf16 %v1515_v21, %v5944_v51 }
 0xf20   :  { %4498 = vmatmul.msk.bf16.vlgmr.msra.gmra.mxu2 %vm415_vm8, %v1519_v43 }
 0xf25   :  { %v1517_v44 = vpop.f32.mrf.mxu0 }
 0xf2d   :  { %v1647_v45 = vpop.f32.mrf.mxu0 }
 0xf2e   :  { %v1651_v46 = vpack.c.bf16 %v1647_v45, %v1623_v24 }
 0xf30   :  { %4497 = vmatmul.msk.bf16.vlgmr.msrb.gmra.mxu1 %vm415_vm8, %v1651_v46 }
 0xf31   :  { %1869 = vmatpush.bf16.xpose.msrb.mxu1 %v1860_v22 }
 0xf35   :  { %v1649_v47 = vpop.f32.mrf.mxu0 }
 0xf3d   :  { %v1735_v48 = vpop.f32.mrf.mxu0 }
 0xf3e   :  { %v1742_v49 = vsel %vm415_vm8, %v1735_v48, -inf }
 0xf3f   :  { %1743 = vmax.xlane.f32.xlu1 %v1742_v49 }
 0xf45   :  { %v1737_v50 = vpop.f32.mrf.mxu0 }
 0xf4d   :  { %v1848_v52 = vpop.f32.mrf.mxu0 }
 0xf4e   :  { %v1875_v55 = vsel %vm415_vm8, %v1848_v52, -inf }
 0xf4f   :  { %1876 = vmax.xlane.f32.xlu1 %v1875_v55 }
 0xf55   :  { %v1850_v6 = vpop.f32.mrf.mxu0 }
 0xf6a   :  { %v1753_v56 = vpop.xlane.xlu2 %1752 }
 0xf6b   :  { %5016 = vrcp.f32 %v1753_v56 }
 0xf71   :  { %v5017_v57 = vpop.eup %5016 }
 0xf72   :  { %v1759_v51 = vmul.f32 %v5017_v57, %v5015_v58  ;;  %v4921_v57 = vld [vmem:[#allocation11 + $0x1] ss:$0 sm:$0xff] }
 0xf74   :  { %v1761_v59 = vpack.c.bf16 %v1759_v51, %v1759_v51 }
 0xf76   :  { %4501 = vmatmul.msk.bf16.vlgmr.msra.gmra.mxu1 %vm415_vm8, %v1761_v59 }
 0xf86   :  { %4505 = vmatmul.msk.bf16.vlgmr.msrb.gmra.mxu1 %vm415_vm8, %v1853_v19 }
 0xfa3   :  { %v1688_v7 = vpop.f32.mrf.mxu2 }
 0xfab   :  { %v1690_v38 = vpop.f32.mrf.mxu2 }
 0xfad   :  { %v1668_v60 = vpop.f32.mrf.mxu1 }
 0xfae   :  { %v5978_v61 = vadd.f32 %v1688_v7, %v1668_v60 }
 0xfb2   :  { %v1744_v12 = vpop.xlane.xlu1 %1743 }
 0xfb3   :  { %v1746_v62 = vsub.f32 %v1735_v48, %v1744_v12  ;;  %v4488_v48 = vld [vmem:[%s6558_s9 + $0x38] sm:$0xff] }
 0xfb4   :  { %v1942_v49 = vpack.c.bf16 %v4488_v48, %v4488_v48 }
 0xfb5   :  { %v1749_v63 = vmul.f32 1.442695, %v1746_v62  ;;  %v5982_v9 = vpop.f32.mrf.mxu1 }
 0xfb6   :  { %v1947_v50 = vsel %vm481_vm9, %v1942_v49, 0  ;;  %v1691_v60 = vadd.f32 %v1690_v38, %v5982_v9  ;;  %v4851_v49 = vld [vmem:[%s6564_s15 + $0x78] sm:$0xff] }
 0xfb7   :  { %5018 = vpow2.f32 %v1749_v63  ;;  %1956 = vmatpush.bf16.msrb.mxu0 %v1947_v50 }
 0xfbd   :  { %v5019_v1 = vpop.eup %5018 }
 0xfbe   :  { %v1754_v40 = vsel %vm415_vm8, %v5019_v1, 0.0 }
 0xfbf   :  { %1755 = vadd.xlane.f32.xlu2 %v1754_v40 }
 0xfc2   :  { %v1877_v4 = vpop.xlane.xlu1 %1876 }
 0xfc3   :  { %v1881_v2 = vsub.f32 %v1848_v52, %v1877_v4 }
 0xfc5   :  { %v1883_v3 = vmul.f32 1.442695, %v1881_v2 }
 0xfc7   :  { %5020 = vpow2.f32 %v1883_v3 }
 0xfcd   :  { %v5021_v5 = vpop.eup %5020 }
 0xfce   :  { %v1887_v8 = vsel %vm415_vm8, %v5021_v5, 0.0 }
 0xfcf   :  { %1888 = vadd.xlane.f32.xlu0 %v1887_v8 }
 0xff3   :  { %v1780_v11 = vpop.f32.mrf.mxu1 }
 0xffb   :  { %v1782_v13 = vpop.f32.mrf.mxu1 }
0x1003   :  { %v1871_v15 = vpop.f32.mrf.mxu1 }
0x1004   :  { %v1878_v16 = vsel %vm415_vm8, %v1871_v15, -inf }
0x1005   :  { %1879 = vmax.xlane.f32.xlu2 %v1878_v16 }
0x100b   :  { %v1873_v18 = vpop.f32.mrf.mxu1 }
0x101d   :  { %1899 = vrot.lane.b32.xlu2 %v5905_v30, %s5452_s25 }
0x1032   :  { %v1756_v19 = vpop.xlane.xlu2 %1755 }
0x1033   :  { %5022 = vrcp.f32 %v1756_v19 }
0x1039   :  { %v5023_v20 = vpop.eup %5022 }
0x103a   :  { %v1760_v23 = vmul.f32 %v5023_v20, %v5019_v1 }
0x103c   :  { %v1762_v24 = vpack.c.bf16 %v1760_v23, %v1760_v23 }
0x103e   :  { %4502 = vmatmul.msk.bf16.vlgmr.msrb.gmra.mxu2 %vm415_vm8, %v1762_v24  ;;  %v4842_v24 = vld [vmem:[#allocation14 + $0x10] sm:$0xff] }
0x1042   :  { %v1889_v25 = vpop.xlane.xlu0 %1888 }
0x1043   :  { %5024 = vrcp.f32 %v1889_v25 }
0x1049   :  { %v5025_v27 = vpop.eup %5024 }
0x104a   :  { %v1895_v28 = vmul.f32 %v5025_v27, %v5021_v5 }
0x104c   :  { %v1897_v33 = vpack.c.bf16 %v1895_v28, %v1895_v28 }
0x1078   :  { %v1880_v0 = vpop.xlane.xlu2 %1879 }
0x1079   :  { %v1882_v17 = vsub.f32 %v1871_v15, %v1880_v0 }
0x107b   :  { %v1885_v26 = vmul.f32 1.442695, %v1882_v17 }
0x107d   :  { %5026 = vpow2.f32 %v1885_v26 }
0x1080   :  { %v1900_v29 = vpop.permute.xlu2 %1899 }
0x1081   :  { %v1905_v32 = vsel %vm481_vm9, %v1900_v29, 0 }
0x1082   :  { %1914 = vmatpush.bf16.msra.mxu2 %v1905_v32 }
0x1083   :  { %v5027_v30 = vpop.eup %5026 }
0x1084   :  { %v1890_v36 = vsel %vm415_vm8, %v5027_v30, 0.0 }
0x1085   :  { %1891 = vadd.xlane.f32.xlu1 %v1890_v36  ;;  %4506 = vmatmul.msk.bf16.vlgmr.msra.gmra.mxu2 %vm415_vm8, %v1897_v33 }
0x1086   :  { %2231 = vmatpush.bf16.msrb.mxu2 %v4851_v49 }
0x109e   :  { %1920 = vrot.lane.b32.xlu1 %v5912_v35, %s5452_s25 }
0x10c1   :  { %v1801_v39 = vpop.f32.mrf.mxu2 }
0x10c2   :  { %v1805_v41 = vpack.c.bf16 %v1801_v39, %v1780_v11  ;;  %v4922_v39 = vld [vmem:[#allocation13 + $0x1] ss:$0 sm:$0xff] }
0x10c4   :  { %4503 = vmatmul.msk.bf16.vlgmr.msrb.gmra.mxu3 %vm415_vm8, %v1805_v41 }
0x10c9   :  { %v1803_v54 = vpop.f32.mrf.mxu2 }
0x10f8   :  { %v1892_v58 = vpop.xlane.xlu1 %1891 }
0x10f9   :  { %5028 = vrcp.f32 %v1892_v58 }
0x10ff   :  { %v5029_v21 = vpop.eup %5028 }
0x1100   :  { %v1896_v43 = vmul.f32 %v5029_v21, %v5027_v30 }
0x1102   :  { %v1898_v46 = vpack.c.bf16 %v1896_v43, %v1896_v43 }
0x1108   :  { %v1916_v42 = vpop.f32.mrf.mxu2 }
0x1110   :  { %v1921_v35 = vpop.permute.xlu1 %1920  ;;  %v1918_v44 = vpop.f32.mrf.mxu2 }
0x1111   :  { %v1926_v45 = vsel %vm481_vm9, %v1921_v35, 0 }
0x1112   :  { %1935 = vmatpush.bf16.msra.mxu3 %v1926_v45 }
0x1115   :  { %4507 = vmatmul.msk.bf16.vlgmr.msra.gmra.mxu3 %vm415_vm8, %v1898_v46 }
0x1147   :  { %v1822_v22 = vpop.f32.mrf.mxu3 }
0x1148   :  { %v1827_v47 = vadd.f32 %v1822_v22, %v5978_v61  ;;  %v4924_v22 = vld [vmem:[#allocation16 + $0x1] ss:$0 sm:$0xff] }
0x114f   :  { %v1824_v52 = vpop.f32.mrf.mxu3 }
0x1150   :  { %v1828_v12 = vadd.f32 %v1824_v52, %v1691_v60 }
0x1198   :  { %v1937_v55 = vpop.f32.mrf.mxu3 }
0x1199   :  { %v1941_v6 = vpack.c.bf16 %v1937_v55, %v1916_v42  ;;  %v4923_v42 = vld [vmem:[%s6561_s12 + $0x1] ss:$0 sm:$0xff]  ;;  %v4850_v55 = vld [vmem:[%s6564_s15 + $0x70] sm:$0xff] }
0x119a   :  { %2232 = vmatpush.bf16.msrb.mxu2 %v4850_v55 }
0x119b   :  { %4508 = vmatmul.msk.bf16.vlgmr.msrb.gmra.mxu0 %vm415_vm8, %v1941_v6 }
0x11a0   :  { %v1939_v56 = vpop.f32.mrf.mxu3 }
0x1218   :  { %v1958_v51 = vpop.f32.mrf.mxu0 }
0x1219   :  { %v1963_v59 = vadd.f32 %v1958_v51, %v1827_v47 }
0x121b   :  { %v1970_v7 = vadd.f32 %v4921_v57, %v1963_v59 }
0x121d   :  { %v1972_v61 = vadd.f32 %v1970_v7, %v5862_v34  ;;  %v4849_v7 = vld [vmem:[%s6564_s15 + $0x68] sm:$0xff] }
0x121e   :  { %2233 = vmatpush.bf16.msrb.mxu2 %v4849_v7 }
0x121f   :  { %v1978_v62 = vsel %vm235_vm0, %v1972_v61, 0.0 }
0x1220   :  { %1979 = vadd.xlane.f32.xlu2 %v1978_v62  ;;  %v1960_v63 = vpop.f32.mrf.mxu0 }
0x1221   :  { %v1964_v1 = vadd.f32 %v1960_v63, %v1828_v12  ;;  %v4848_v63 = vld [vmem:[%s6564_s15 + $0x60] sm:$0xff] }
0x1222   :  { %2234 = vmatpush.bf16.msrb.mxu2 %v4848_v63 }
0x1223   :  { %v1971_v40 = vadd.f32 %v4921_v57, %v1964_v1 }
0x1225   :  { %v1973_v4 = vadd.f32 %v1971_v40, %v5864_v31  ;;  %v4843_v31 = vld [vmem:[#allocation14 + $0x18] sm:$0xff] }
0x1226   :  { %2064 = vmatpush.bf16.msra.mxu1 %v4843_v31 }
0x1227   :  { %v1981_v2 = vsel %vm235_vm0, %v1973_v4, 0.0 }
0x1228   :  { %1982 = vadd.xlane.f32.xlu1 %v1981_v2 }
0x122a   :  { %2065 = vmatpush.bf16.msra.mxu1 %v4842_v24 }
0x1293   :  { %v1980_v3 = vpop.xlane.xlu2 %1979 }
0x1294   :  { %v1984_v5 = vmul.f32 %v1980_v3, %v5613_v10 }
0x1296   :  { %v1986_v8 = vsub.f32 %v1972_v61, %v1984_v5  ;;  %v4847_v5 = vld [vmem:[%s6564_s15 + $0x58] sm:$0xff] }
0x1297   :  { %2235 = vmatpush.bf16.msrb.mxu2 %v4847_v5 }
0x1298   :  { %v1988_v11 = vmul.f32 %v1986_v8, %v1986_v8 }
0x129a   :  { %v1990_v9 = vsel %vm235_vm0, %v1988_v11, 0.0 }
0x129b   :  { %1991 = vadd.xlane.f32.xlu0 %v1990_v9  ;;  %v1983_v34 = vpop.xlane.xlu1 %1982 }
0x129c   :  { %v1985_v13 = vmul.f32 %v1983_v34, %v5613_v10 }
0x129e   :  { %v1987_v15 = vsub.f32 %v1973_v4, %v1985_v13 }
0x12a0   :  { %v1989_v16 = vmul.f32 %v1987_v15, %v1987_v15 }
0x12a2   :  { %v1993_v18 = vsel %vm235_vm0, %v1989_v16, 0.0 }
0x12a3   :  { %1994 = vadd.xlane.f32.xlu0 %v1993_v18  ;;  %v4846_v18 = vld [vmem:[%s6564_s15 + $0x50] sm:$0xff] }
0x12a4   :  { %2236 = vmatpush.bf16.msrb.mxu2 %v4846_v18 }
0x130e   :  { %v1992_v19 = vpop.xlane.xlu0 %1991 }
0x130f   :  { %v1996_v20 = vmul.f32 %v1992_v19, %v5613_v10 }
0x1311   :  { %v1998_v23 = vadd.f32 1e-12, %v1996_v20 }
0x1313   :  { %5030 = vrsqrt.f32 %v1998_v23  ;;  %vm2006_vm3 = vweird.f32 %v1998_v23 }
0x1316   :  { %v1995_v25 = vpop.xlane.xlu0 %1994 }
0x1317   :  { %v1997_v0 = vmul.f32 %v1995_v25, %v5613_v10 }
0x1319   :  { %v5031_v17 = vpop.eup %5030  ;;  %v1999_v26 = vadd.f32 1e-12, %v1997_v0 }
0x131a   :  { %v2001_v27 = vmul.f32 %v5031_v17, %v1998_v23  ;;  %vm2007_vm2 = vweird.f32 %v5031_v17 }
0x131b   :  { %5032 = vrsqrt.f32 %v1999_v26  ;;  %vm2008_vm4 = vmor %vm2006_vm3, %vm2007_vm2  ;;  %vm2016_vm6 = vweird.f32 %v1999_v26 }
0x131c   :  { %v2002_v28 = vmul.f32 %v5031_v17, %v2001_v27 }
0x131e   :  { %v2003_v29 = vmul.f32 0.5, %v2002_v28 }
0x1320   :  { %v2004_v32 = vsub.f32 1.5, %v2003_v29 }
0x1321   :  { %v5033_v30 = vpop.eup %5032 }
0x1322   :  { %v2005_v33 = vmul.f32 %v5031_v17, %v2004_v32  ;;  %v2011_v36 = vmul.f32 %v5033_v30, %v1999_v26  ;;  %vm2017_vm5 = vweird.f32 %v5033_v30 }
0x1323   :  { %vm2018_vm7 = vmor %vm2016_vm6, %vm2017_vm5 }
0x1324   :  { %v2012_v53 = vmul.f32 %v5033_v30, %v2011_v36  ;;  %v2009_v14 = vsel %vm2008_vm4, %v5031_v17, %v2005_v33  ;;  %v4845_v17 = vld [vmem:[%s6564_s15 + $0x48] sm:$0xff] }
0x1325   :  { %v2020_v41 = vmul.f32 %v2009_v14, %v1986_v8  ;;  %2237 = vmatpush.bf16.msrb.mxu2 %v4845_v17 }
0x1326   :  { %v2013_v37 = vmul.f32 0.5, %v2012_v53 }
0x1327   :  { %v2025_v21 = vmul.f32 %v4922_v39, %v2020_v41 }
0x1328   :  { %v2014_v38 = vsub.f32 1.5, %v2013_v37 }
0x1329   :  { %v6020_v44 = vadd.f32 %v4923_v42, %v2025_v21 }
0x132a   :  { %v2015_v54 = vmul.f32 %v5033_v30, %v2014_v38 }
0x132c   :  { %v2019_v58 = vsel %vm2018_vm7, %v5033_v30, %v2015_v54  ;;  %v4844_v30 = vld [vmem:[%s6564_s15 + $0x40] sm:$0xff] }
0x132d   :  { %v2021_v43 = vmul.f32 %v2019_v58, %v1987_v15  ;;  %2238 = vmatpush.bf16.msrb.mxu2 %v4844_v30 }
0x132f   :  { %v2026_v35 = vmul.f32 %v4922_v39, %v2021_v43 }
0x1331   :  { %v6022_v45 = vadd.f32 %v4923_v42, %v2026_v35 }
0x1333   :  { %v2039_v46 = vpack.c.bf16 %v6022_v45, %v6020_v44 }
0x1335   :  { %4518 = vmatmul.msk.bf16.vlgmr.msra.gmra.mxu1 %vm235_vm0, %v2039_v46 }
0x13b2   :  { %v2067_v47 = vpop.f32.mrf.mxu1 }
0x13b3   :  { %v6027_v48 = vadd.f32 %v4924_v22, %v2067_v47 }
0x13b5   :  { %v6033_v50 = vmul.f32 0.70710677, %v6027_v48 }
0x13b7   :  { %v2076_v52 = vmul.f32 %v6033_v50, %v6033_v50 }
0x13b9   :  { %v2077_v6 = vmin.f32 %v2076_v52, 16.0 }
0x13ba   :  { %v2069_v56 = vpop.f32.mrf.mxu1 }
0x13bb   :  { %v2078_v57 = vmul.f32 2.1237322e-06, %v2077_v6  ;;  %v2089_v51 = vmul.f32 3.8918573e-05, %v2077_v6  ;;  %v6040_v59 = vadd.f32 %v4924_v22, %v2069_v56 }
0x13bd   :  { %v2079_v60 = vadd.f32 0.00028619796, %v2078_v57  ;;  %v2090_v61 = vadd.f32 0.001143296, %v2089_v51  ;;  %v6046_v12 = vmul.f32 0.70710677, %v6040_v59 }
0x13bf   :  { %v2091_v62 = vmul.f32 %v2090_v61, %v2077_v6  ;;  %v2116_v1 = vmul.f32 %v6046_v12, %v6046_v12  ;;  %v2080_v40 = vmul.f32 %v2079_v60, %v2077_v6 }
0x13c1   :  { %v2092_v4 = vadd.f32 0.014752088, %v2091_v62  ;;  %v2117_v2 = vmin.f32 %v2116_v1, 16.0  ;;  %v2081_v9 = vadd.f32 0.0036580483, %v2080_v40 }
0x13c3   :  { %v2093_v3 = vmul.f32 %v2092_v4, %v2077_v6  ;;  %v2118_v8 = vmul.f32 2.1237322e-06, %v2117_v2  ;;  %v2129_v11 = vmul.f32 3.8918573e-05, %v2117_v2  ;;  %v2082_v20 = vmul.f32 %v2081_v9, %v2077_v6 }
0x13c5   :  { %v2094_v34 = vadd.f32 0.112945676, %v2093_v3  ;;  %v2119_v13 = vadd.f32 0.00028619796, %v2118_v8  ;;  %v2130_v15 = vadd.f32 0.001143296, %v2129_v11 }
0x13c6   :  { %v2083_v27 = vadd.f32 0.05243302, %v2082_v20  ;;  %v4925_v20 = vld [vmem:[%s6565_s16 + $0x1] ss:$0 sm:$0xff] }
0x13c7   :  { %v2095_v16 = vmul.f32 %v2094_v34, %v2077_v6  ;;  %v2120_v31 = vmul.f32 %v2119_v13, %v2117_v2  ;;  %v2131_v19 = vmul.f32 %v2130_v15, %v2117_v2  ;;  %v2072_v13 = vmul.f32 0.5, %v6027_v48 }
0x13c8   :  { %v2084_v36 = vmul.f32 %v2083_v27, %v2077_v6  ;;  %v2073_v15 = vmul.f32 0.5, %v6040_v59 }
0x13c9   :  { %v2096_v23 = vadd.f32 0.4994258, %v2095_v16  ;;  %v2121_v24 = vadd.f32 0.0036580483, %v2120_v31  ;;  %v2132_v25 = vadd.f32 0.014752088, %v2131_v19 }
0x13ca   :  { %v2085_v39 = vadd.f32 0.18741608, %v2084_v36 }
0x13cb   :  { %v2097_v0 = vmul.f32 %v2096_v23, %v2077_v6  ;;  %v2133_v26 = vmul.f32 %v2132_v25, %v2117_v2  ;;  %v2122_v29 = vmul.f32 %v2121_v24, %v2117_v2 }
0x13cc   :  { %v2086_v21 = vmul.f32 %v2085_v39, %v2077_v6 }
0x13cd   :  { %v2098_v28 = vadd.f32 1.0, %v2097_v0  ;;  %v2134_v32 = vadd.f32 0.112945676, %v2133_v26  ;;  %v2123_v53 = vadd.f32 0.05243302, %v2122_v29 }
0x13ce   :  { %v2087_v49 = vadd.f32 1.1283791, %v2086_v21 }
0x13cf   :  { %5034 = vrcp.f32 %v2098_v28  ;;  %v2135_v33 = vmul.f32 %v2134_v32, %v2117_v2  ;;  %v2124_v54 = vmul.f32 %v2123_v53, %v2117_v2  ;;  %v2110_v35 = vand.u32 2147483648, %v2098_v28 }
0x13d0   :  { %v2108_v22 = vand.u32 2147483647, %v2098_v28  ;;  %vm2104_vm11 = vweird.f32 %v2098_v28  ;;  %v2088_v60 = vmul.f32 %v2087_v49, %v6033_v50 }
0x13d1   :  { %v2136_v14 = vadd.f32 0.4994258, %v2135_v33  ;;  %v2125_v46 = vadd.f32 0.18741608, %v2124_v54  ;;  %v2111_v56 = vor.u32 1.1754944e-38, %v2110_v35  ;;  %v4852_v54 = vld [vmem:[%s6577_s27 + $0x20] sm:$0xff] }
0x13d2   :  { %vm2109_vm13 = vcmp.eq.f32.partialorder %v2108_v22, 8.507059e+37 }
0x13d3   :  { %v2137_v37 = vmul.f32 %v2136_v14, %v2117_v2  ;;  %v2126_v57 = vmul.f32 %v2125_v46, %v2117_v2  ;;  %v4855_v14 = vld [vmem:[%s6554_s5 + $0x28] sm:$0xff] }
0x13d4   :  { %2373 = vmatpush.bf16.msra.mxu0 %v4855_v14 }
0x13d5   :  { %v5035_v38 = vpop.eup %5034  ;;  %v2138_v58 = vadd.f32 1.0, %v2137_v37  ;;  %v2127_v6 = vadd.f32 1.1283791, %v2126_v57  ;;  %v4857_v37 = vld [vmem:[%s6556_s7 + $0x28] sm:$0xff] }
0x13d6   :  { %v2100_v41 = vmul.f32 %v5035_v38, %v2098_v28  ;;  %vm2105_vm10 = vweird.f32 %v5035_v38  ;;  %2409 = vmatpush.bf16.msrb.mxu1 %v4857_v37 }
0x13d7   :  { %5036 = vrcp.f32 %v2138_v58  ;;  %vm2106_vm12 = vmor %vm2104_vm11, %vm2105_vm10  ;;  %v2150_v62 = vand.u32 2147483648, %v2138_v58  ;;  %v2148_v40 = vand.u32 2147483647, %v2138_v58  ;;  %vm2144_vm15 = vweird.f32 %v2138_v58 }
0x13d8   :  { %v2101_v42 = vsub.f32 1.0, %v2100_v41  ;;  %v2128_v8 = vmul.f32 %v2127_v6, %v6046_v12  ;;  %v4926_v6 = vld [vmem:[#allocation17 + $0x1] ss:$0 sm:$0xff] }
0x13d9   :  { %v2151_v3 = vor.u32 1.1754944e-38, %v2150_v62  ;;  %vm2149_vm2 = vcmp.eq.f32.partialorder %v2148_v40, 8.507059e+37  ;;  %v4927_v40 = vld [vmem:[#allocation19 + $0x1] ss:$0 sm:$0xff] }
0x13da   :  { %v2102_v43 = vmul.f32 %v5035_v38, %v2101_v42  ;;  %v4856_v42 = vld [vmem:[%s6556_s7 + $0x20] sm:$0xff] }
0x13db   :  { %2410 = vmatpush.bf16.msrb.mxu1 %v4856_v42 }
0x13dc   :  { %v2103_v47 = vadd.f32 %v5035_v38, %v2102_v43 }
0x13dd   :  { %v5037_v52 = vpop.eup %5036 }
0x13de   :  { %v2107_v55 = vsel %vm2106_vm12, %v5035_v38, %v2103_v47  ;;  %v2140_v51 = vmul.f32 %v5037_v52, %v2138_v58  ;;  %vm2145_vm14 = vweird.f32 %v5037_v52  ;;  %v4854_v58 = vld [vmem:[%s6554_s5 + $0x20] sm:$0xff] }
0x13df   :  { %v2112_v7 = vsel %vm2109_vm13, %v2111_v56, %v2107_v55  ;;  %vm2146_vm1 = vmor %vm2144_vm15, %vm2145_vm14  ;;  %2374 = vmatpush.bf16.msra.mxu0 %v4854_v58 }
0x13e0   :  { %v2141_v61 = vsub.f32 1.0, %v2140_v51  ;;  %v2113_v63 = vmul.f32 %v2112_v7, %v2088_v60 }
0x13e2   :  { %v2142_v1 = vmul.f32 %v5037_v52, %v2141_v61  ;;  %v4519_v5 = vclamps-f32 %v2113_v63, 1.0 }
0x13e4   :  { %v2143_v4 = vadd.f32 %v5037_v52, %v2142_v1  ;;  %v2156_v34 = vadd.f32 1.0, %v4519_v5 }
0x13e6   :  { %v2147_v2 = vsel %vm2146_vm1, %v5037_v52, %v2143_v4  ;;  %v2158_v18 = vmul.f32 %v2156_v34, %v2072_v13  ;;  %v4929_v34 = vld [vmem:[%s6557_s8 + $0x2] ss:$0 sm:$0xff] }
0x13e7   :  { %v2152_v11 = vsel %vm2149_vm2, %v2151_v3, %v2147_v2 }
0x13e8   :  { %v2153_v9 = vmul.f32 %v2152_v11, %v2128_v8 }
0x13ea   :  { %v4520_v50 = vclamps-f32 %v2153_v9, 1.0  ;;  %v4928_v9 = vld [vmem:[#allocation10 + $0x2] ss:$0 sm:$0xff] }
0x13ec   :  { %v2157_v16 = vadd.f32 1.0, %v4520_v50 }
0x13ee   :  { %v2159_v31 = vmul.f32 %v2157_v16, %v2073_v15 }
0x13f0   :  { %v2179_v19 = vpack.c.bf16 %v2159_v31, %v2158_v18  ;;  %v4930_v31 = vld [vmem:[#allocation8 + $0x2] ss:$0 sm:$0xff] }
0x13f2   :  { %2239 = vmatmul.bf16.vlgmr.msrb.gmra.mxu2 %v2179_v19 }
0x1475   :  { %v2240_v12 = vpop.f32.mrf.mxu2 }
0x1476   :  { %v2241_v23 = vadd.f32 %v4925_v20, %v2240_v12 }
0x1478   :  { %v2245_v24 = vadd.f32 %v2241_v23, %v6020_v44 }
0x147a   :  { %v2251_v25 = vsel %vm235_vm0, %v2245_v24, 0.0 }
0x147b   :  { %2252 = vadd.xlane.f32.xlu0 %v2251_v25 }
0x147d   :  { %v2242_v0 = vpop.f32.mrf.mxu2 }
0x147e   :  { %v2243_v48 = vadd.f32 %v4925_v20, %v2242_v0 }
0x1480   :  { %v2246_v59 = vadd.f32 %v2243_v48, %v6022_v45  ;;  %v4853_v45 = vld [vmem:[%s6577_s27 + $0x28] sm:$0xff] }
0x1481   :  { %2337 = vmatpush.bf16.msrb.mxu3 %v4853_v45 }
0x1482   :  { %v2254_v17 = vsel %vm235_vm0, %v2246_v59, 0.0 }
0x1483   :  { %2255 = vadd.xlane.f32.xlu0 %v2254_v17 }
0x1485   :  { %2338 = vmatpush.bf16.msrb.mxu3 %v4852_v54 }
0x14ee   :  { %v2253_v26 = vpop.xlane.xlu0 %2252 }
0x14ef   :  { %v2257_v27 = vmul.f32 %v2253_v26, %v5613_v10 }
0x14f1   :  { %v2259_v28 = vsub.f32 %v2245_v24, %v2257_v27 }
0x14f3   :  { %v2261_v29 = vmul.f32 %v2259_v28, %v2259_v28 }
0x14f5   :  { %v2263_v32 = vsel %vm235_vm0, %v2261_v29, 0.0 }
0x14f6   :  { %2264 = vadd.xlane.f32.xlu2 %v2263_v32  ;;  %v2256_v30 = vpop.xlane.xlu0 %2255 }
0x14f7   :  { %v2258_v44 = vmul.f32 %v2256_v30, %v5613_v10 }
0x14f9   :  { %v2260_v33 = vsub.f32 %v2246_v59, %v2258_v44 }
0x14fb   :  { %v2262_v36 = vmul.f32 %v2260_v33, %v2260_v33 }
0x14fd   :  { %v2266_v53 = vsel %vm235_vm0, %v2262_v36, 0.0 }
0x14fe   :  { %2267 = vadd.xlane.f32.xlu0 %v2266_v53 }
0x1569   :  { %v2265_v38 = vpop.xlane.xlu2 %2264 }
0x156a   :  { %v2269_v39 = vmul.f32 %v2265_v38, %v5613_v10 }
0x156c   :  { %v2271_v41 = vadd.f32 1e-12, %v2269_v39 }
0x156e   :  { %5038 = vrsqrt.f32 %v2271_v41  ;;  %vm2279_vm4 = vweird.f32 %v2271_v41 }
0x1571   :  { %v2268_v21 = vpop.xlane.xlu0 %2267 }
0x1572   :  { %v2270_v43 = vmul.f32 %v2268_v21, %v5613_v10 }
0x1574   :  { %v5039_v35 = vpop.eup %5038  ;;  %v2272_v46 = vadd.f32 1e-12, %v2270_v43 }
0x1575   :  { %v2274_v22 = vmul.f32 %v5039_v35, %v2271_v41  ;;  %vm2280_vm3 = vweird.f32 %v5039_v35 }
0x1576   :  { %5040 = vrsqrt.f32 %v2272_v46  ;;  %vm2281_vm5 = vmor %vm2279_vm4, %vm2280_vm3  ;;  %vm2289_vm7 = vweird.f32 %v2272_v46 }
0x1577   :  { %v2275_v47 = vmul.f32 %v5039_v35, %v2274_v22 }
0x1579   :  { %v2276_v49 = vmul.f32 0.5, %v2275_v47 }
0x157b   :  { %v2277_v52 = vsub.f32 1.5, %v2276_v49 }
0x157c   :  { %v5041_v55 = vpop.eup %5040 }
0x157d   :  { %v2278_v56 = vmul.f32 %v5039_v35, %v2277_v52  ;;  %v2284_v57 = vmul.f32 %v5041_v55, %v2272_v46  ;;  %vm2290_vm6 = vweird.f32 %v5041_v55 }
0x157e   :  { %vm2291_vm10 = vmor %vm2289_vm7, %vm2290_vm6 }
0x157f   :  { %v2285_v51 = vmul.f32 %v5041_v55, %v2284_v57  ;;  %v2282_v7 = vsel %vm2281_vm5, %v5039_v35, %v2278_v56 }
0x1580   :  { %v2293_v62 = vmul.f32 %v2282_v7, %v2259_v28 }
0x1581   :  { %v2286_v60 = vmul.f32 0.5, %v2285_v51 }
0x1582   :  { %v2298_v4 = vmul.f32 %v4926_v6, %v2293_v62 }
0x1583   :  { %v2287_v61 = vsub.f32 1.5, %v2286_v60 }
0x1584   :  { %v6100_v8 = vadd.f32 %v4927_v40, %v2298_v4 }
0x1585   :  { %v2288_v63 = vmul.f32 %v5041_v55, %v2287_v61 }
0x1587   :  { %v2292_v1 = vsel %vm2291_vm10, %v5041_v55, %v2288_v63 }
0x1588   :  { %v2294_v3 = vmul.f32 %v2292_v1, %v2260_v33 }
0x158a   :  { %v2299_v5 = vmul.f32 %v4926_v6, %v2294_v3 }
0x158c   :  { %v6102_v2 = vadd.f32 %v4927_v40, %v2299_v5 }
0x158e   :  { %v2312_v11 = vpack.c.bf16 %v6102_v2, %v6100_v8 }
0x1590   :  { %4582 = vmatmul.msk.bf16.vlgmr.msrb.gmra.mxu3 %vm235_vm0, %v2312_v11  ;;  %4595 = vmatmul.msk.bf16.vlgmr.msra.gmra.mxu0 %vm235_vm0, %v2312_v11 }
0x1591   :  { %4609 = vmatmul.msk.bf16.vlgmr.msrb.gmra.mxu1 %vm235_vm0, %v2312_v11 }
0x160d   :  { %v2376_v50 = vpop.f32.mrf.mxu0 }
0x160e   :  { %v2377_v13 = vadd.f32 %v4928_v9, %v2376_v50  ;;  %v2412_v15 = vpop.f32.mrf.mxu1 }
0x160f   :  { %v2413_v16 = vadd.f32 %v4929_v34, %v2412_v15 }
0x1610   :  { %v2421_v18 = vpack.c.bf16 %v2377_v13, %v2377_v13 }
0x1611   :  { %v6112_v19 = vpack.c.bf16 %v2413_v16, %v2413_v16 }
0x1612   :  { %v2434_v20 = vsel %vm415_vm8, %v2421_v18, 0  ;;  %v2538_v12 = vunpack.c.l.b16 %v2421_v18 }
0x1613   :  { %v2496_v23 = vsel %vm481_vm9, %v6112_v19, 0  ;;  %v2340_v24 = vpop.f32.mrf.mxu3  ;;  %2443 = vmatpush.bf16.xpose.msra.mxu3 %v2434_v20  ;;  %v2615_v4 = vunpack.c.l.b16 %v6112_v19 }
0x1614   :  { %v6117_v25 = vpack.c.b16 %v2538_v12, %v2538_v12  ;;  %v2341_v0 = vadd.f32 %v4930_v31, %v2340_v24  ;;  %2505 = vmatpush.bf16.msra.mxu1 %v2496_v23 }
0x1615   :  { %v2378_v48 = vpop.f32.mrf.mxu0  ;;  %v6149_v3 = vpack.c.b16 %v2615_v4, %v2615_v4 }
0x1616   :  { %v2417_v59 = vmul.f32 0.35355338, %v2341_v0  ;;  %v2379_v17 = vadd.f32 %v4928_v9, %v2378_v48  ;;  %v2414_v26 = vpop.f32.mrf.mxu1  ;;  %2540 = vrot.lane.b32.xlu2 %v6117_v25, %s5450_s11 }
0x1617   :  { %v2415_v27 = vadd.f32 %v4929_v34, %v2414_v26 }
0x1618   :  { %v2419_v28 = vpack.c.bf16 %v2417_v59, %v2417_v59  ;;  %v2422_v29 = vpack.c.bf16 %v2379_v17, %v2379_v17 }
0x1619   :  { %v6121_v32 = vpack.c.bf16 %v2415_v27, %v2415_v27 }
0x161a   :  { %v2533_v30 = vunpack.c.l.b16 %v2419_v28  ;;  %v2453_v44 = vsel %vm415_vm8, %v2422_v29, 0  ;;  %v2567_v33 = vunpack.c.l.b16 %v2422_v29  ;;  %4614 = vmatmul.msk.bf16.vlgmr.msra.gmra.mxu3 %vm415_vm8, %v2419_v28 }
0x161b   :  { %v2342_v36 = vpop.f32.mrf.mxu3  ;;  %2462 = vmatpush.bf16.xpose.msrb.mxu0 %v2453_v44  ;;  %v2515_v53 = vsel %vm481_vm9, %v6121_v32, 0  ;;  %v2639_v15 = vunpack.c.l.b16 %v6121_v32 }
0x161c   :  { %v6127_v45 = vpack.c.b16 %v2567_v33, %v2567_v33  ;;  %v2343_v14 = vadd.f32 %v4930_v31, %v2342_v36  ;;  %2524 = vmatpush.bf16.msra.mxu2 %v2515_v53  ;;  %v6129_v37 = vpack.c.b16 %v2533_v30, %v2533_v30 }
0x161d   :  { %v6158_v16 = vpack.c.b16 %v2639_v15, %v2639_v15 }
0x161e   :  { %v2418_v38 = vmul.f32 0.35355338, %v2343_v14  ;;  %2569 = vrot.lane.b32.xlu1 %v6127_v45, %s5450_s11  ;;  %2535 = vrot.lane.b32.xlu0 %v6129_v37, %s5450_s11 }
0x1620   :  { %v2420_v39 = vpack.c.bf16 %v2418_v38, %v2418_v38 }
0x1622   :  { %4615 = vmatmul.msk.bf16.vlgmr.msrb.gmra.mxu0 %vm415_vm8, %v2420_v39  ;;  %v2562_v41 = vunpack.c.l.b16 %v2420_v39 }
0x1624   :  { %v6136_v54 = vpack.c.b16 %v2562_v41, %v2562_v41 }
0x1626   :  { %2564 = vrot.lane.b32.xlu0 %v6136_v54, %s5450_s11 }
0x1670   :  { %v2541_v58 = vpop.permute.xlu2 %2540 }
0x1671   :  { %v2546_v42 = vsel %vm415_vm8, %v2541_v58, 0 }
0x1672   :  { %2555 = vmatpush.bf16.xpose.msrb.mxu3 %v2546_v42 }
0x1690   :  { %v2570_v21 = vpop.permute.xlu1 %2569  ;;  %v2536_v43 = vpop.permute.xlu0 %2535 }
0x1691   :  { %v2575_v35 = vsel %vm415_vm8, %v2570_v21, 0  ;;  %4618 = vmatmul.msk.bf16.vlgmr.msrb.gmra.mxu3 %vm415_vm8, %v2536_v43 }
0x1692   :  { %2584 = vmatpush.bf16.xpose.msra.mxu0 %v2575_v35 }
0x1698   :  { %v2565_v46 = vpop.permute.xlu0 %2564 }
0x1699   :  { %4619 = vmatmul.msk.bf16.vlgmr.msra.gmra.mxu0 %vm415_vm8, %v2565_v46 }
0x169d   :  { %v2445_v22 = vpop.f32.mrf.mxu3 }
0x169e   :  { %v2468_v47 = vsel %vm415_vm8, %v2445_v22, -inf }
0x169f   :  { %v2464_v49 = vpop.f32.mrf.mxu0  ;;  %2469 = vmax.xlane.f32.xlu2 %v2468_v47 }
0x16a0   :  { %v2471_v55 = vsel %vm415_vm8, %v2464_v49, -inf }
0x16a5   :  { %v2447_v52 = vpop.f32.mrf.mxu3 }
0x16a6   :  { %v4611_v52 = vld [vmem:[%s6558_s9 + $0x48] sm:$0xff] }
0x16a7   :  { %v2466_v56 = vpop.f32.mrf.mxu0  ;;  %2472 = vmax.xlane.f32.xlu2 %v2471_v55 }
0x1712   :  { %v2470_v57 = vpop.xlane.xlu2 %2469 }
0x1713   :  { %v2474_v51 = vsub.f32 %v2445_v22, %v2470_v57 }
0x1714   :  { %v2557_v7 = vpop.f32.mrf.mxu3 }
0x1715   :  { %v2476_v60 = vmul.f32 1.442695, %v2474_v51  ;;  %v2590_v61 = vsel %vm415_vm8, %v2557_v7, -inf }
0x1716   :  { %v2586_v6 = vpop.f32.mrf.mxu0  ;;  %2591 = vmax.xlane.f32.xlu1 %v2590_v61 }
0x1717   :  { %5042 = vpow2.f32 %v2476_v60  ;;  %v2593_v13 = vsel %vm415_vm8, %v2586_v6, -inf }
0x171a   :  { %v2473_v5 = vpop.xlane.xlu2 %2472 }
0x171b   :  { %v2475_v11 = vsub.f32 %v2464_v49, %v2473_v5 }
0x171c   :  { %v2559_v62 = vpop.f32.mrf.mxu3 }
0x171d   :  { %v5043_v63 = vpop.eup %5042  ;;  %v2478_v9 = vmul.f32 1.442695, %v2475_v11 }
0x171e   :  { %v2588_v1 = vpop.f32.mrf.mxu0  ;;  %v2480_v40 = vsel %vm415_vm8, %v5043_v63, 0.0 }
0x171f   :  { %2481 = vadd.xlane.f32.xlu0 %v2480_v40  ;;  %5044 = vpow2.f32 %v2478_v9 }
0x1725   :  { %v5045_v34 = vpop.eup %5044 }
0x1726   :  { %v2483_v50 = vsel %vm415_vm8, %v5045_v34, 0.0 }
0x172f   :  { %2617 = vrot.lane.b32.xlu1 %v6149_v3, %s5450_s11 }
0x1733   :  { %2706 = vrot.lane.b32.xlu0 %v6117_v25, %s5451_s10 }
0x1759   :  { %2484 = vadd.xlane.f32.xlu1 %v2483_v50 }
0x175d   :  { %2594 = vmax.xlane.f32.xlu0 %v2593_v13 }
0x1771   :  { %2641 = vrot.lane.b32.xlu0 %v6158_v16, %s5450_s11 }
0x1772   :  { %2729 = vrot.lane.b32.xlu1 %v6127_v45, %s5451_s10 }
0x1789   :  { %v2592_v18 = vpop.xlane.xlu1 %2591 }
0x178a   :  { %v2596_v31 = vsub.f32 %v2557_v7, %v2592_v18 }
0x178c   :  { %v2598_v19 = vmul.f32 1.442695, %v2596_v31 }
0x178e   :  { %5046 = vpow2.f32 %v2598_v19 }
0x1792   :  { %v2482_v20 = vpop.xlane.xlu0 %2481 }
0x1793   :  { %5048 = vrcp.f32 %v2482_v20 }
0x1794   :  { %v5047_v12 = vpop.eup %5046 }
0x1795   :  { %v2602_v23 = vsel %vm415_vm8, %v5047_v12, 0.0 }
0x1796   :  { %2603 = vadd.xlane.f32.xlu2 %v2602_v23 }
0x1799   :  { %v5049_v24 = vpop.eup %5048 }
0x179a   :  { %v2488_v0 = vmul.f32 %v5049_v24, %v5043_v63 }
0x179c   :  { %v2490_v48 = vpack.c.bf16 %v2488_v0, %v2488_v0 }
0x179e   :  { %4616 = vmatmul.msk.bf16.vlgmr.msra.gmra.mxu1 %vm415_vm8, %v2490_v48 }
0x17a1   :  { %v2618_v59 = vpop.permute.xlu1 %2617 }
0x17a2   :  { %v2623_v17 = vsel %vm481_vm9, %v2618_v59, 0 }
0x17a3   :  { %2632 = vmatpush.bf16.msrb.mxu1 %v2623_v17 }
0x17a5   :  { %v2707_v26 = vpop.permute.xlu0 %2706 }
0x17a6   :  { %v2712_v27 = vsel %vm415_vm8, %v2707_v26, 0 }
0x17a7   :  { %2721 = vmatpush.bf16.xpose.msra.mxu1 %v2712_v27 }
0x17ae   :  { %2704 = vrot.lane.b32.xlu2 %v6129_v37, %s5451_s10 }
0x17cc   :  { %v2485_v28 = vpop.xlane.xlu1 %2484 }
0x17cd   :  { %5050 = vrcp.f32 %v2485_v28 }
0x17d0   :  { %v2595_v29 = vpop.xlane.xlu0 %2594 }
0x17d1   :  { %v2597_v32 = vsub.f32 %v2586_v6, %v2595_v29 }
0x17d3   :  { %v5051_v30 = vpop.eup %5050  ;;  %v2600_v44 = vmul.f32 1.442695, %v2597_v32 }
0x17d4   :  { %v2489_v33 = vmul.f32 %v5051_v30, %v5045_v34 }
0x17d5   :  { %5052 = vpow2.f32 %v2600_v44 }
0x17d6   :  { %v2491_v36 = vpack.c.bf16 %v2489_v33, %v2489_v33 }
0x17d8   :  { %4617 = vmatmul.msk.bf16.vlgmr.msra.gmra.mxu2 %vm415_vm8, %v2491_v36 }
0x17db   :  { %v5053_v53 = vpop.eup %5052 }
0x17dc   :  { %v2605_v14 = vsel %vm415_vm8, %v5053_v53, 0.0 }
0x17dd   :  { %2606 = vadd.xlane.f32.xlu2 %v2605_v14 }
0x17e3   :  { %v2642_v38 = vpop.permute.xlu0 %2641 }
0x17e4   :  { %v2647_v39 = vsel %vm481_vm9, %v2642_v38, 0  ;;  %v2730_v41 = vpop.permute.xlu1 %2729 }
0x17e5   :  { %v2735_v58 = vsel %vm415_vm8, %v2730_v41, 0  ;;  %2656 = vmatpush.bf16.msrb.mxu2 %v2647_v39 }
0x17e9   :  { %2744 = vmatpush.bf16.xpose.msra.mxu2 %v2735_v58 }
0x17f5   :  { %2727 = vrot.lane.b32.xlu2 %v6136_v54, %s5451_s10 }
0x17fd   :  { %2774 = vrot.lane.b32.xlu2 %v6149_v3, %s5451_s10 }
0x1805   :  { %2842 = vrot.lane.b32.xlu2 %v6117_v25, %s5452_s25  ;;  %v4610_v25 = vld [vmem:[%s6558_s9 + $0x40] sm:$0xff] }
0x1806   :  { %v2531_v49 = vpack.c.bf16 %v4610_v25, %v4610_v25 }
0x1809   :  { %v2604_v42 = vpop.xlane.xlu2 %2603 }
0x180a   :  { %5054 = vrcp.f32 %v2604_v42 }
0x180d   :  { %2865 = vrot.lane.b32.xlu2 %v6127_v45, %s5452_s25  ;;  %v2688_v45 = vsel %vm481_vm9, %v2531_v49, 0 }
0x180e   :  { %2697 = vmatpush.bf16.msrb.mxu0 %v2688_v45 }
0x1810   :  { %v5055_v21 = vpop.eup %5054 }
0x1811   :  { %v2610_v43 = vmul.f32 %v5055_v21, %v5047_v12  ;;  %v2705_v47 = vpop.permute.xlu2 %2704 }
0x1813   :  { %v2612_v35 = vpack.c.bf16 %v2610_v43, %v2610_v43 }
0x1815   :  { %2840 = vrot.lane.b32.xlu2 %v6129_v37, %s5452_s25  ;;  %4620 = vmatmul.msk.bf16.vlgmr.msrb.gmra.mxu1 %vm415_vm8, %v2612_v35  ;;  %v2663_v37 = vpack.c.bf16 %v4611_v52, %v4611_v52 }
0x1817   :  { %v2668_v55 = vsel %vm481_vm9, %v2663_v37, 0 }
0x1818   :  { %2677 = vmatpush.bf16.msra.mxu3 %v2668_v55 }
0x181b   :  { %v2507_v46 = vpop.f32.mrf.mxu1 }
0x1823   :  { %v2509_v22 = vpop.f32.mrf.mxu1 }
0x1825   :  { %4624 = vmatmul.msk.bf16.vlgmr.msra.gmra.mxu1 %vm415_vm8, %v2705_v47 }
0x1850   :  { %v2607_v56 = vpop.xlane.xlu2 %2606 }
0x1851   :  { %5056 = vrcp.f32 %v2607_v56 }
0x1857   :  { %v5057_v57 = vpop.eup %5056 }
0x1858   :  { %v2611_v51 = vmul.f32 %v5057_v57, %v5053_v53  ;;  %v2728_v7 = vpop.permute.xlu2 %2727 }
0x185a   :  { %v2613_v60 = vpack.c.bf16 %v2611_v51, %v2611_v51 }
0x185b   :  { %v2526_v61 = vpop.f32.mrf.mxu2 }
0x185c   :  { %v2530_v6 = vpack.c.bf16 %v2526_v61, %v2507_v46  ;;  %4621 = vmatmul.msk.bf16.vlgmr.msrb.gmra.mxu2 %vm415_vm8, %v2613_v60 }
0x185e   :  { %4623 = vmatmul.msk.bf16.vlgmr.msrb.gmra.mxu0 %vm415_vm8, %v2530_v6 }
0x1860   :  { %v2775_v62 = vpop.permute.xlu2 %2774 }
0x1861   :  { %v2780_v63 = vsel %vm481_vm9, %v2775_v62, 0 }
0x1862   :  { %2789 = vmatpush.bf16.msrb.mxu3 %v2780_v63  ;;  %v4612_v63 = vld [vmem:[%s6558_s9 + $0x50] sm:$0xff] }
0x1863   :  { %v2528_v1 = vpop.f32.mrf.mxu2 }
0x1864   :  { %v2817_v1 = vpack.c.bf16 %v4612_v63, %v4612_v63 }
0x1868   :  { %v2843_v40 = vpop.permute.xlu2 %2842 }
0x1869   :  { %v2848_v4 = vsel %vm415_vm8, %v2843_v40, 0  ;;  %v2822_v40 = vsel %vm481_vm9, %v2817_v1, 0 }
0x186a   :  { %2857 = vmatpush.bf16.xpose.msrb.mxu2 %v2848_v4  ;;  %2831 = vmatpush.bf16.msrb.mxu1 %v2822_v40 }
0x186c   :  { %4625 = vmatmul.msk.bf16.vlgmr.msra.gmra.mxu2 %vm415_vm8, %v2728_v7 }
0x1870   :  { %v2866_v5 = vpop.permute.xlu2 %2865 }
0x1871   :  { %v2871_v19 = vsel %vm415_vm8, %v2866_v5, 0 }
0x1878   :  { %v2841_v11 = vpop.permute.xlu2 %2840 }
0x187c   :  { %4629 = vmatmul.msk.bf16.vlgmr.msrb.gmra.mxu2 %vm415_vm8, %v2841_v11 }
0x1892   :  { %v2634_v9 = vpop.f32.mrf.mxu1 }
0x189a   :  { %v2636_v34 = vpop.f32.mrf.mxu1 }
0x18a2   :  { %v2723_v50 = vpop.f32.mrf.mxu1 }
0x18a3   :  { %v2750_v13 = vsel %vm415_vm8, %v2723_v50, -inf }
0x18a4   :  { %2751 = vmax.xlane.f32.xlu0 %v2750_v13 }
0x18aa   :  { %v2725_v15 = vpop.f32.mrf.mxu1 }
0x18b8   :  { %2863 = vrot.lane.b32.xlu0 %v6136_v54, %s5452_s25 }
0x18db   :  { %v2699_v4 = vpop.f32.mrf.mxu0 }
0x18df   :  { %v2658_v18 = vpop.f32.mrf.mxu2 }
0x18e0   :  { %v2662_v31 = vpack.c.bf16 %v2658_v18, %v2634_v9 }
0x18e2   :  { %4622 = vmatmul.msk.bf16.vlgmr.msra.gmra.mxu3 %vm415_vm8, %v2662_v31 }
0x18e3   :  { %2880 = vmatpush.bf16.xpose.msra.mxu3 %v2871_v19  ;;  %v2701_v5 = vpop.f32.mrf.mxu0 }
0x18e7   :  { %v2660_v20 = vpop.f32.mrf.mxu2 }
0x18ef   :  { %v2746_v12 = vpop.f32.mrf.mxu2 }
0x18f0   :  { %v2753_v23 = vsel %vm415_vm8, %v2746_v12, -inf }
0x18f1   :  { %2754 = vmax.xlane.f32.xlu2 %v2753_v23 }
0x18f7   :  { %v2748_v24 = vpop.f32.mrf.mxu2 }
0x18ff   :  { %v2859_v0 = vpop.f32.mrf.mxu2 }
0x1900   :  { %v2886_v48 = vsel %vm415_vm8, %v2859_v0, -inf }
0x1901   :  { %2887 = vmax.xlane.f32.xlu0 %v2886_v48 }
0x1907   :  { %v2861_v59 = vpop.f32.mrf.mxu2 }
0x1915   :  { %2910 = vrot.lane.b32.xlu0 %v6149_v3, %s5452_s25 }
0x1917   :  { %v2752_v54 = vpop.xlane.xlu0 %2751 }
0x1918   :  { %v2756_v17 = vsub.f32 %v2723_v50, %v2752_v54 }
0x191a   :  { %v2758_v26 = vmul.f32 1.442695, %v2756_v17 }
0x191c   :  { %5058 = vpow2.f32 %v2758_v26 }
0x1922   :  { %v5059_v27 = vpop.eup %5058 }
0x1923   :  { %v2762_v28 = vsel %vm415_vm8, %v5059_v27, 0.0 }
0x1924   :  { %2763 = vadd.xlane.f32.xlu1 %v2762_v28 }
0x192a   :  { %v2864_v44 = vpop.permute.xlu0 %2863 }
0x1964   :  { %v2755_v29 = vpop.xlane.xlu2 %2754 }
0x1965   :  { %v2757_v32 = vsub.f32 %v2746_v12, %v2755_v29  ;;  %v2679_v57 = vpop.f32.mrf.mxu3 }
0x1966   :  { %v2700_v12 = vadd.f32 %v2699_v4, %v2679_v57 }
0x1967   :  { %v2760_v30 = vmul.f32 1.442695, %v2757_v32 }
0x1969   :  { %5060 = vpow2.f32 %v2760_v30 }
0x196d   :  { %v2681_v51 = vpop.f32.mrf.mxu3 }
0x196f   :  { %v5061_v33 = vpop.eup %5060 }
0x1970   :  { %v2765_v36 = vsel %vm415_vm8, %v5061_v33, 0.0 }
0x1971   :  { %2766 = vadd.xlane.f32.xlu1 %v2765_v36 }
0x1974   :  { %v2888_v53 = vpop.xlane.xlu0 %2887 }
0x1975   :  { %v2892_v14 = vsub.f32 %v2859_v0, %v2888_v53 }
0x1977   :  { %v2894_v3 = vmul.f32 1.442695, %v2892_v14 }
0x1979   :  { %5062 = vpow2.f32 %v2894_v3  ;;  %v2702_v3 = vadd.f32 %v2701_v5, %v2681_v51 }
0x197f   :  { %v5063_v38 = vpop.eup %5062 }
0x1980   :  { %v2898_v39 = vsel %vm415_vm8, %v5063_v38, 0.0 }
0x1981   :  { %2899 = vadd.xlane.f32.xlu2 %v2898_v39 }
0x1987   :  { %v2911_v46 = vpop.permute.xlu0 %2910 }
0x1988   :  { %v2916_v49 = vsel %vm481_vm9, %v2911_v46, 0 }
0x198a   :  { %2795 = vrot.lane.b32.xlu1 %v6158_v16, %s5451_s10 }
0x1997   :  { %v2764_v41 = vpop.xlane.xlu1 %2763 }
0x1998   :  { %5064 = vrcp.f32 %v2764_v41 }
0x199e   :  { %v5065_v58 = vpop.eup %5064 }
0x199f   :  { %v2770_v42 = vmul.f32 %v5065_v58, %v5059_v27  ;;  %v4613_v27 = vld [vmem:[%s6558_s9 + $0x58] sm:$0xff] }
0x19a0   :  { %v2953_v28 = vpack.c.bf16 %v4613_v27, %v4613_v27 }
0x19a1   :  { %v2772_v21 = vpack.c.bf16 %v2770_v42, %v2770_v42 }
0x19a3   :  { %4626 = vmatmul.msk.bf16.vlgmr.msrb.gmra.mxu3 %vm415_vm8, %v2772_v21 }
0x19b3   :  { %4630 = vmatmul.msk.bf16.vlgmr.msra.gmra.mxu3 %vm415_vm8, %v2864_v44 }
0x19e4   :  { %v2767_v43 = vpop.xlane.xlu1 %2766 }
0x19e5   :  { %5066 = vrcp.f32 %v2767_v43 }
0x19eb   :  { %v5067_v35 = vpop.eup %5066 }
0x19ec   :  { %v2771_v22 = vmul.f32 %v5067_v35, %v5061_v33  ;;  %v4931_v33 = vld [vmem:[#allocation11 + $0x2] ss:$0 sm:$0xff] }
0x19ee   :  { %v2773_v45 = vpack.c.bf16 %v2771_v22, %v2771_v22 }
0x19f4   :  { %v2900_v52 = vpop.xlane.xlu2 %2899 }
0x19f5   :  { %5068 = vrcp.f32 %v2900_v52 }
0x19fb   :  { %v5069_v37 = vpop.eup %5068 }
0x19fc   :  { %v2796_v47 = vpop.permute.xlu1 %2795  ;;  %v2906_v55 = vmul.f32 %v5069_v37, %v5063_v38 }
0x19fd   :  { %v2801_v25 = vsel %vm481_vm9, %v2796_v47, 0 }
0x19fe   :  { %2810 = vmatpush.bf16.msra.mxu0 %v2801_v25  ;;  %v2908_v56 = vpack.c.bf16 %v2906_v55, %v2906_v55 }
0x1a01   :  { %4627 = vmatmul.msk.bf16.vlgmr.msra.gmra.mxu0 %vm415_vm8, %v2773_v45 }
0x1a02   :  { %2925 = vmatpush.bf16.msrb.mxu0 %v2916_v49 }
0x1a11   :  { %4631 = vmatmul.msk.bf16.vlgmr.msrb.gmra.mxu0 %vm415_vm8, %v2908_v56 }
0x1a26   :  { %v2791_v7 = vpop.f32.mrf.mxu3 }
0x1a2e   :  { %v2793_v60 = vpop.f32.mrf.mxu3 }
0x1a36   :  { %v2882_v61 = vpop.f32.mrf.mxu3 }
0x1a37   :  { %v2889_v6 = vsel %vm415_vm8, %v2882_v61, -inf }
0x1a38   :  { %2890 = vmax.xlane.f32.xlu1 %v2889_v6 }
0x1a3e   :  { %v2884_v62 = vpop.f32.mrf.mxu3 }
0x1a7e   :  { %v2812_v11 = vpop.f32.mrf.mxu0 }
0x1a7f   :  { %v2816_v9 = vpack.c.bf16 %v2812_v11, %v2791_v7  ;;  %v4858_v7 = vld [vmem:[#allocation14 + $0x20] sm:$0xff] }
0x1a81   :  { %4628 = vmatmul.msk.bf16.vlgmr.msrb.gmra.mxu1 %vm415_vm8, %v2816_v9 }
0x1a86   :  { %v2814_v34 = vpop.f32.mrf.mxu0 }
0x1a8e   :  { %v2927_v50 = vpop.f32.mrf.mxu0 }
0x1a96   :  { %v2929_v13 = vpop.f32.mrf.mxu0 }
0x1aab   :  { %v2891_v15 = vpop.xlane.xlu1 %2890 }
0x1aac   :  { %v2893_v18 = vsub.f32 %v2882_v61, %v2891_v15 }
0x1aae   :  { %v2896_v31 = vmul.f32 1.442695, %v2893_v18  ;;  %v4932_v18 = vld [vmem:[#allocation13 + $0x2] ss:$0 sm:$0xff] }
0x1ab0   :  { %5070 = vpow2.f32 %v2896_v31 }
0x1ab6   :  { %v5071_v19 = vpop.eup %5070 }
0x1ab7   :  { %v2901_v20 = vsel %vm415_vm8, %v5071_v19, 0.0 }
0x1ab8   :  { %2902 = vadd.xlane.f32.xlu2 %v2901_v20 }
0x1ad0   :  { %2931 = vrot.lane.b32.xlu2 %v6158_v16, %s5452_s25  ;;  %v2958_v16 = vsel %vm481_vm9, %v2953_v28, 0  ;;  %v4867_v28 = vld [vmem:[%s6564_s15 + $0xb8] sm:$0xff] }
0x1ad1   :  { %2967 = vmatpush.bf16.msra.mxu2 %v2958_v16  ;;  %3242 = vmatpush.bf16.msra.mxu0 %v4867_v28 }
0x1afe   :  { %v2833_v23 = vpop.f32.mrf.mxu1 }
0x1aff   :  { %v2838_v24 = vadd.f32 %v2833_v23, %v2700_v12  ;;  %v4933_v12 = vld [vmem:[%s6561_s12 + $0x2] ss:$0 sm:$0xff] }
0x1b06   :  { %v2835_v29 = vpop.f32.mrf.mxu1 }
0x1b07   :  { %v2839_v39 = vadd.f32 %v2835_v29, %v2702_v3 }
0x1b2b   :  { %v2903_v0 = vpop.xlane.xlu2 %2902 }
0x1b2c   :  { %5072 = vrcp.f32 %v2903_v0 }
0x1b32   :  { %v5073_v48 = vpop.eup %5072 }
0x1b33   :  { %v2907_v59 = vmul.f32 %v5073_v48, %v5071_v19  ;;  %v2932_v54 = vpop.permute.xlu2 %2931 }
0x1b34   :  { %v2937_v17 = vsel %vm481_vm9, %v2932_v54, 0 }
0x1b35   :  { %v2909_v26 = vpack.c.bf16 %v2907_v59, %v2907_v59  ;;  %2946 = vmatpush.bf16.msra.mxu1 %v2937_v17  ;;  %v4934_v17 = vld [vmem:[#allocation16 + $0x2] ss:$0 sm:$0xff] }
0x1b38   :  { %4632 = vmatmul.msk.bf16.vlgmr.msra.gmra.mxu1 %vm415_vm8, %v2909_v26 }
0x1bb5   :  { %v2948_v32 = vpop.f32.mrf.mxu1 }
0x1bb6   :  { %v2952_v30 = vpack.c.bf16 %v2948_v32, %v2927_v50  ;;  %v4866_v32 = vld [vmem:[%s6564_s15 + $0xb0] sm:$0xff] }
0x1bb7   :  { %3243 = vmatpush.bf16.msra.mxu0 %v4866_v32 }
0x1bb8   :  { %4633 = vmatmul.msk.bf16.vlgmr.msra.gmra.mxu2 %vm415_vm8, %v2952_v30 }
0x1bbd   :  { %v2950_v44 = vpop.f32.mrf.mxu1 }
0x1c3b   :  { %v2969_v36 = vpop.f32.mrf.mxu2 }
0x1c3c   :  { %v2974_v53 = vadd.f32 %v2969_v36, %v2838_v24 }
0x1c3e   :  { %v2981_v14 = vadd.f32 %v4931_v33, %v2974_v53 }
0x1c40   :  { %v2983_v38 = vadd.f32 %v2981_v14, %v6100_v8  ;;  %v4865_v14 = vld [vmem:[%s6564_s15 + $0xa8] sm:$0xff] }
0x1c41   :  { %3244 = vmatpush.bf16.msra.mxu0 %v4865_v14 }
0x1c42   :  { %v2989_v41 = vsel %vm235_vm0, %v2983_v38, 0.0 }
0x1c43   :  { %2990 = vadd.xlane.f32.xlu0 %v2989_v41  ;;  %v2971_v58 = vpop.f32.mrf.mxu2 }
0x1c44   :  { %v2975_v42 = vadd.f32 %v2971_v58, %v2839_v39  ;;  %v4864_v58 = vld [vmem:[%s6564_s15 + $0xa0] sm:$0xff] }
0x1c45   :  { %3245 = vmatpush.bf16.msra.mxu0 %v4864_v58 }
0x1c46   :  { %v2982_v21 = vadd.f32 %v4931_v33, %v2975_v42 }
0x1c48   :  { %v2984_v43 = vadd.f32 %v2982_v21, %v6102_v2  ;;  %v4859_v2 = vld [vmem:[#allocation14 + $0x28] sm:$0xff] }
0x1c49   :  { %3075 = vmatpush.bf16.msrb.mxu3 %v4859_v2 }
0x1c4a   :  { %v2992_v35 = vsel %vm235_vm0, %v2984_v43, 0.0 }
0x1c4b   :  { %2993 = vadd.xlane.f32.xlu1 %v2992_v35 }
0x1c4d   :  { %3076 = vmatpush.bf16.msrb.mxu3 %v4858_v7 }
0x1cb6   :  { %v2991_v46 = vpop.xlane.xlu0 %2990 }
0x1cb7   :  { %v2995_v22 = vmul.f32 %v2991_v46, %v5613_v10 }
0x1cb9   :  { %v2997_v47 = vsub.f32 %v2983_v38, %v2995_v22  ;;  %v4863_v22 = vld [vmem:[%s6564_s15 + $0x98] sm:$0xff] }
0x1cba   :  { %3246 = vmatpush.bf16.msra.mxu0 %v4863_v22 }
0x1cbb   :  { %v2999_v25 = vmul.f32 %v2997_v47, %v2997_v47 }
0x1cbd   :  { %v3001_v49 = vsel %vm235_vm0, %v2999_v25, 0.0 }
0x1cbe   :  { %3002 = vadd.xlane.f32.xlu2 %v3001_v49  ;;  %v2994_v8 = vpop.xlane.xlu1 %2993 }
0x1cbf   :  { %v2996_v45 = vmul.f32 %v2994_v8, %v5613_v10 }
0x1cc1   :  { %v2998_v52 = vsub.f32 %v2984_v43, %v2996_v45 }
0x1cc3   :  { %v3000_v37 = vmul.f32 %v2998_v52, %v2998_v52 }
0x1cc5   :  { %v3004_v55 = vsel %vm235_vm0, %v3000_v37, 0.0 }
0x1cc6   :  { %3005 = vadd.xlane.f32.xlu1 %v3004_v55  ;;  %v4862_v55 = vld [vmem:[%s6564_s15 + $0x90] sm:$0xff] }
0x1cc7   :  { %3247 = vmatpush.bf16.msra.mxu0 %v4862_v55 }
0x1d31   :  { %v3003_v56 = vpop.xlane.xlu2 %3002 }
0x1d32   :  { %v3007_v57 = vmul.f32 %v3003_v56, %v5613_v10 }
0x1d34   :  { %v3009_v51 = vadd.f32 1e-12, %v3007_v57 }
0x1d36   :  { %5074 = vrsqrt.f32 %v3009_v51  ;;  %vm3017_vm12 = vweird.f32 %v3009_v51 }
0x1d39   :  { %v3006_v60 = vpop.xlane.xlu1 %3005 }
0x1d3a   :  { %v3008_v61 = vmul.f32 %v3006_v60, %v5613_v10 }
0x1d3c   :  { %v5075_v6 = vpop.eup %5074  ;;  %v3010_v62 = vadd.f32 1e-12, %v3008_v61 }
0x1d3d   :  { %v3012_v63 = vmul.f32 %v5075_v6, %v3009_v51  ;;  %vm3018_vm11 = vweird.f32 %v5075_v6 }
0x1d3e   :  { %5076 = vrsqrt.f32 %v3010_v62  ;;  %vm3019_vm13 = vmor %vm3017_vm12, %vm3018_vm11  ;;  %vm3027_vm15 = vweird.f32 %v3010_v62 }
0x1d3f   :  { %v3013_v1 = vmul.f32 %v5075_v6, %v3012_v63 }
0x1d41   :  { %v3014_v40 = vmul.f32 0.5, %v3013_v1 }
0x1d43   :  { %v3015_v4 = vsub.f32 1.5, %v3014_v40 }
0x1d44   :  { %v5077_v5 = vpop.eup %5076 }
0x1d45   :  { %v3016_v11 = vmul.f32 %v5075_v6, %v3015_v4  ;;  %v3022_v9 = vmul.f32 %v5077_v5, %v3010_v62  ;;  %vm3028_vm14 = vweird.f32 %v5077_v5 }
0x1d46   :  { %vm3029_vm1 = vmor %vm3027_vm15, %vm3028_vm14 }
0x1d47   :  { %v3023_v34 = vmul.f32 %v5077_v5, %v3022_v9  ;;  %v3020_v50 = vsel %vm3019_vm13, %v5075_v6, %v3016_v11  ;;  %v4861_v6 = vld [vmem:[%s6564_s15 + $0x88] sm:$0xff] }
0x1d48   :  { %v3031_v31 = vmul.f32 %v3020_v50, %v2997_v47  ;;  %3248 = vmatpush.bf16.msra.mxu0 %v4861_v6 }
0x1d49   :  { %v3024_v13 = vmul.f32 0.5, %v3023_v34 }
0x1d4a   :  { %v3036_v23 = vmul.f32 %v4932_v18, %v3031_v31 }
0x1d4b   :  { %v3025_v15 = vsub.f32 1.5, %v3024_v13 }
0x1d4c   :  { %v6249_v48 = vadd.f32 %v4933_v12, %v3036_v23 }
0x1d4d   :  { %v3026_v19 = vmul.f32 %v5077_v5, %v3025_v15 }
0x1d4f   :  { %v3030_v20 = vsel %vm3029_vm1, %v5077_v5, %v3026_v19  ;;  %v4860_v5 = vld [vmem:[%s6564_s15 + $0x80] sm:$0xff] }
0x1d50   :  { %v3032_v24 = vmul.f32 %v3030_v20, %v2998_v52  ;;  %3249 = vmatpush.bf16.msra.mxu0 %v4860_v5 }
0x1d52   :  { %v3037_v0 = vmul.f32 %v4932_v18, %v3032_v24 }
0x1d54   :  { %v6251_v59 = vadd.f32 %v4933_v12, %v3037_v0 }
0x1d56   :  { %v3050_v54 = vpack.c.bf16 %v6251_v59, %v6249_v48 }
0x1d58   :  { %4643 = vmatmul.msk.bf16.vlgmr.msrb.gmra.mxu3 %vm235_vm0, %v3050_v54 }
0x1ddb   :  { %v3078_v26 = vpop.f32.mrf.mxu3 }
0x1ddc   :  { %v6256_v27 = vadd.f32 %v4934_v17, %v3078_v26 }
0x1dde   :  { %v6262_v16 = vmul.f32 0.70710677, %v6256_v27 }
0x1de0   :  { %v3087_v29 = vmul.f32 %v6262_v16, %v6262_v16 }
0x1de2   :  { %v3088_v30 = vmin.f32 %v3087_v29, 16.0 }
0x1de3   :  { %v3080_v44 = vpop.f32.mrf.mxu3 }
0x1de4   :  { %v3089_v33 = vmul.f32 2.1237322e-06, %v3088_v30  ;;  %v3100_v36 = vmul.f32 3.8918573e-05, %v3088_v30  ;;  %v6269_v53 = vadd.f32 %v4934_v17, %v3080_v44 }
0x1de6   :  { %v3090_v3 = vadd.f32 0.00028619796, %v3089_v33  ;;  %v3101_v38 = vadd.f32 0.001143296, %v3100_v36  ;;  %v6275_v39 = vmul.f32 0.70710677, %v6269_v53 }
0x1de8   :  { %v3102_v41 = vmul.f32 %v3101_v38, %v3088_v30  ;;  %v3127_v42 = vmul.f32 %v6275_v39, %v6275_v39  ;;  %v3091_v21 = vmul.f32 %v3090_v3, %v3088_v30 }
0x1dea   :  { %v3103_v43 = vadd.f32 0.014752088, %v3102_v41  ;;  %v3128_v35 = vmin.f32 %v3127_v42, 16.0  ;;  %v3092_v49 = vadd.f32 0.0036580483, %v3091_v21 }
0x1dec   :  { %v3104_v46 = vmul.f32 %v3103_v43, %v3088_v30  ;;  %v3129_v47 = vmul.f32 2.1237322e-06, %v3128_v35  ;;  %v3140_v25 = vmul.f32 3.8918573e-05, %v3128_v35  ;;  %v3093_v57 = vmul.f32 %v3092_v49, %v3088_v30 }
0x1dee   :  { %v3105_v8 = vadd.f32 0.112945676, %v3104_v46  ;;  %v3130_v45 = vadd.f32 0.00028619796, %v3129_v47  ;;  %v3141_v52 = vadd.f32 0.001143296, %v3140_v25 }
0x1def   :  { %v3094_v63 = vadd.f32 0.05243302, %v3093_v57  ;;  %v4935_v57 = vld [vmem:[%s6565_s16 + $0x2] ss:$0 sm:$0xff] }
0x1df0   :  { %v3106_v37 = vmul.f32 %v3105_v8, %v3088_v30  ;;  %v3131_v2 = vmul.f32 %v3130_v45, %v3128_v35  ;;  %v3142_v56 = vmul.f32 %v3141_v52, %v3128_v35  ;;  %v3083_v45 = vmul.f32 0.5, %v6256_v27 }
0x1df1   :  { %v3095_v9 = vmul.f32 %v3094_v63, %v3088_v30  ;;  %v3084_v52 = vmul.f32 0.5, %v6269_v53 }
0x1df2   :  { %v3107_v51 = vadd.f32 0.4994258, %v3106_v37  ;;  %v3132_v7 = vadd.f32 0.0036580483, %v3131_v2  ;;  %v3143_v60 = vadd.f32 0.014752088, %v3142_v56 }
0x1df3   :  { %v3096_v18 = vadd.f32 0.18741608, %v3095_v9 }
0x1df4   :  { %v3108_v61 = vmul.f32 %v3107_v51, %v3088_v30  ;;  %v3144_v62 = vmul.f32 %v3143_v60, %v3128_v35  ;;  %v3133_v40 = vmul.f32 %v3132_v7, %v3128_v35 }
0x1df5   :  { %v3097_v23 = vmul.f32 %v3096_v18, %v3088_v30 }
0x1df6   :  { %v3109_v1 = vadd.f32 1.0, %v3108_v61  ;;  %v3145_v4 = vadd.f32 0.112945676, %v3144_v62  ;;  %v3134_v34 = vadd.f32 0.05243302, %v3133_v40 }
0x1df7   :  { %v3098_v28 = vadd.f32 1.1283791, %v3097_v23 }
0x1df8   :  { %5078 = vrcp.f32 %v3109_v1  ;;  %v3146_v11 = vmul.f32 %v3145_v4, %v3128_v35  ;;  %v3135_v19 = vmul.f32 %v3134_v34, %v3128_v35  ;;  %v3121_v0 = vand.u32 2147483648, %v3109_v1 }
0x1df9   :  { %v3119_v17 = vand.u32 2147483647, %v3109_v1  ;;  %vm3115_vm3 = vweird.f32 %v3109_v1  ;;  %v3099_v3 = vmul.f32 %v3098_v28, %v6262_v16 }
0x1dfa   :  { %v3147_v50 = vadd.f32 0.4994258, %v3146_v11  ;;  %v3136_v54 = vadd.f32 0.18741608, %v3135_v19  ;;  %v3122_v44 = vor.u32 1.1754944e-38, %v3121_v0  ;;  %v4868_v19 = vld [vmem:[%s6577_s27 + $0x30] sm:$0xff] }
0x1dfb   :  { %vm3120_vm5 = vcmp.eq.f32.partialorder %v3119_v17, 8.507059e+37 }
0x1dfc   :  { %v3148_v13 = vmul.f32 %v3147_v50, %v3128_v35  ;;  %v3137_v33 = vmul.f32 %v3136_v54, %v3128_v35  ;;  %v4871_v50 = vld [vmem:[%s6554_s5 + $0x38] sm:$0xff] }
0x1dfd   :  { %3384 = vmatpush.bf16.msrb.mxu2 %v4871_v50 }
0x1dfe   :  { %v5079_v15 = vpop.eup %5078  ;;  %v3149_v20 = vadd.f32 1.0, %v3148_v13  ;;  %v3138_v30 = vadd.f32 1.1283791, %v3137_v33  ;;  %v4873_v13 = vld [vmem:[%s6556_s7 + $0x38] sm:$0xff] }
0x1dff   :  { %v3111_v31 = vmul.f32 %v5079_v15, %v3109_v1  ;;  %vm3116_vm2 = vweird.f32 %v5079_v15  ;;  %3420 = vmatpush.bf16.msra.mxu3 %v4873_v13 }
0x1e00   :  { %5080 = vrcp.f32 %v3149_v20  ;;  %vm3117_vm4 = vmor %vm3115_vm3, %vm3116_vm2  ;;  %v3161_v41 = vand.u32 2147483648, %v3149_v20  ;;  %v3159_v21 = vand.u32 2147483647, %v3149_v20  ;;  %vm3155_vm7 = vweird.f32 %v3149_v20 }
0x1e01   :  { %v3112_v12 = vsub.f32 1.0, %v3111_v31  ;;  %v3139_v47 = vmul.f32 %v3138_v30, %v6275_v39  ;;  %v4936_v30 = vld [vmem:[#allocation17 + $0x2] ss:$0 sm:$0xff] }
0x1e02   :  { %v3162_v46 = vor.u32 1.1754944e-38, %v3161_v41  ;;  %vm3160_vm11 = vcmp.eq.f32.partialorder %v3159_v21, 8.507059e+37  ;;  %v4937_v21 = vld [vmem:[#allocation19 + $0x2] ss:$0 sm:$0xff] }
0x1e03   :  { %v3113_v24 = vmul.f32 %v5079_v15, %v3112_v12  ;;  %v4872_v12 = vld [vmem:[%s6556_s7 + $0x30] sm:$0xff] }
0x1e04   :  { %3421 = vmatpush.bf16.msra.mxu3 %v4872_v12 }
0x1e05   :  { %v3114_v26 = vadd.f32 %v5079_v15, %v3113_v24 }
0x1e06   :  { %v5081_v29 = vpop.eup %5080 }
0x1e07   :  { %v3118_v32 = vsel %vm3117_vm4, %v5079_v15, %v3114_v26  ;;  %v3151_v36 = vmul.f32 %v5081_v29, %v3149_v20  ;;  %vm3156_vm6 = vweird.f32 %v5081_v29  ;;  %v4870_v20 = vld [vmem:[%s6554_s5 + $0x30] sm:$0xff] }
0x1e08   :  { %v3123_v14 = vsel %vm3120_vm5, %v3122_v44, %v3118_v32  ;;  %vm3157_vm10 = vmor %vm3155_vm7, %vm3156_vm6  ;;  %3385 = vmatpush.bf16.msrb.mxu2 %v4870_v20 }
0x1e09   :  { %v3152_v38 = vsub.f32 1.0, %v3151_v36  ;;  %v3124_v58 = vmul.f32 %v3123_v14, %v3099_v3 }
0x1e0b   :  { %v3153_v42 = vmul.f32 %v5081_v29, %v3152_v38  ;;  %v4644_v22 = vclamps-f32 %v3124_v58, 1.0 }
0x1e0d   :  { %v3154_v43 = vadd.f32 %v5081_v29, %v3153_v42  ;;  %v3167_v8 = vadd.f32 1.0, %v4644_v22 }
0x1e0f   :  { %v3158_v35 = vsel %vm3157_vm10, %v5081_v29, %v3154_v43  ;;  %v3169_v55 = vmul.f32 %v3167_v8, %v3083_v45 }
0x1e10   :  { %v3163_v25 = vsel %vm3160_vm11, %v3162_v46, %v3158_v35 }
0x1e11   :  { %v3164_v49 = vmul.f32 %v3163_v25, %v3139_v47 }
0x1e13   :  { %v4645_v16 = vclamps-f32 %v3164_v49, 1.0  ;;  %v4938_v49 = vld [vmem:[#allocation8 + $0x3] ss:$0 sm:$0xff] }
0x1e15   :  { %v3168_v37 = vadd.f32 1.0, %v4645_v16 }
0x1e17   :  { %v3170_v2 = vmul.f32 %v3168_v37, %v3084_v52  ;;  %v4939_v52 = vld [vmem:[#allocation10 + $0x3] ss:$0 sm:$0xff]  ;;  %v4940_v37 = vld [vmem:[%s6557_s8 + $0x3] ss:$0 sm:$0xff] }
0x1e19   :  { %v3190_v56 = vpack.c.bf16 %v3170_v2, %v3169_v55 }
0x1e1b   :  { %3250 = vmatmul.bf16.vlgmr.msra.gmra.mxu0 %v3190_v56 }
0x1e98   :  { %v3251_v39 = vpop.f32.mrf.mxu0 }
0x1e99   :  { %v3252_v51 = vadd.f32 %v4935_v57, %v3251_v39 }
0x1e9b   :  { %v3256_v7 = vadd.f32 %v3252_v51, %v6249_v48 }
0x1e9d   :  { %v3262_v60 = vsel %vm235_vm0, %v3256_v7, 0.0 }
0x1e9e   :  { %3263 = vadd.xlane.f32.xlu1 %v3262_v60 }
0x1ea0   :  { %v3253_v61 = vpop.f32.mrf.mxu0 }
0x1ea1   :  { %v3254_v27 = vadd.f32 %v4935_v57, %v3253_v61 }
0x1ea3   :  { %v3257_v53 = vadd.f32 %v3254_v27, %v6251_v59  ;;  %v4869_v59 = vld [vmem:[%s6577_s27 + $0x38] sm:$0xff] }
0x1ea4   :  { %3348 = vmatpush.bf16.msrb.mxu1 %v4869_v59 }
0x1ea5   :  { %v3265_v6 = vsel %vm235_vm0, %v3257_v53, 0.0 }
0x1ea6   :  { %3266 = vadd.xlane.f32.xlu1 %v3265_v6 }
0x1ea8   :  { %3349 = vmatpush.bf16.msrb.mxu1 %v4868_v19 }
0x1f11   :  { %v3264_v62 = vpop.xlane.xlu1 %3263 }
0x1f12   :  { %v3268_v63 = vmul.f32 %v3264_v62, %v5613_v10 }
0x1f14   :  { %v3270_v1 = vsub.f32 %v3256_v7, %v3268_v63 }
0x1f16   :  { %v3272_v40 = vmul.f32 %v3270_v1, %v3270_v1 }
0x1f18   :  { %v3274_v4 = vsel %vm235_vm0, %v3272_v40, 0.0 }
0x1f19   :  { %3275 = vadd.xlane.f32.xlu1 %v3274_v4  ;;  %v3267_v5 = vpop.xlane.xlu1 %3266 }
0x1f1a   :  { %v3269_v48 = vmul.f32 %v3267_v5, %v5613_v10 }
0x1f1c   :  { %v3271_v11 = vsub.f32 %v3257_v53, %v3269_v48 }
0x1f1e   :  { %v3273_v9 = vmul.f32 %v3271_v11, %v3271_v11 }
0x1f20   :  { %v3277_v34 = vsel %vm235_vm0, %v3273_v9, 0.0 }
0x1f21   :  { %3278 = vadd.xlane.f32.xlu1 %v3277_v34 }
0x1f8c   :  { %v3276_v15 = vpop.xlane.xlu1 %3275 }
0x1f8d   :  { %v3280_v18 = vmul.f32 %v3276_v15, %v5613_v10 }
0x1f8f   :  { %v3282_v31 = vadd.f32 1e-12, %v3280_v18 }
0x1f91   :  { %5082 = vrsqrt.f32 %v3282_v31  ;;  %vm3290_vm13 = vweird.f32 %v3282_v31 }
0x1f94   :  { %v3279_v23 = vpop.xlane.xlu1 %3278 }
0x1f95   :  { %v3281_v24 = vmul.f32 %v3279_v23, %v5613_v10 }
0x1f97   :  { %v5083_v0 = vpop.eup %5082  ;;  %v3283_v54 = vadd.f32 1e-12, %v3281_v24 }
0x1f98   :  { %v3285_v17 = vmul.f32 %v5083_v0, %v3282_v31  ;;  %vm3291_vm12 = vweird.f32 %v5083_v0 }
0x1f99   :  { %5084 = vrsqrt.f32 %v3283_v54  ;;  %vm3292_vm14 = vmor %vm3290_vm13, %vm3291_vm12  ;;  %vm3300_vm1 = vweird.f32 %v3283_v54 }
0x1f9a   :  { %v3286_v26 = vmul.f32 %v5083_v0, %v3285_v17 }
0x1f9c   :  { %v3287_v28 = vmul.f32 0.5, %v3286_v26 }
0x1f9e   :  { %v3288_v29 = vsub.f32 1.5, %v3287_v28 }
0x1f9f   :  { %v5085_v32 = vpop.eup %5084 }
0x1fa0   :  { %v3289_v44 = vmul.f32 %v5083_v0, %v3288_v29  ;;  %v3295_v33 = vmul.f32 %v5085_v32, %v3283_v54  ;;  %vm3301_vm15 = vweird.f32 %v5085_v32 }
0x1fa1   :  { %vm3302_vm2 = vmor %vm3300_vm1, %vm3301_vm15 }
0x1fa2   :  { %v3296_v36 = vmul.f32 %v5085_v32, %v3295_v33  ;;  %v3293_v14 = vsel %vm3292_vm14, %v5083_v0, %v3289_v44 }
0x1fa3   :  { %v3304_v41 = vmul.f32 %v3293_v14, %v3270_v1 }
0x1fa4   :  { %v3297_v3 = vmul.f32 0.5, %v3296_v36 }
0x1fa5   :  { %v3309_v43 = vmul.f32 %v4936_v30, %v3304_v41 }
0x1fa6   :  { %v3298_v38 = vsub.f32 1.5, %v3297_v3 }
0x1fa7   :  { %v6329_v47 = vadd.f32 %v4937_v21, %v3309_v43 }
0x1fa8   :  { %v3299_v58 = vmul.f32 %v5085_v32, %v3298_v38 }
0x1faa   :  { %v3303_v42 = vsel %vm3302_vm2, %v5085_v32, %v3299_v58 }
0x1fab   :  { %v3305_v46 = vmul.f32 %v3303_v42, %v3271_v11 }
0x1fad   :  { %v3310_v22 = vmul.f32 %v4936_v30, %v3305_v46 }
0x1faf   :  { %v6331_v35 = vadd.f32 %v4937_v21, %v3310_v22 }
0x1fb1   :  { %v3323_v25 = vpack.c.bf16 %v6331_v35, %v6329_v47 }
0x1fb3   :  { %4707 = vmatmul.msk.bf16.vlgmr.msrb.gmra.mxu1 %vm235_vm0, %v3323_v25  ;;  %4720 = vmatmul.msk.bf16.vlgmr.msrb.gmra.mxu2 %vm235_vm0, %v3323_v25 }
0x1fb4   :  { %4734 = vmatmul.msk.bf16.vlgmr.msra.gmra.mxu3 %vm235_vm0, %v3323_v25 }
0x2030   :  { %v3351_v8 = vpop.f32.mrf.mxu1 }
0x2031   :  { %v3352_v16 = vadd.f32 %v4938_v49, %v3351_v8 }
0x2033   :  { %v3428_v45 = vmul.f32 0.35355338, %v3352_v16 }
0x2035   :  { %v3430_v55 = vpack.c.bf16 %v3428_v45, %v3428_v45 }
0x2036   :  { %v3387_v2 = vpop.f32.mrf.mxu2 }
0x2037   :  { %v3544_v56 = vunpack.c.l.b16 %v3430_v55  ;;  %v3388_v57 = vadd.f32 %v4939_v52, %v3387_v2  ;;  %v3423_v39 = vpop.f32.mrf.mxu3 }
0x2038   :  { %v3424_v51 = vadd.f32 %v4940_v37, %v3423_v39  ;;  %v3353_v7 = vpop.f32.mrf.mxu1 }
0x2039   :  { %v3432_v60 = vpack.c.bf16 %v3388_v57, %v3388_v57  ;;  %v3354_v61 = vadd.f32 %v4938_v49, %v3353_v7  ;;  %v6341_v27 = vpack.c.b16 %v3544_v56, %v3544_v56 }
0x203a   :  { %v3434_v53 = vpack.c.bf16 %v3424_v51, %v3424_v51 }
0x203b   :  { %v3445_v6 = vsel %vm415_vm8, %v3432_v60, 0  ;;  %v3549_v62 = vunpack.c.l.b16 %v3432_v60  ;;  %v3429_v63 = vmul.f32 0.35355338, %v3354_v61  ;;  %3546 = vrot.lane.b32.xlu2 %v6341_v27, %s5450_s11 }
0x203c   :  { %v3507_v1 = vsel %vm481_vm9, %v3434_v53, 0  ;;  %3454 = vmatpush.bf16.xpose.msra.mxu1 %v3445_v6  ;;  %v3626_v32 = vunpack.c.l.b16 %v3434_v53 }
0x203d   :  { %v6347_v40 = vpack.c.b16 %v3549_v62, %v3549_v62  ;;  %v3431_v4 = vpack.c.bf16 %v3429_v63, %v3429_v63  ;;  %3516 = vmatpush.bf16.msrb.mxu3 %v3507_v1 }
0x203e   :  { %v3389_v5 = vpop.f32.mrf.mxu2  ;;  %v6371_v44 = vpack.c.b16 %v3626_v32, %v3626_v32 }
0x203f   :  { %v3390_v48 = vadd.f32 %v4939_v52, %v3389_v5  ;;  %v3425_v11 = vpop.f32.mrf.mxu3  ;;  %3551 = vrot.lane.b32.xlu0 %v6347_v40, %s5450_s11  ;;  %v3573_v34 = vunpack.c.l.b16 %v3431_v4 }
0x2040   :  { %v3426_v9 = vadd.f32 %v4940_v37, %v3425_v11 }
0x2041   :  { %v3433_v59 = vpack.c.bf16 %v3390_v48, %v3390_v48  ;;  %v6359_v19 = vpack.c.b16 %v3573_v34, %v3573_v34 }
0x2042   :  { %v6351_v50 = vpack.c.bf16 %v3426_v9, %v3426_v9 }
0x2043   :  { %v3464_v13 = vsel %vm415_vm8, %v3433_v59, 0  ;;  %v3578_v15 = vunpack.c.l.b16 %v3433_v59  ;;  %4739 = vmatmul.msk.bf16.vlgmr.msra.gmra.mxu1 %vm415_vm8, %v3430_v55 }
0x2044   :  { %v3526_v18 = vsel %vm481_vm9, %v6351_v50, 0  ;;  %3473 = vmatpush.bf16.xpose.msra.mxu2 %v3464_v13  ;;  %v3650_v48 = vunpack.c.l.b16 %v6351_v50 }
0x2045   :  { %v6357_v31 = vpack.c.b16 %v3578_v15, %v3578_v15  ;;  %3535 = vmatpush.bf16.msrb.mxu0 %v3526_v18  ;;  %v4736_v18 = vld [vmem:[%s6558_s9 + $0x68] sm:$0xff] }
0x2046   :  { %v6394_v11 = vpack.c.b16 %v3650_v48, %v3650_v48 }
0x2047   :  { %3580 = vrot.lane.b32.xlu1 %v6357_v31, %s5450_s11  ;;  %3575 = vrot.lane.b32.xlu0 %v6359_v19, %s5450_s11 }
0x204b   :  { %4740 = vmatmul.msk.bf16.vlgmr.msra.gmra.mxu2 %vm415_vm8, %v3431_v4 }
0x2095   :  { %v3547_v23 = vpop.permute.xlu2 %3546 }
0x20b1   :  { %v3552_v20 = vpop.permute.xlu0 %3551 }
0x20b2   :  { %v3557_v12 = vsel %vm415_vm8, %v3552_v20, 0 }
0x20b3   :  { %3566 = vmatpush.bf16.xpose.msrb.mxu1 %v3557_v12 }
0x20b9   :  { %v3581_v24 = vpop.permute.xlu1 %3580  ;;  %v3576_v17 = vpop.permute.xlu0 %3575 }
0x20ba   :  { %v3586_v0 = vsel %vm415_vm8, %v3581_v24, 0  ;;  %4743 = vmatmul.msk.bf16.vlgmr.msrb.gmra.mxu1 %vm415_vm8, %v3547_v23 }
0x20bb   :  { %3595 = vmatpush.bf16.xpose.msrb.mxu2 %v3586_v0 }
0x20c0   :  { %v3456_v54 = vpop.f32.mrf.mxu1 }
0x20c1   :  { %v3479_v26 = vsel %vm415_vm8, %v3456_v54, -inf }
0x20c2   :  { %4744 = vmatmul.msk.bf16.vlgmr.msrb.gmra.mxu2 %vm415_vm8, %v3576_v17  ;;  %3480 = vmax.xlane.f32.xlu0 %v3479_v26 }
0x20c8   :  { %v3458_v28 = vpop.f32.mrf.mxu1 }
0x20ce   :  { %v3475_v29 = vpop.f32.mrf.mxu2 }
0x20cf   :  { %v3482_v36 = vsel %vm415_vm8, %v3475_v29, -inf }
0x20d6   :  { %v3477_v33 = vpop.f32.mrf.mxu2  ;;  %3628 = vrot.lane.b32.xlu0 %v6371_v44, %s5450_s11 }
0x2100   :  { %3483 = vmax.xlane.f32.xlu0 %v3482_v36 }
0x2135   :  { %v3481_v14 = vpop.xlane.xlu0 %3480 }
0x2136   :  { %v3485_v3 = vsub.f32 %v3456_v54, %v3481_v14 }
0x2137   :  { %v3568_v38 = vpop.f32.mrf.mxu1 }
0x2138   :  { %v3487_v30 = vmul.f32 1.442695, %v3485_v3  ;;  %v3601_v41 = vsel %vm415_vm8, %v3568_v38, -inf }
0x2139   :  { %3602 = vmax.xlane.f32.xlu2 %v3601_v41 }
0x213a   :  { %5086 = vpow2.f32 %v3487_v30 }
0x213f   :  { %v3570_v58 = vpop.f32.mrf.mxu1 }
0x2140   :  { %v5087_v42 = vpop.eup %5086 }
0x2141   :  { %v3491_v21 = vsel %vm415_vm8, %v5087_v42, 0.0 }
0x2142   :  { %3492 = vadd.xlane.f32.xlu1 %v3491_v21 }
0x2145   :  { %v3597_v43 = vpop.f32.mrf.mxu2 }
0x2146   :  { %v3604_v49 = vsel %vm415_vm8, %v3597_v43, -inf }
0x2148   :  { %v3629_v46 = vpop.permute.xlu0 %3628 }
0x2149   :  { %v3634_v22 = vsel %vm481_vm9, %v3629_v46, 0 }
0x214a   :  { %3643 = vmatpush.bf16.msra.mxu3 %v3634_v22  ;;  %v4735_v22 = vld [vmem:[%s6558_s9 + $0x60] sm:$0xff] }
0x214d   :  { %v3599_v25 = vpop.f32.mrf.mxu2 }
0x214e   :  { %v3542_v25 = vpack.c.bf16 %v4735_v22, %v4735_v22 }
0x215b   :  { %3717 = vrot.lane.b32.xlu1 %v6347_v40, %s5451_s10 }
0x2173   :  { %v3484_v7 = vpop.xlane.xlu0 %3483 }
0x2174   :  { %v3486_v60 = vsub.f32 %v3475_v29, %v3484_v7 }
0x2176   :  { %v3489_v61 = vmul.f32 1.442695, %v3486_v60 }
0x2185   :  { %3605 = vmax.xlane.f32.xlu1 %v3604_v49  ;;  %v3699_v49 = vsel %vm481_vm9, %v3542_v25, 0 }
0x2186   :  { %3708 = vmatpush.bf16.msra.mxu2 %v3699_v49 }
0x219e   :  { %3740 = vrot.lane.b32.xlu1 %v6357_v31, %s5451_s10 }
0x21ac   :  { %v3603_v8 = vpop.xlane.xlu2 %3602 }
0x21ad   :  { %v3607_v16 = vsub.f32 %v3568_v38, %v3603_v8 }
0x21af   :  { %v3609_v45 = vmul.f32 1.442695, %v3607_v16 }
0x21b1   :  { %5088 = vpow2.f32 %v3609_v45 }
0x21b5   :  { %v3493_v52 = vpop.xlane.xlu1 %3492 }
0x21b6   :  { %5090 = vrcp.f32 %v3493_v52 }
0x21b7   :  { %v5089_v37 = vpop.eup %5088  ;;  %5092 = vpow2.f32 %v3489_v61 }
0x21b8   :  { %v3613_v55 = vsel %vm415_vm8, %v5089_v37, 0.0 }
0x21b9   :  { %3614 = vadd.xlane.f32.xlu2 %v3613_v55 }
0x21bc   :  { %v5091_v2 = vpop.eup %5090 }
0x21bd   :  { %v3499_v56 = vmul.f32 %v5091_v2, %v5087_v42  ;;  %v5093_v53 = vpop.eup %5092 }
0x21be   :  { %v3494_v63 = vsel %vm415_vm8, %v5093_v53, 0.0 }
0x21bf   :  { %v3501_v57 = vpack.c.bf16 %v3499_v56, %v3499_v56 }
0x21c1   :  { %4741 = vmatmul.msk.bf16.vlgmr.msrb.gmra.mxu3 %vm415_vm8, %v3501_v57 }
0x21cd   :  { %v3718_v39 = vpop.permute.xlu1 %3717 }
0x21ce   :  { %v3723_v51 = vsel %vm415_vm8, %v3718_v39, 0 }
0x21cf   :  { %3732 = vmatpush.bf16.xpose.msrb.mxu3 %v3723_v51 }
0x21d1   :  { %3715 = vrot.lane.b32.xlu2 %v6341_v27, %s5451_s10 }
0x21f8   :  { %v3606_v6 = vpop.xlane.xlu1 %3605 }
0x21f9   :  { %v3608_v62 = vsub.f32 %v3597_v43, %v3606_v6 }
0x21fa   :  { %3495 = vadd.xlane.f32.xlu2 %v3494_v63 }
0x21fb   :  { %v3611_v1 = vmul.f32 1.442695, %v3608_v62 }
0x21fd   :  { %5094 = vpow2.f32 %v3611_v1 }
0x2203   :  { %v5095_v4 = vpop.eup %5094 }
0x2204   :  { %v3616_v5 = vsel %vm415_vm8, %v5095_v4, 0.0 }
0x2205   :  { %3617 = vadd.xlane.f32.xlu0 %v3616_v5 }
0x2210   :  { %v3741_v28 = vpop.permute.xlu1 %3740 }
0x2211   :  { %v3746_v36 = vsel %vm415_vm8, %v3741_v28, 0 }
0x2212   :  { %3738 = vrot.lane.b32.xlu2 %v6359_v19, %s5451_s10 }
0x2219   :  { %3652 = vrot.lane.b32.xlu0 %v6394_v11, %s5450_s11 }
0x221a   :  { %3785 = vrot.lane.b32.xlu2 %v6371_v44, %s5451_s10 }
0x2222   :  { %3853 = vrot.lane.b32.xlu2 %v6347_v40, %s5452_s25 }
0x222a   :  { %3876 = vrot.lane.b32.xlu2 %v6357_v31, %s5452_s25  ;;  %v3674_v31 = vpack.c.bf16 %v4736_v18, %v4736_v18 }
0x222c   :  { %v3615_v9 = vpop.xlane.xlu2 %3614 }
0x222d   :  { %5096 = vrcp.f32 %v3615_v9 }
0x2232   :  { %3851 = vrot.lane.b32.xlu2 %v6341_v27, %s5452_s25  ;;  %v3679_v27 = vsel %vm481_vm9, %v3674_v31, 0 }
0x2233   :  { %v5097_v34 = vpop.eup %5096  ;;  %3688 = vmatpush.bf16.msra.mxu1 %v3679_v27 }
0x2234   :  { %v3621_v59 = vmul.f32 %v5097_v34, %v5089_v37  ;;  %v3716_v15 = vpop.permute.xlu2 %3715 }
0x2236   :  { %v3623_v50 = vpack.c.bf16 %v3621_v59, %v3621_v59 }
0x2238   :  { %4745 = vmatmul.msk.bf16.vlgmr.msra.gmra.mxu3 %vm415_vm8, %v3623_v50 }
0x223a   :  { %3874 = vrot.lane.b32.xlu2 %v6359_v19, %s5452_s25 }
0x2244   :  { %v3518_v13 = vpop.f32.mrf.mxu3 }
0x2248   :  { %4749 = vmatmul.msk.bf16.vlgmr.msrb.gmra.mxu3 %vm415_vm8, %v3716_v15 }
0x224c   :  { %v3520_v40 = vpop.f32.mrf.mxu3 }
0x226d   :  { %v3496_v20 = vpop.xlane.xlu2 %3495 }
0x226e   :  { %5098 = vrcp.f32 %v3496_v20 }
0x2274   :  { %v5099_v12 = vpop.eup %5098 }
0x2275   :  { %v3500_v23 = vmul.f32 %v5099_v12, %v5093_v53  ;;  %v3739_v24 = vpop.permute.xlu2 %3738  ;;  %v4737_v12 = vld [vmem:[%s6558_s9 + $0x70] sm:$0xff] }
0x2277   :  { %v3502_v0 = vpack.c.bf16 %v3500_v23, %v3500_v23  ;;  %v3828_v23 = vpack.c.bf16 %v4737_v12, %v4737_v12 }
0x2278   :  { %v3618_v54 = vpop.xlane.xlu0 %3617 }
0x2279   :  { %4742 = vmatmul.msk.bf16.vlgmr.msrb.gmra.mxu0 %vm415_vm8, %v3502_v0  ;;  %5100 = vrcp.f32 %v3618_v54 }
0x227d   :  { %v3786_v19 = vpop.permute.xlu2 %3785 }
0x227e   :  { %v3791_v17 = vsel %vm481_vm9, %v3786_v19, 0 }
0x227f   :  { %3800 = vmatpush.bf16.msrb.mxu1 %v3791_v17  ;;  %v5101_v26 = vpop.eup %5100 }
0x2280   :  { %v3622_v29 = vmul.f32 %v5101_v26, %v5095_v4 }
0x2282   :  { %v3624_v3 = vpack.c.bf16 %v3622_v29, %v3622_v29 }
0x2285   :  { %v3854_v14 = vpop.permute.xlu2 %3853 }
0x2286   :  { %v3859_v38 = vsel %vm415_vm8, %v3854_v14, 0 }
0x228b   :  { %v3653_v32 = vpop.permute.xlu0 %3652 }
0x228c   :  { %v3658_v33 = vsel %vm481_vm9, %v3653_v32, 0 }
0x228d   :  { %3667 = vmatpush.bf16.msra.mxu0 %v3658_v33  ;;  %v3877_v30 = vpop.permute.xlu2 %3876 }
0x228e   :  { %v3882_v55 = vsel %vm415_vm8, %v3877_v30, 0 }
0x2290   :  { %4746 = vmatmul.msk.bf16.vlgmr.msra.gmra.mxu0 %vm415_vm8, %v3624_v3 }
0x2291   :  { %3755 = vmatpush.bf16.xpose.msrb.mxu0 %v3746_v36 }
0x2295   :  { %v3852_v41 = vpop.permute.xlu2 %3851 }
0x2299   :  { %3868 = vmatpush.bf16.xpose.msra.mxu0 %v3859_v38 }
0x229d   :  { %v3875_v20 = vpop.permute.xlu2 %3874 }
0x22a0   :  { %4750 = vmatmul.msk.bf16.vlgmr.msrb.gmra.mxu0 %vm415_vm8, %v3739_v24 }
0x22b0   :  { %4754 = vmatmul.msk.bf16.vlgmr.msra.gmra.mxu0 %vm415_vm8, %v3852_v41 }
0x22bb   :  { %v3645_v58 = vpop.f32.mrf.mxu3 }
0x22c3   :  { %v3647_v42 = vpop.f32.mrf.mxu3 }
0x22cb   :  { %v3734_v21 = vpop.f32.mrf.mxu3 }
0x22cc   :  { %v3761_v43 = vsel %vm415_vm8, %v3734_v21, -inf }
0x22cd   :  { %3762 = vmax.xlane.f32.xlu0 %v3761_v43 }
0x22d3   :  { %v3736_v46 = vpop.f32.mrf.mxu3 }
0x22f6   :  { %v3537_v8 = vpop.f32.mrf.mxu0 }
0x22f7   :  { %v3541_v16 = vpack.c.bf16 %v3537_v8, %v3518_v13 }
0x22f9   :  { %4748 = vmatmul.msk.bf16.vlgmr.msra.gmra.mxu2 %vm415_vm8, %v3541_v16 }
0x22fe   :  { %v3539_v45 = vpop.f32.mrf.mxu0 }
0x230d   :  { %v3669_v52 = vpop.f32.mrf.mxu0 }
0x230e   :  { %v3673_v37 = vpack.c.bf16 %v3669_v52, %v3645_v58 }
0x2310   :  { %4747 = vmatmul.msk.bf16.vlgmr.msra.gmra.mxu1 %vm415_vm8, %v3673_v37 }
0x2311   :  { %3891 = vmatpush.bf16.xpose.msra.mxu1 %v3882_v55 }
0x2315   :  { %v3671_v2 = vpop.f32.mrf.mxu0 }
0x231d   :  { %v3757_v56 = vpop.f32.mrf.mxu0 }
0x231e   :  { %v3764_v57 = vsel %vm415_vm8, %v3757_v56, -inf }
0x231f   :  { %3765 = vmax.xlane.f32.xlu0 %v3764_v57 }
0x2325   :  { %v3759_v39 = vpop.f32.mrf.mxu0 }
0x232d   :  { %v3870_v51 = vpop.f32.mrf.mxu0 }
0x232e   :  { %v3897_v7 = vsel %vm415_vm8, %v3870_v51, -inf }
0x232f   :  { %3898 = vmax.xlane.f32.xlu0 %v3897_v7 }
0x2335   :  { %v3872_v60 = vpop.f32.mrf.mxu0 }
0x2340   :  { %v3763_v61 = vpop.xlane.xlu0 %3762 }
0x2341   :  { %v3767_v53 = vsub.f32 %v3734_v21, %v3763_v61 }
0x2343   :  { %v3769_v6 = vmul.f32 1.442695, %v3767_v53 }
0x2345   :  { %5102 = vpow2.f32 %v3769_v6  ;;  %v4738_v6 = vld [vmem:[%s6558_s9 + $0x78] sm:$0xff] }
0x234b   :  { %v5103_v62 = vpop.eup %5102 }
0x234c   :  { %v3773_v63 = vsel %vm415_vm8, %v5103_v62, 0.0 }
0x234d   :  { %3774 = vadd.xlane.f32.xlu1 %v3773_v63 }
0x2366   :  { %3806 = vrot.lane.b32.xlu1 %v6394_v11, %s5451_s10  ;;  %s4337_s10 = sshll.u32 %s6568_s19, 4  ;;  %s4338_s10 = int_to_ptr.hbm [resolvable:$true] %s4337_s10 }
0x237c   :  { %v3710_v1 = vpop.f32.mrf.mxu2 }
0x2384   :  { %v3712_v42 = vpop.f32.mrf.mxu2 }
0x238d   :  { %v3690_v4 = vpop.f32.mrf.mxu1 }
0x238e   :  { %v6435_v5 = vadd.f32 %v3710_v1, %v3690_v4 }
0x2392   :  { %v3766_v48 = vpop.xlane.xlu0 %3765 }
0x2393   :  { %v3768_v9 = vsub.f32 %v3757_v56, %v3766_v48 }
0x2395   :  { %v3771_v34 = vmul.f32 1.442695, %v3768_v9  ;;  %v3692_v28 = vpop.f32.mrf.mxu1  ;;  %v4941_v9 = vld [vmem:[#allocation11 + $0x3] ss:$0 sm:$0xff] }
0x2397   :  { %5104 = vpow2.f32 %v3771_v34 }
0x239d   :  { %v5105_v59 = vpop.eup %5104 }
0x239e   :  { %v3776_v50 = vsel %vm415_vm8, %v5105_v59, 0.0 }
0x239f   :  { %3777 = vadd.xlane.f32.xlu2 %v3776_v50 }
0x23a2   :  { %v3899_v32 = vpop.xlane.xlu0 %3898 }
0x23a3   :  { %v3903_v33 = vsub.f32 %v3870_v51, %v3899_v32 }
0x23a5   :  { %v3905_v14 = vmul.f32 1.442695, %v3903_v33  ;;  %v4875_v33 = vld [vmem:[#allocation14 + $0x38] sm:$0xff] }
0x23b7   :  { %3942 = vrot.lane.b32.xlu2 %v6394_v11, %s5452_s25  ;;  %v3833_v11 = vsel %vm481_vm9, %v3828_v23, 0 }
0x23b8   :  { %3842 = vmatpush.bf16.msra.mxu3 %v3833_v11 }
0x23c0   :  { %v3775_v13 = vpop.xlane.xlu1 %3774 }
0x23c1   :  { %5106 = vrcp.f32 %v3775_v13  ;;  %v3713_v13 = vadd.f32 %v3712_v42, %v3692_v28 }
0x23c7   :  { %v5107_v15 = vpop.eup %5106 }
0x23c8   :  { %v3781_v40 = vmul.f32 %v5107_v15, %v5103_v62  ;;  %v3964_v62 = vpack.c.bf16 %v4738_v6, %v4738_v6  ;;  %v4944_v6 = vld [vmem:[#allocation16 + $0x3] ss:$0 sm:$0xff] }
0x23ca   :  { %v3783_v18 = vpack.c.bf16 %v3781_v40, %v3781_v40  ;;  %v3969_v63 = vsel %vm481_vm9, %v3964_v62, 0 }
0x23cb   :  { %3978 = vmatpush.bf16.msrb.mxu0 %v3969_v63 }
0x23cc   :  { %4751 = vmatmul.msk.bf16.vlgmr.msrb.gmra.mxu1 %vm415_vm8, %v3783_v18 }
0x23cd   :  { %4086 = vmatpush.bf16.msrb.mxu1 %v4875_v33 }
0x23d8   :  { %v3807_v31 = vpop.permute.xlu1 %3806 }
0x23d9   :  { %v3812_v27 = vsel %vm481_vm9, %v3807_v31, 0 }
0x23da   :  { %3821 = vmatpush.bf16.msrb.mxu2 %v3812_v27 }
0x23dc   :  { %4755 = vmatmul.msk.bf16.vlgmr.msra.gmra.mxu1 %vm415_vm8, %v3875_v20 }
0x2412   :  { %v3778_v24 = vpop.xlane.xlu2 %3777 }
0x2413   :  { %5108 = vrcp.f32 %v3778_v24 }
0x2414   :  { %5110 = vpow2.f32 %v3905_v14 }
0x2419   :  { %v5109_v0 = vpop.eup %5108 }
0x241a   :  { %v3782_v19 = vmul.f32 %v5109_v0, %v5105_v59  ;;  %v3943_v54 = vpop.permute.xlu2 %3942  ;;  %v5111_v30 = vpop.eup %5110 }
0x241b   :  { %v3948_v17 = vsel %vm481_vm9, %v3943_v54, 0  ;;  %v3909_v58 = vsel %vm415_vm8, %v5111_v30, 0.0 }
0x241c   :  { %v3784_v26 = vpack.c.bf16 %v3782_v19, %v3782_v19  ;;  %3957 = vmatpush.bf16.msrb.mxu3 %v3948_v17 }
0x241e   :  { %4752 = vmatmul.msk.bf16.vlgmr.msrb.gmra.mxu2 %vm415_vm8, %v3784_v26 }
0x2449   :  { %v3802_v29 = vpop.f32.mrf.mxu1 }
0x2451   :  { %v3804_v36 = vpop.f32.mrf.mxu1 }
0x2459   :  { %v3893_v3 = vpop.f32.mrf.mxu1 }
0x245a   :  { %v3900_v38 = vsel %vm415_vm8, %v3893_v3, -inf }
0x245b   :  { %3901 = vmax.xlane.f32.xlu0 %v3900_v38  ;;  %v4874_v38 = vld [vmem:[#allocation14 + $0x30] sm:$0xff] }
0x245c   :  { %4087 = vmatpush.bf16.msrb.mxu1 %v4874_v38 }
0x2461   :  { %v3895_v41 = vpop.f32.mrf.mxu1 }
0x2463   :  { %3910 = vadd.xlane.f32.xlu0 %v3909_v58 }
0x2477   :  { %3921 = vrot.lane.b32.xlu0 %v6371_v44, %s5452_s25 }
0x24a1   :  { %v3823_v21 = vpop.f32.mrf.mxu2 }
0x24a2   :  { %v3827_v43 = vpack.c.bf16 %v3823_v21, %v3802_v29 }
0x24a4   :  { %4753 = vmatmul.msk.bf16.vlgmr.msra.gmra.mxu3 %vm415_vm8, %v3827_v43 }
0x24a9   :  { %v3825_v46 = vpop.f32.mrf.mxu2 }
0x24ce   :  { %v3902_v22 = vpop.xlane.xlu0 %3901 }
0x24cf   :  { %v3904_v25 = vsub.f32 %v3893_v3, %v3902_v22 }
0x24d1   :  { %v3907_v49 = vmul.f32 1.442695, %v3904_v25 }
0x24d3   :  { %5112 = vpow2.f32 %v3907_v49 }
0x24d6   :  { %v3911_v45 = vpop.xlane.xlu0 %3910 }
0x24d7   :  { %5114 = vrcp.f32 %v3911_v45 }
0x24d9   :  { %v5113_v8 = vpop.eup %5112 }
0x24da   :  { %v3912_v16 = vsel %vm415_vm8, %v5113_v8, 0.0 }
0x24db   :  { %3913 = vadd.xlane.f32.xlu1 %v3912_v16 }
0x24dd   :  { %v5115_v52 = vpop.eup %5114 }
0x24de   :  { %v3917_v37 = vmul.f32 %v5115_v52, %v5111_v30 }
0x24e0   :  { %v3919_v2 = vpack.c.bf16 %v3917_v37, %v3917_v37 }
0x24e9   :  { %v3922_v55 = vpop.permute.xlu0 %3921 }
0x24ea   :  { %v3927_v44 = vsel %vm481_vm9, %v3922_v55, 0  ;;  %v4942_v55 = vld [vmem:[#allocation13 + $0x3] ss:$0 sm:$0xff] }
0x24eb   :  { %3936 = vmatpush.bf16.msra.mxu2 %v3927_v44 }
0x24ee   :  { %4756 = vmatmul.msk.bf16.vlgmr.msra.gmra.mxu2 %vm415_vm8, %v3919_v2 }
0x2527   :  { %v3844_v56 = vpop.f32.mrf.mxu3 }
0x2528   :  { %v3849_v57 = vadd.f32 %v3844_v56, %v6435_v5 }
0x252f   :  { %v3846_v1 = vpop.f32.mrf.mxu3 }
0x2530   :  { %v3850_v40 = vadd.f32 %v3846_v1, %v3713_v13  ;;  %v4883_v1 = vld [vmem:[%s6564_s15 + $0xf8] sm:$0xff] }
0x2531   :  { %4253 = vmatpush.bf16.msrb.mxu2 %v4883_v1 }
0x254e   :  { %v3914_v39 = vpop.xlane.xlu1 %3913 }
0x254f   :  { %5116 = vrcp.f32 %v3914_v39 }
0x2555   :  { %v5117_v51 = vpop.eup %5116 }
0x2556   :  { %v3918_v7 = vmul.f32 %v5117_v51, %v5113_v8 }
0x2558   :  { %v3920_v60 = vpack.c.bf16 %v3918_v7, %v3918_v7 }
0x255a   :  { %4757 = vmatmul.msk.bf16.vlgmr.msrb.gmra.mxu3 %vm415_vm8, %v3920_v60 }
0x2571   :  { %v3938_v61 = vpop.f32.mrf.mxu2 }
0x2579   :  { %v3940_v53 = vpop.f32.mrf.mxu2 }
0x25dd   :  { %v3959_v4 = vpop.f32.mrf.mxu3 }
0x25de   :  { %v3963_v5 = vpack.c.bf16 %v3959_v4, %v3938_v61 }
0x25e0   :  { %4758 = vmatmul.msk.bf16.vlgmr.msrb.gmra.mxu0 %vm415_vm8, %v3963_v5 }
0x25e5   :  { %v3961_v48 = vpop.f32.mrf.mxu3 }
0x25e6   :  { %v4882_v48 = vld [vmem:[%s6564_s15 + $0xf0] sm:$0xff] }
0x25e7   :  { %4254 = vmatpush.bf16.msrb.mxu2 %v4882_v48 }
0x265d   :  { %v3980_v34 = vpop.f32.mrf.mxu0 }
0x265e   :  { %v3985_v59 = vadd.f32 %v3980_v34, %v3849_v57  ;;  %v4943_v57 = vld [vmem:[%s6561_s12 + $0x3] ss:$0 sm:$0xff] }
0x2660   :  { %v3992_v50 = vadd.f32 %v4941_v9, %v3985_v59 }
0x2662   :  { %v3994_v15 = vadd.f32 %v3992_v50, %v6329_v47 }
0x2664   :  { %v4000_v18 = vsel %vm235_vm0, %v3994_v15, 0.0 }
0x2665   :  { %4001 = vadd.xlane.f32.xlu0 %v4000_v18  ;;  %v3982_v31 = vpop.f32.mrf.mxu0 }
0x2666   :  { %v3986_v27 = vadd.f32 %v3982_v31, %v3850_v40 }
0x2668   :  { %v3993_v20 = vadd.f32 %v4941_v9, %v3986_v27 }
0x266a   :  { %v3995_v12 = vadd.f32 %v3993_v20, %v6331_v35  ;;  %v4880_v20 = vld [vmem:[%s6564_s15 + $0xe0] sm:$0xff] }
0x266c   :  { %v4003_v23 = vsel %vm235_vm0, %v3995_v12, 0.0 }
0x266d   :  { %4004 = vadd.xlane.f32.xlu2 %v4003_v23 }
0x26d8   :  { %v4002_v11 = vpop.xlane.xlu0 %4001 }
0x26d9   :  { %v4006_v24 = vmul.f32 %v4002_v11, %v5613_v10 }
0x26db   :  { %v4008_v0 = vsub.f32 %v3994_v15, %v4006_v24  ;;  %v4881_v15 = vld [vmem:[%s6564_s15 + $0xe8] sm:$0xff] }
0x26dc   :  { %4255 = vmatpush.bf16.msrb.mxu2 %v4881_v15 }
0x26dd   :  { %v4010_v19 = vmul.f32 %v4008_v0, %v4008_v0 }
0x26df   :  { %v4012_v54 = vsel %vm235_vm0, %v4010_v19, 0.0  ;;  %v4879_v19 = vld [vmem:[%s6564_s15 + $0xd8] sm:$0xff] }
0x26e0   :  { %4013 = vadd.xlane.f32.xlu1 %v4012_v54  ;;  %v4005_v17 = vpop.xlane.xlu2 %4004  ;;  %4256 = vmatpush.bf16.msrb.mxu2 %v4880_v20 }
0x26e1   :  { %v4007_v26 = vmul.f32 %v4005_v17, %v5613_v10 }
0x26e3   :  { %v4009_v28 = vsub.f32 %v3995_v12, %v4007_v26 }
0x26e4   :  { %4257 = vmatpush.bf16.msrb.mxu2 %v4879_v19 }
0x26e5   :  { %v4011_v29 = vmul.f32 %v4009_v28, %v4009_v28 }
0x26e7   :  { %v4015_v32 = vsel %vm235_vm0, %v4011_v29, 0.0 }
0x26e8   :  { %4016 = vadd.xlane.f32.xlu1 %v4015_v32 }
0x2753   :  { %v4014_v36 = vpop.xlane.xlu1 %4013 }
0x2754   :  { %v4018_v14 = vmul.f32 %v4014_v36, %v5613_v10  ;;  %v4878_v36 = vld [vmem:[%s6564_s15 + $0xd0] sm:$0xff] }
0x2755   :  { %4258 = vmatpush.bf16.msrb.mxu2 %v4878_v36 }
0x2756   :  { %v4020_v3 = vadd.f32 1e-12, %v4018_v14 }
0x2758   :  { %5118 = vrsqrt.f32 %v4020_v3  ;;  %vm4028_vm9 = vweird.f32 %v4020_v3 }
0x275b   :  { %v4017_v30 = vpop.xlane.xlu1 %4016 }
0x275c   :  { %v4019_v41 = vmul.f32 %v4017_v30, %v5613_v10 }
0x275e   :  { %v5119_v58 = vpop.eup %5118  ;;  %v4021_v42 = vadd.f32 1e-12, %v4019_v41 }
0x275f   :  { %v4023_v21 = vmul.f32 %v5119_v58, %v4020_v3  ;;  %vm4029_vm8 = vweird.f32 %v5119_v58 }
0x2760   :  { %5120 = vrsqrt.f32 %v4021_v42  ;;  %vm4030_vm3 = vmor %vm4028_vm9, %vm4029_vm8  ;;  %vm4038_vm5 = vweird.f32 %v4021_v42 }
0x2761   :  { %v4024_v43 = vmul.f32 %v5119_v58, %v4023_v21  ;;  %v4877_v21 = vld [vmem:[%s6564_s15 + $0xc8] sm:$0xff] }
0x2762   :  { %4259 = vmatpush.bf16.msrb.mxu2 %v4877_v21 }
0x2763   :  { %v4025_v46 = vmul.f32 0.5, %v4024_v43 }
0x2765   :  { %v4026_v22 = vsub.f32 1.5, %v4025_v46 }
0x2766   :  { %v5121_v25 = vpop.eup %5120 }
0x2767   :  { %v4027_v49 = vmul.f32 %v5119_v58, %v4026_v22  ;;  %v4033_v8 = vmul.f32 %v5121_v25, %v4021_v42  ;;  %vm4039_vm4 = vweird.f32 %v5121_v25 }
0x2768   :  { %vm4040_vm6 = vmor %vm4038_vm5, %vm4039_vm4 }
0x2769   :  { %v4034_v16 = vmul.f32 %v5121_v25, %v4033_v8  ;;  %v4031_v45 = vsel %vm4030_vm3, %v5119_v58, %v4027_v49  ;;  %v4876_v8 = vld [vmem:[%s6564_s15 + $0xc0] sm:$0xff] }
0x276a   :  { %v4042_v44 = vmul.f32 %v4031_v45, %v4008_v0  ;;  %4260 = vmatpush.bf16.msrb.mxu2 %v4876_v8 }
0x276b   :  { %v4035_v52 = vmul.f32 0.5, %v4034_v16 }
0x276c   :  { %v4047_v39 = vmul.f32 %v4942_v55, %v4042_v44 }
0x276d   :  { %v4036_v37 = vsub.f32 1.5, %v4035_v52 }
0x276e   :  { %v6477_v60 = vadd.f32 %v4943_v57, %v4047_v39 }
0x276f   :  { %v4037_v2 = vmul.f32 %v5121_v25, %v4036_v37 }
0x2771   :  { %v4041_v56 = vsel %vm4040_vm6, %v5121_v25, %v4037_v2 }
0x2772   :  { %v4043_v51 = vmul.f32 %v4041_v56, %v4009_v28 }
0x2774   :  { %v4048_v7 = vmul.f32 %v4942_v55, %v4043_v51 }
0x2776   :  { %v6479_v61 = vadd.f32 %v4943_v57, %v4048_v7 }
0x2778   :  { %v4061_v53 = vpack.c.bf16 %v6479_v61, %v6477_v60 }
0x277a   :  { %4768 = vmatmul.msk.bf16.vlgmr.msrb.gmra.mxu1 %vm235_vm0, %v4061_v53 }
0x27f7   :  { %v4089_v62 = vpop.f32.mrf.mxu1 }
0x27f8   :  { %v6484_v63 = vadd.f32 %v4944_v6, %v4089_v62 }
0x27fa   :  { %v6490_v4 = vmul.f32 0.70710677, %v6484_v63 }
0x27fc   :  { %v4098_v5 = vmul.f32 %v6490_v4, %v6490_v4 }
0x27fe   :  { %v4099_v9 = vmin.f32 %v4098_v5, 16.0 }
0x27ff   :  { %v4091_v34 = vpop.f32.mrf.mxu1 }
0x2800   :  { %v4100_v59 = vmul.f32 2.1237322e-06, %v4099_v9  ;;  %v4111_v50 = vmul.f32 3.8918573e-05, %v4099_v9  ;;  %v6497_v13 = vadd.f32 %v4944_v6, %v4091_v34 }
0x2802   :  { %v4101_v40 = vadd.f32 0.00028619796, %v4100_v59  ;;  %v4112_v18 = vadd.f32 0.001143296, %v4111_v50  ;;  %v6503_v31 = vmul.f32 0.70710677, %v6497_v13 }
0x2803   :  { %v4095_v36 = vmul.f32 0.5, %v6497_v13 }
0x2804   :  { %v4113_v27 = vmul.f32 %v4112_v18, %v4099_v9  ;;  %v4138_v12 = vmul.f32 %v6503_v31, %v6503_v31  ;;  %v4102_v23 = vmul.f32 %v4101_v40, %v4099_v9 }
0x2806   :  { %v4114_v11 = vadd.f32 0.014752088, %v4113_v27  ;;  %v4139_v24 = vmin.f32 %v4138_v12, 16.0  ;;  %v4103_v26 = vadd.f32 0.0036580483, %v4102_v23 }
0x2808   :  { %v4115_v0 = vmul.f32 %v4114_v11, %v4099_v9  ;;  %v4140_v54 = vmul.f32 2.1237322e-06, %v4139_v24  ;;  %v4151_v17 = vmul.f32 3.8918573e-05, %v4139_v24  ;;  %v4104_v38 = vmul.f32 %v4103_v26, %v4099_v9 }
0x280a   :  { %v4116_v28 = vadd.f32 0.112945676, %v4115_v0  ;;  %v4141_v29 = vadd.f32 0.00028619796, %v4140_v54  ;;  %v4152_v32 = vadd.f32 0.001143296, %v4151_v17 }
0x280b   :  { %v4105_v46 = vadd.f32 0.05243302, %v4104_v38 }
0x280c   :  { %v4117_v33 = vmul.f32 %v4116_v28, %v4099_v9  ;;  %v4142_v14 = vmul.f32 %v4141_v29, %v4139_v24  ;;  %v4153_v3 = vmul.f32 %v4152_v32, %v4139_v24 }
0x280d   :  { %v4106_v45 = vmul.f32 %v4105_v46, %v4099_v9 }
0x280e   :  { %v4118_v30 = vadd.f32 0.4994258, %v4117_v33  ;;  %v4143_v41 = vadd.f32 0.0036580483, %v4142_v14  ;;  %v4154_v58 = vadd.f32 0.014752088, %v4153_v3 }
0x280f   :  { %v4107_v2 = vadd.f32 0.18741608, %v4106_v45  ;;  %v4094_v33 = vmul.f32 0.5, %v6484_v63 }
0x2810   :  { %v4119_v42 = vmul.f32 %v4118_v30, %v4099_v9  ;;  %v4155_v43 = vmul.f32 %v4154_v58, %v4139_v24  ;;  %v4144_v25 = vmul.f32 %v4143_v41, %v4139_v24  ;;  %v4945_v41 = vld [vmem:[%s6565_s16 + $0x3] ss:$0 sm:$0xff]  ;;  %s5453_s16 = smov [#allocation20]  }
0x2811   :  { %v4108_v7 = vmul.f32 %v4107_v2, %v4099_v9  ;;  %s4335_s27 = sshll.u32 %s5453_s16, 4  ;;  %s4336_s27 = int_to_ptr.vmem [resolvable:$true] %s4335_s27 }
0x2812   :  { %v4120_v22 = vadd.f32 1.0, %v4119_v42  ;;  %v4156_v49 = vadd.f32 0.112945676, %v4155_v43  ;;  %v4145_v52 = vadd.f32 0.05243302, %v4144_v25 }
0x2813   :  { %v4109_v48 = vadd.f32 1.1283791, %v4108_v7 }
0x2814   :  { %5122 = vrcp.f32 %v4120_v22  ;;  %v4157_v16 = vmul.f32 %v4156_v49, %v4139_v24  ;;  %v4146_v57 = vmul.f32 %v4145_v52, %v4139_v24  ;;  %v4132_v6 = vand.u32 2147483648, %v4120_v22 }
0x2815   :  { %v4130_v1 = vand.u32 2147483647, %v4120_v22  ;;  %vm4126_vm10 = vweird.f32 %v4120_v22  ;;  %v4110_v27 = vmul.f32 %v4109_v48, %v6490_v4 }
0x2816   :  { %v4158_v37 = vadd.f32 0.4994258, %v4157_v16  ;;  %v4147_v62 = vadd.f32 0.18741608, %v4146_v57  ;;  %v4133_v50 = vor.u32 1.1754944e-38, %v4132_v6 }
0x2817   :  { %vm4131_vm12 = vcmp.eq.f32.partialorder %v4130_v1, 8.507059e+37 }
0x2818   :  { %v4159_v55 = vmul.f32 %v4158_v37, %v4139_v24  ;;  %v4148_v15 = vmul.f32 %v4147_v62, %v4139_v24 }
0x281a   :  { %v5123_v44 = vpop.eup %5122  ;;  %v4160_v39 = vadd.f32 1.0, %v4159_v55  ;;  %v4149_v9 = vadd.f32 1.1283791, %v4148_v15 }
0x281b   :  { %v4122_v56 = vmul.f32 %v5123_v44, %v4120_v22  ;;  %vm4127_vm7 = vweird.f32 %v5123_v44 }
0x281c   :  { %5124 = vrcp.f32 %v4160_v39  ;;  %vm4128_vm11 = vmor %vm4126_vm10, %vm4127_vm7  ;;  %v4172_v12 = vand.u32 2147483648, %v4160_v39  ;;  %v4170_v0 = vand.u32 2147483647, %v4160_v39  ;;  %vm4166_vm14 = vweird.f32 %v4160_v39 }
0x281d   :  { %v4123_v51 = vsub.f32 1.0, %v4122_v56  ;;  %v4150_v26 = vmul.f32 %v4149_v9, %v6503_v31 }
0x281e   :  { %v4173_v54 = vor.u32 1.1754944e-38, %v4172_v12  ;;  %vm4171_vm1 = vcmp.eq.f32.partialorder %v4170_v0, 8.507059e+37 }
0x281f   :  { %v4124_v53 = vmul.f32 %v5123_v44, %v4123_v51 }
0x2821   :  { %v4125_v5 = vadd.f32 %v5123_v44, %v4124_v53 }
0x2822   :  { %v5125_v34 = vpop.eup %5124 }
0x2823   :  { %v4129_v59 = vsel %vm4128_vm11, %v5123_v44, %v4125_v5  ;;  %v4162_v40 = vmul.f32 %v5125_v34, %v4160_v39  ;;  %vm4167_vm13 = vweird.f32 %v5125_v34 }
0x2824   :  { %v4134_v18 = vsel %vm4131_vm12, %v4133_v50, %v4129_v59  ;;  %vm4168_vm15 = vmor %vm4166_vm14, %vm4167_vm13 }
0x2825   :  { %v4163_v20 = vsub.f32 1.0, %v4162_v40  ;;  %v4135_v23 = vmul.f32 %v4134_v18, %v4110_v27  ;;  %v4947_v40 = vld [vmem:[#allocation19 + $0x3] ss:$0 sm:$0xff] }
0x2827   :  { %v4164_v11 = vmul.f32 %v5125_v34, %v4163_v20  ;;  %v4769_v17 = vclamps-f32 %v4135_v23, 1.0 }
0x2829   :  { %v4165_v19 = vadd.f32 %v5125_v34, %v4164_v11  ;;  %v4178_v32 = vadd.f32 1.0, %v4769_v17 }
0x282b   :  { %v4169_v24 = vsel %vm4168_vm15, %v5125_v34, %v4165_v19  ;;  %v4180_v3 = vmul.f32 %v4178_v32, %v4094_v33  ;;  %v4946_v34 = vld [vmem:[#allocation17 + $0x3] ss:$0 sm:$0xff] }
0x282c   :  { %v4174_v28 = vsel %vm4171_vm1, %v4173_v54, %v4169_v24 }
0x282d   :  { %v4175_v29 = vmul.f32 %v4174_v28, %v4150_v26 }
0x282f   :  { %v4770_v4 = vclamps-f32 %v4175_v29, 1.0 }
0x2831   :  { %v4179_v14 = vadd.f32 1.0, %v4770_v4 }
0x2833   :  { %v4181_v38 = vmul.f32 %v4179_v14, %v4095_v36 }
0x2835   :  { %v4201_v30 = vpack.c.bf16 %v4181_v38, %v4180_v3 }
0x2837   :  { %4261 = vmatmul.bf16.vlgmr.msrb.gmra.mxu2 %v4201_v30 }
0x28ba   :  { %v4262_v31 = vpop.f32.mrf.mxu2 }
0x28bb   :  { %v4263_v58 = vadd.f32 %v4945_v41, %v4262_v31 }
0x28bd   :  { %v4267_v42 = vadd.f32 %v4263_v58, %v6477_v60 }
0x28bf   :  { %v4273_v21 = vsel %vm235_vm0, %v4267_v42, 0.0 }
0x28c0   :  { %4274 = vadd.xlane.f32.xlu1 %v4273_v21 }
0x28c2   :  { %v4264_v43 = vpop.f32.mrf.mxu2 }
0x28c3   :  { %v4265_v63 = vadd.f32 %v4945_v41, %v4264_v43 }
0x28c5   :  { %v4268_v13 = vadd.f32 %v4265_v63, %v6479_v61 }
0x28c7   :  { %v4276_v46 = vsel %vm235_vm0, %v4268_v13, 0.0 }
0x28c8   :  { %4277 = vadd.xlane.f32.xlu0 %v4276_v46 }
0x2933   :  { %v4275_v22 = vpop.xlane.xlu1 %4274 }
0x2934   :  { %v4279_v25 = vmul.f32 %v4275_v22, %v5613_v10 }
0x2936   :  { %v4281_v49 = vsub.f32 %v4267_v42, %v4279_v25 }
0x2938   :  { %v4283_v8 = vmul.f32 %v4281_v49, %v4281_v49 }
0x293a   :  { %v4285_v16 = vsel %vm235_vm0, %v4283_v8, 0.0 }
0x293b   :  { %v4278_v45 = vpop.xlane.xlu0 %4277  ;;  %4286 = vadd.xlane.f32.xlu1 %v4285_v16 }
0x293c   :  { %v4280_v60 = vmul.f32 %v4278_v45, %v5613_v10 }
0x293e   :  { %v4282_v52 = vsub.f32 %v4268_v13, %v4280_v60 }
0x2940   :  { %v4284_v37 = vmul.f32 %v4282_v52, %v4282_v52 }
0x2942   :  { %v4288_v55 = vsel %vm235_vm0, %v4284_v37, 0.0 }
0x2943   :  { %4289 = vadd.xlane.f32.xlu0 %v4288_v55 }
0x29ae   :  { %v4287_v61 = vpop.xlane.xlu1 %4286 }
0x29af   :  { %v4291_v44 = vmul.f32 %v4287_v61, %v5613_v10 }
0x29b1   :  { %v4293_v2 = vadd.f32 1e-12, %v4291_v44 }
0x29b3   :  { %5126 = vrsqrt.f32 %v4293_v2  ;;  %vm4301_vm8 = vweird.f32 %v4293_v2 }
0x29b6   :  { %v4290_v56 = vpop.xlane.xlu0 %4289 }
0x29b7   :  { %v4292_v57 = vmul.f32 %v4290_v56, %v5613_v10 }
0x29b9   :  { %v5127_v39 = vpop.eup %5126  ;;  %v4294_v51 = vadd.f32 1e-12, %v4292_v57 }
0x29ba   :  { %v4296_v7 = vmul.f32 %v5127_v39, %v4293_v2  ;;  %vm4302_vm2 = vweird.f32 %v5127_v39 }
0x29bb   :  { %5128 = vrsqrt.f32 %v4294_v51  ;;  %vm4303_vm9 = vmor %vm4301_vm8, %vm4302_vm2  ;;  %vm4311_vm4 = vweird.f32 %v4294_v51 }
0x29bc   :  { %v4297_v53 = vmul.f32 %v5127_v39, %v4296_v7 }
0x29be   :  { %v4298_v6 = vmul.f32 0.5, %v4297_v53 }
0x29c0   :  { %v4299_v62 = vsub.f32 1.5, %v4298_v6 }
0x29c1   :  { %v5129_v1 = vpop.eup %5128 }
0x29c2   :  { %v4300_v5 = vmul.f32 %v5127_v39, %v4299_v62  ;;  %v4306_v48 = vmul.f32 %v5129_v1, %v4294_v51  ;;  %vm4312_vm3 = vweird.f32 %v5129_v1 }
0x29c3   :  { %vm4313_vm5 = vmor %vm4311_vm4, %vm4312_vm3 }
0x29c4   :  { %v4304_v59 = vsel %vm4303_vm9, %v5127_v39, %v4300_v5  ;;  %v4307_v50 = vmul.f32 %v5129_v1, %v4306_v48 }
0x29c5   :  { %v4315_v15 = vmul.f32 %v4304_v59, %v4281_v49 }
0x29c6   :  { %v4308_v18 = vmul.f32 0.5, %v4307_v50 }
0x29c7   :  { %v4320_v10 = vmul.f32 %v4946_v34, %v4315_v15 }
0x29c8   :  { %v4309_v27 = vsub.f32 1.5, %v4308_v18 }
0x29c9   :  { %v4325_v20 = vadd.f32 %v4947_v40, %v4320_v10 }
0x29ca   :  { %v4310_v9 = vmul.f32 %v5129_v1, %v4309_v27 }
0x29cb   :  { %v4327_v12 = vadd.f32 %v4325_v20, %v6329_v47 }
0x29cc   :  { %v4314_v23 = vsel %vm4313_vm5, %v5129_v1, %v4310_v9 }
0x29cd   :  { %v4316_v11 = vmul.f32 %v4314_v23, %v4282_v52  ;;  %4329 = vst.msk [vmem:[#allocation20] sm:$0xff] %vm235_vm0, %v4327_v12 }
0x29cf   :  { %v4321_v0 = vmul.f32 %v4946_v34, %v4316_v11 }
0x29d1   :  { %v4326_v19 = vadd.f32 %v4947_v40, %v4321_v0 }
0x29d3   :  { %v4328_v54 = vadd.f32 %v4326_v19, %v6331_v35 }
0x29d5   :  { %4330 = vst.msk [vmem:[#allocation20 + $0x8] sm:$0xff] %vm235_vm0, %v4328_v54 }
0x29d6   :  { %4343 = dma.vmem_to_hbm [thread:$0]  %s4336_s27, 256, %s4338_s10, [#allocation4], %s5442_s1, %s5442_s1, %s5443_s22  }
0x29d7   :  { %5430 = dma.done.wait [#allocation4], 256  }
0x29d8   :  { %5431 = vsyncadd [#allocation4], 4294967040 }
0x29d9   :  { %4348 = vsyncpa [#allocation3], 1 }
0x29da   :  { %4349 = vsyncpa [#allocation6], 1 }
0x29db   :  { %4350 = vsyncpa [#allocation9], 1 }
0x29dc   :  { %4351 = vsyncpa [#allocation12], 1 }
0x29dd   :  { %4352 = vsyncpa [#allocation15], 1 }
0x29de   :  { %4353 = vsyncpa [#allocation18], 1 }
0x29df   :  { %4354 = vsyncpa [#allocation4], 1 }

</bundles_post_ra>
